<compile_context>
chip_gen: v7x
topology: tpu7x:2x2x1
jax: 0.10.0
libtpu: 0.0.40
codegen_flags: <defaults>
</compile_context>

<pallas_src>
import jax
import jax.numpy as jnp
from jax.experimental import pallas as pl
from jax.experimental.pallas import tpu as pltpu

LATENT_DIM = 100            # reference cGAN latent size
N_CLASSES = 10
IN_PAD = 128                # latent(100) + one-hot(10) padded to a full lane group
H1, H2, H3, OUT = 256, 512, 1024, 28 * 28
BN_EPS = 1e-5
LEAKY_SLOPE = 0.2


def _generator_kernel(z_ref, y_ref,
                      w1_ref, g1_ref, be1_ref,
                      w2_ref, g2_ref, be2_ref,
                      w3_ref, g3_ref, be3_ref,
                      w4_ref, b4_ref,
                      out_ref):
    """Whole MLP (4 linears + 3 batchnorms + leaky-relu + tanh) in one kernel."""

    # --- fused one-hot + concat ------------------------------------------------
    # z_ref is (B, 128) f32 with lanes [100:128) zero.  One-hot of y lands in
    # lanes [100:110); adding it to the zero-padded z reproduces cat([z, onehot]).
    z = z_ref[...]
    col = jax.lax.broadcasted_iota(jnp.int32, z.shape, 1)
    onehot = (col == (y_ref[...] + LATENT_DIM)).astype(jnp.float32)
    x = z + onehot

    def linear(x, w_ref, bias=None):
        # MXU matmul in bf16 with f32 accumulation (weights stored bf16 in HBM).
        acc = jnp.dot(x.astype(jnp.bfloat16), w_ref[...],
                      preferred_element_type=jnp.float32)
        return acc if bias is None else acc + bias

    def bn_leaky(x, g_ref, be_ref):
        # Training-mode BatchNorm1d (batch mean, biased variance) + LeakyReLU(0.2).
        mean = jnp.mean(x, axis=0, keepdims=True)
        centered = x - mean
        var = jnp.mean(centered * centered, axis=0, keepdims=True)
        scale = jax.lax.rsqrt(var + BN_EPS) * g_ref[...]       # (1, N): gamma folded
        h = centered * scale + be_ref[...]
        return jnp.maximum(h, LEAKY_SLOPE * h)                 # leaky relu, slope<1

    # Biases b1..b3 are omitted: they are exactly cancelled by the BN mean subtract.
    h = bn_leaky(linear(x, w1_ref), g1_ref, be1_ref)
    h = bn_leaky(linear(h, w2_ref), g2_ref, be2_ref)
    h = bn_leaky(linear(h, w3_ref), g3_ref, be3_ref)
    out_ref[...] = jnp.tanh(linear(h, w4_ref, b4_ref[...]))


@jax.jit
def generator_forward(z, y, params):
    """z: (B, 100) f32, y: (B,) int labels -> (B, 1, 28, 28) images in [-1, 1]."""
    b = z.shape[0]
    # Zero-pad latent to 128 lanes (padded lanes meet zero rows of w1 -> no-op).
    z_pad = jnp.pad(z.astype(jnp.float32),
                    ((0, 0), (0, IN_PAD - LATENT_DIM)))
    y2d = y.astype(jnp.int32).reshape(b, 1)

    flat_inputs = (
        z_pad, y2d,
        params["w1"], params["g1"], params["be1"],
        params["w2"], params["g2"], params["be2"],
        params["w3"], params["g3"], params["be3"],
        params["w4"], params["b4"],
    )

    vmem_spec = pl.BlockSpec(memory_space=pltpu.MemorySpace.VMEM)
    out_flat = pl.pallas_call(
        _generator_kernel,
        out_shape=jax.ShapeDtypeStruct((b, OUT), jnp.float32),
        in_specs=[vmem_spec] * len(flat_inputs),
        out_specs=vmem_spec,
        # Tight VMEM budget: ~3 MiB of bf16 weights + small activations.
        # Stays well under v7x's 64 MiB physical VMEM.
        compiler_params=pltpu.CompilerParams(vmem_limit_bytes=24 << 20),
    )(*flat_inputs)

    # Matches PyTorch out.view(B, 1, 28, 28)  (NCHW).
    return out_flat.reshape(b, 1, 28, 28)


def init_params(key):
    """PyTorch-style Linear init: U(-1/sqrt(fan_in), 1/sqrt(fan_in)); BN gamma=1, beta=0."""
    dims = [(LATENT_DIM + N_CLASSES, H1), (H1, H2), (H2, H3), (H3, OUT)]
    params = {}
    keys = jax.random.split(key, 2 * len(dims))
    for i, (fan_in, fan_out) in enumerate(dims):
        bound = 1.0 / jnp.sqrt(jnp.float32(fan_in))
        w = jax.random.uniform(keys[2 * i], (fan_in, fan_out),
                               minval=-bound, maxval=bound, dtype=jnp.float32)
        if i == 0:
            # Zero-pad fan_in 110 -> 128 so the lane-padded input contributes nothing.
            w = jnp.pad(w, ((0, IN_PAD - fan_in), (0, 0)))
        params[f"w{i + 1}"] = w.astype(jnp.bfloat16)           # bf16 weights in HBM
        bias = jax.random.uniform(keys[2 * i + 1], (1, fan_out),
                                  minval=-bound, maxval=bound, dtype=jnp.float32)
        params[f"b{i + 1}"] = bias   # b1..b3 are dead (cancelled by BN) but kept for fidelity
    # BatchNorm affine params (PyTorch defaults).
    for i, h in enumerate([H1, H2, H3], start=1):
        params[f"g{i}"] = jnp.ones((1, h), jnp.float32)
        params[f"be{i}"] = jnp.zeros((1, h), jnp.float32)
    # TODO(synk): if sampling under model.eval(), pass running_mean/running_var and
    # switch bn_leaky() to use them instead of batch statistics.
    return params


if __name__ == "__main__":
    key = jax.random.PRNGKey(0)
    k_param, k_z, k_y = jax.random.split(key, 3)

    batch = 8
    params = init_params(k_param)
    z = jax.random.normal(k_z, (batch, LATENT_DIM), dtype=jnp.float32)
    y = jax.random.randint(k_y, (batch,), 0, N_CLASSES, dtype=jnp.int32)

    img = generator_forward(z, y, params)
    jax.block_until_ready(img)

    assert img.shape == (batch, 1, 28, 28), img.shape
    assert img.dtype == jnp.float32
    # tanh output must be in [-1, 1]
    assert bool(jnp.all(jnp.abs(img) <= 1.0 + 1e-6))
    print("KERNEL_OK")
</pallas_src>

<mosaic_0001>
module attributes {stable_mosaic.version = 11 : i64} {
  func.func @_generator_kernel(%arg0: memref<8x128xf32, #tpu.memory_space<vmem>>, %arg1: memref<8x1xi32, #tpu.memory_space<vmem>>, %arg2: memref<128x256xbf16, #tpu.memory_space<vmem>>, %arg3: memref<1x256xf32, #tpu.memory_space<vmem>>, %arg4: memref<1x256xf32, #tpu.memory_space<vmem>>, %arg5: memref<256x512xbf16, #tpu.memory_space<vmem>>, %arg6: memref<1x512xf32, #tpu.memory_space<vmem>>, %arg7: memref<1x512xf32, #tpu.memory_space<vmem>>, %arg8: memref<512x1024xbf16, #tpu.memory_space<vmem>>, %arg9: memref<1x1024xf32, #tpu.memory_space<vmem>>, %arg10: memref<1x1024xf32, #tpu.memory_space<vmem>>, %arg11: memref<1024x784xbf16, #tpu.memory_space<vmem>>, %arg12: memref<1x784xf32, #tpu.memory_space<vmem>>, %arg13: memref<8x784xf32, #tpu.memory_space<vmem>>) attributes {dimension_semantics = [], scalar_prefetch = 0 : i64, scratch_operands = 0 : i64, tpu.core_type = #tpu.core_type<tc>} {
    %c0 = arith.constant 0 : index
    %c0_0 = arith.constant 0 : index
    %0 = vector.load %arg0[%c0, %c0_0] : memref<8x128xf32, #tpu.memory_space<vmem>>, vector<8x128xf32>
    %1 = tpu.iota {dimensions = array<i32: 1>} : vector<8x128xi32>
    %c0_1 = arith.constant 0 : index
    %c0_2 = arith.constant 0 : index
    %2 = vector.load %arg1[%c0_1, %c0_2] : memref<8x1xi32, #tpu.memory_space<vmem>>, vector<8x1xi32>
    %c100_i32 = arith.constant 100 : i32
    %3 = vector.broadcast %c100_i32 : i32 to vector<8x1xi32>
    %4 = arith.addi %2, %3 : vector<8x1xi32>
    %5 = vector.broadcast %4 : vector<8x1xi32> to vector<8x128xi32>
    %6 = arith.cmpi eq, %1, %5 : vector<8x128xi32>
    %7 = arith.extui %6 : vector<8x128xi1> to vector<8x128xi32>
    %8 = arith.sitofp %7 : vector<8x128xi32> to vector<8x128xf32>
    %9 = arith.addf %0, %8 : vector<8x128xf32>
    %10 = arith.truncf %9 : vector<8x128xf32> to vector<8x128xbf16>
    %c0_3 = arith.constant 0 : index
    %c0_4 = arith.constant 0 : index
    %11 = vector.load %arg2[%c0_3, %c0_4] : memref<128x256xbf16, #tpu.memory_space<vmem>>, vector<128x256xbf16>
    %cst = arith.constant dense<0.000000e+00> : vector<8x256xf32>
    %12 = tpu.matmul %10, %11, %cst {dimension_numbers = #tpu.dot_dimension_numbers<[1], [0], [0], [1], [0, 0, 1, 1], [], []>} : vector<8x128xbf16>, vector<128x256xbf16>, vector<8x256xf32> -> vector<8x256xf32>
    %cst_5 = arith.constant dense<0.000000e+00> : vector<256xf32>
    %13 = vector.multi_reduction <add>, %12, %cst_5 [0] : vector<8x256xf32> to vector<256xf32>
    %14 = vector.shape_cast %13 : vector<256xf32> to vector<1x256xf32>
    %cst_6 = arith.constant 8.000000e+00 : f32
    %15 = vector.broadcast %cst_6 : f32 to vector<1x256xf32>
    %16 = arith.divf %14, %15 : vector<1x256xf32>
    %17 = vector.broadcast %16 : vector<1x256xf32> to vector<8x256xf32>
    %18 = arith.subf %12, %17 : vector<8x256xf32>
    %19 = arith.mulf %18, %18 : vector<8x256xf32>
    %cst_7 = arith.constant dense<0.000000e+00> : vector<256xf32>
    %20 = vector.multi_reduction <add>, %19, %cst_7 [0] : vector<8x256xf32> to vector<256xf32>
    %21 = vector.shape_cast %20 : vector<256xf32> to vector<1x256xf32>
    %cst_8 = arith.constant 8.000000e+00 : f32
    %22 = vector.broadcast %cst_8 : f32 to vector<1x256xf32>
    %23 = arith.divf %21, %22 : vector<1x256xf32>
    %cst_9 = arith.constant 9.99999974E-6 : f32
    %24 = vector.broadcast %cst_9 : f32 to vector<1x256xf32>
    %25 = arith.addf %23, %24 : vector<1x256xf32>
    %26 = math.rsqrt %25 : vector<1x256xf32>
    %c0_10 = arith.constant 0 : index
    %c0_11 = arith.constant 0 : index
    %27 = vector.load %arg3[%c0_10, %c0_11] : memref<1x256xf32, #tpu.memory_space<vmem>>, vector<1x256xf32>
    %28 = arith.mulf %26, %27 : vector<1x256xf32>
    %29 = vector.broadcast %28 : vector<1x256xf32> to vector<8x256xf32>
    %30 = arith.mulf %18, %29 : vector<8x256xf32>
    %c0_12 = arith.constant 0 : index
    %c0_13 = arith.constant 0 : index
    %31 = vector.load %arg4[%c0_12, %c0_13] : memref<1x256xf32, #tpu.memory_space<vmem>>, vector<1x256xf32>
    %32 = vector.broadcast %31 : vector<1x256xf32> to vector<8x256xf32>
    %33 = arith.addf %30, %32 : vector<8x256xf32>
    %cst_14 = arith.constant 2.000000e-01 : f32
    %34 = vector.broadcast %cst_14 : f32 to vector<8x256xf32>
    %35 = arith.mulf %34, %33 : vector<8x256xf32>
    %36 = arith.maximumf %33, %35 : vector<8x256xf32>
    %37 = arith.truncf %36 : vector<8x256xf32> to vector<8x256xbf16>
    %c0_15 = arith.constant 0 : index
    %c0_16 = arith.constant 0 : index
    %38 = vector.load %arg5[%c0_15, %c0_16] : memref<256x512xbf16, #tpu.memory_space<vmem>>, vector<256x512xbf16>
    %cst_17 = arith.constant dense<0.000000e+00> : vector<8x512xf32>
    %39 = tpu.matmul %37, %38, %cst_17 {dimension_numbers = #tpu.dot_dimension_numbers<[1], [0], [0], [1], [0, 0, 1, 1], [], []>} : vector<8x256xbf16>, vector<256x512xbf16>, vector<8x512xf32> -> vector<8x512xf32>
    %cst_18 = arith.constant dense<0.000000e+00> : vector<512xf32>
    %40 = vector.multi_reduction <add>, %39, %cst_18 [0] : vector<8x512xf32> to vector<512xf32>
    %41 = vector.shape_cast %40 : vector<512xf32> to vector<1x512xf32>
    %cst_19 = arith.constant 8.000000e+00 : f32
    %42 = vector.broadcast %cst_19 : f32 to vector<1x512xf32>
    %43 = arith.divf %41, %42 : vector<1x512xf32>
    %44 = vector.broadcast %43 : vector<1x512xf32> to vector<8x512xf32>
    %45 = arith.subf %39, %44 : vector<8x512xf32>
    %46 = arith.mulf %45, %45 : vector<8x512xf32>
    %cst_20 = arith.constant dense<0.000000e+00> : vector<512xf32>
    %47 = vector.multi_reduction <add>, %46, %cst_20 [0] : vector<8x512xf32> to vector<512xf32>
    %48 = vector.shape_cast %47 : vector<512xf32> to vector<1x512xf32>
    %cst_21 = arith.constant 8.000000e+00 : f32
    %49 = vector.broadcast %cst_21 : f32 to vector<1x512xf32>
    %50 = arith.divf %48, %49 : vector<1x512xf32>
    %cst_22 = arith.constant 9.99999974E-6 : f32
    %51 = vector.broadcast %cst_22 : f32 to vector<1x512xf32>
    %52 = arith.addf %50, %51 : vector<1x512xf32>
    %53 = math.rsqrt %52 : vector<1x512xf32>
    %c0_23 = arith.constant 0 : index
    %c0_24 = arith.constant 0 : index
    %54 = vector.load %arg6[%c0_23, %c0_24] : memref<1x512xf32, #tpu.memory_space<vmem>>, vector<1x512xf32>
    %55 = arith.mulf %53, %54 : vector<1x512xf32>
    %56 = vector.broadcast %55 : vector<1x512xf32> to vector<8x512xf32>
    %57 = arith.mulf %45, %56 : vector<8x512xf32>
    %c0_25 = arith.constant 0 : index
    %c0_26 = arith.constant 0 : index
    %58 = vector.load %arg7[%c0_25, %c0_26] : memref<1x512xf32, #tpu.memory_space<vmem>>, vector<1x512xf32>
    %59 = vector.broadcast %58 : vector<1x512xf32> to vector<8x512xf32>
    %60 = arith.addf %57, %59 : vector<8x512xf32>
    %cst_27 = arith.constant 2.000000e-01 : f32
    %61 = vector.broadcast %cst_27 : f32 to vector<8x512xf32>
    %62 = arith.mulf %61, %60 : vector<8x512xf32>
    %63 = arith.maximumf %60, %62 : vector<8x512xf32>
    %64 = arith.truncf %63 : vector<8x512xf32> to vector<8x512xbf16>
    %c0_28 = arith.constant 0 : index
    %c0_29 = arith.constant 0 : index
    %65 = vector.load %arg8[%c0_28, %c0_29] : memref<512x1024xbf16, #tpu.memory_space<vmem>>, vector<512x1024xbf16>
    %cst_30 = arith.constant dense<0.000000e+00> : vector<8x1024xf32>
    %66 = tpu.matmul %64, %65, %cst_30 {dimension_numbers = #tpu.dot_dimension_numbers<[1], [0], [0], [1], [0, 0, 1, 1], [], []>} : vector<8x512xbf16>, vector<512x1024xbf16>, vector<8x1024xf32> -> vector<8x1024xf32>
    %cst_31 = arith.constant dense<0.000000e+00> : vector<1024xf32>
    %67 = vector.multi_reduction <add>, %66, %cst_31 [0] : vector<8x1024xf32> to vector<1024xf32>
    %68 = vector.shape_cast %67 : vector<1024xf32> to vector<1x1024xf32>
    %cst_32 = arith.constant 8.000000e+00 : f32
    %69 = vector.broadcast %cst_32 : f32 to vector<1x1024xf32>
    %70 = arith.divf %68, %69 : vector<1x1024xf32>
    %71 = vector.broadcast %70 : vector<1x1024xf32> to vector<8x1024xf32>
    %72 = arith.subf %66, %71 : vector<8x1024xf32>
    %73 = arith.mulf %72, %72 : vector<8x1024xf32>
    %cst_33 = arith.constant dense<0.000000e+00> : vector<1024xf32>
    %74 = vector.multi_reduction <add>, %73, %cst_33 [0] : vector<8x1024xf32> to vector<1024xf32>
    %75 = vector.shape_cast %74 : vector<1024xf32> to vector<1x1024xf32>
    %cst_34 = arith.constant 8.000000e+00 : f32
    %76 = vector.broadcast %cst_34 : f32 to vector<1x1024xf32>
    %77 = arith.divf %75, %76 : vector<1x1024xf32>
    %cst_35 = arith.constant 9.99999974E-6 : f32
    %78 = vector.broadcast %cst_35 : f32 to vector<1x1024xf32>
    %79 = arith.addf %77, %78 : vector<1x1024xf32>
    %80 = math.rsqrt %79 : vector<1x1024xf32>
    %c0_36 = arith.constant 0 : index
    %c0_37 = arith.constant 0 : index
    %81 = vector.load %arg9[%c0_36, %c0_37] : memref<1x1024xf32, #tpu.memory_space<vmem>>, vector<1x1024xf32>
    %82 = arith.mulf %80, %81 : vector<1x1024xf32>
    %83 = vector.broadcast %82 : vector<1x1024xf32> to vector<8x1024xf32>
    %84 = arith.mulf %72, %83 : vector<8x1024xf32>
    %c0_38 = arith.constant 0 : index
    %c0_39 = arith.constant 0 : index
    %85 = vector.load %arg10[%c0_38, %c0_39] : memref<1x1024xf32, #tpu.memory_space<vmem>>, vector<1x1024xf32>
    %86 = vector.broadcast %85 : vector<1x1024xf32> to vector<8x1024xf32>
    %87 = arith.addf %84, %86 : vector<8x1024xf32>
    %cst_40 = arith.constant 2.000000e-01 : f32
    %88 = vector.broadcast %cst_40 : f32 to vector<8x1024xf32>
    %89 = arith.mulf %88, %87 : vector<8x1024xf32>
    %90 = arith.maximumf %87, %89 : vector<8x1024xf32>
    %c0_41 = arith.constant 0 : index
    %c0_42 = arith.constant 0 : index
    %91 = vector.load %arg12[%c0_41, %c0_42] : memref<1x784xf32, #tpu.memory_space<vmem>>, vector<1x784xf32>
    %92 = arith.truncf %90 : vector<8x1024xf32> to vector<8x1024xbf16>
    %c0_43 = arith.constant 0 : index
    %c0_44 = arith.constant 0 : index
    %93 = vector.load %arg11[%c0_43, %c0_44] : memref<1024x784xbf16, #tpu.memory_space<vmem>>, vector<1024x784xbf16>
    %cst_45 = arith.constant dense<0.000000e+00> : vector<8x784xf32>
    %94 = tpu.matmul %92, %93, %cst_45 {dimension_numbers = #tpu.dot_dimension_numbers<[1], [0], [0], [1], [0, 0, 1, 1], [], []>} : vector<8x1024xbf16>, vector<1024x784xbf16>, vector<8x784xf32> -> vector<8x784xf32>
    %95 = vector.broadcast %91 : vector<1x784xf32> to vector<8x784xf32>
    %96 = arith.addf %94, %95 : vector<8x784xf32>
    %97 = math.tanh %96 : vector<8x784xf32>
    %c0_46 = arith.constant 0 : index
    %c0_47 = arith.constant 0 : index
    %98 = vector.load %arg13[%c0_46, %c0_47] : memref<8x784xf32, #tpu.memory_space<vmem>>, vector<8x784xf32>
    tpu.vector_store %arg13[%c0_46, %c0_47], %97 {strides = array<i32>} : memref<8x784xf32, #tpu.memory_space<vmem>>, vector<8x784xf32>,
    return
  }
}

</mosaic_0001>

<bundles_post_ra>
// kernel: generator_forward.1
= control target key start
LH: loop header
LB: loop body
LE: loop exit
PB: predicated region body
PF: predicated region fallthrough
CT: control target
= control target key end

     0   :  { %v8332_v0 = vmov 0   ;;  %v46_v20 = vlaneseq  ;;  %v8333_v24 = vmov 0.0   ;;  %vm6588_vm1 = vcmask 130048   ;;  %s11065_s1 = inlined_call_operand.vmem [shape: s32[8,1], index: 1, kind: input, shape index: {}]   ;;  %s11066_s2 = inlined_call_operand.vmem [shape: bf16[128,256], index: 2, kind: input, shape index: {}]   ;;  %s11067_s5 = inlined_call_operand.vmem [shape: bf16[256,512], index: 5, kind: input, shape index: {}]   ;;  %s11068_s0 = inlined_call_operand.vmem [shape: f32[8,128], index: 0, kind: input, shape index: {}]   ;;  %s11069_s8 = inlined_call_operand.vmem [shape: bf16[512,1024], index: 8, kind: input, shape index: {}]   ;;  %s11070_s3 = inlined_call_operand.vmem [shape: f32[1,256], index: 3, kind: input, shape index: {}]   ;;  %s11071_s4 = inlined_call_operand.vmem [shape: f32[1,256], index: 4, kind: input, shape index: {}]   ;;  %s11072_s6 = inlined_call_operand.vmem [shape: f32[1,512], index: 6, kind: input, shape index: {}]   ;;  %s11073_s7 = inlined_call_operand.vmem [shape: f32[1,512], index: 7, kind: input, shape index: {}]   ;;  %s11074_s11 = inlined_call_operand.vmem [shape: bf16[1024,784], index: 11, kind: input, shape index: {}]   ;;  %s11075_s9 = inlined_call_operand.vmem [shape: f32[1,1024], index: 9, kind: input, shape index: {}]   ;;  %s11076_s10 = inlined_call_operand.vmem [shape: f32[1,1024], index: 10, kind: input, shape index: {}]   ;;  %s11077_s12 = inlined_call_operand.vmem [shape: f32[1,784], index: 12, kind: input, shape index: {}]   ;;  %s11078_s13 = inlined_call_operand.vmem [shape: f32[8,784], index: 13, kind: output, shape index: {}]  }
   0x1   :  { %7527 = vset.pattern.permute.xlu0 %v8332_v0  ;;  %v48_v1 = vld [vmem:[%s11065_s1] sm:$0xff]  ;;  %186 = vmatprep.mubr.bf16.mxu0 %v8332_v0  ;;  %v7531_v5 = vld [vmem:[%s11066_s2 + $0x14] ss:$8 sps:$4 sm:$0xff]   ;;  %v7533_v6 = vld [vmem:[%s11066_s2 + $0x10] ss:$8 sps:$4 sm:$0xff]  }
   0x2   :  { %v49_v2 = vadd.s32 100, %v48_v1  ;;  %v7528_v3 = vld [vmem:[%s11066_s2 + $0x4] ss:$8 sps:$4 sm:$0xff]   ;;  %v7530_v4 = vld [vmem:[%s11066_s2] ss:$8 sps:$4 sm:$0xff]   ;;  %v47_v21 = vand.u32 127, %v46_v20 }
   0x3   :  { %154 = vmatprep.subr.bf16.mxu0 %v7528_v3  ;;  %v7534_v7 = vld [vmem:[%s11066_s2 + $0x24] ss:$8 sps:$4 sm:$0xff]   ;;  %v7536_v8 = vld [vmem:[%s11066_s2 + $0x20] ss:$8 sps:$4 sm:$0xff]   ;;  %v7537_v9 = vld [vmem:[%s11066_s2 + $0x34] ss:$8 sps:$4 sm:$0xff]  }
   0x4   :  { %51 = vperm.xlu0 %7527, %v49_v2   ;;  %155 = vmatpush1.bf16.msra.mxu0 %v7530_v4  ;;  %v7539_v10 = vld [vmem:[%s11066_s2 + $0x30] ss:$8 sps:$4 sm:$0xff]   ;;  %v7540_v11 = vld [vmem:[%s11066_s2 + $0x44] ss:$8 sps:$4 sm:$0xff]   ;;  %v7542_v12 = vld [vmem:[%s11066_s2 + $0x40] ss:$8 sps:$4 sm:$0xff]  }
   0x5   :  { %156 = vmatprep.subr.bf16.mxu0 %v7531_v5  ;;  %v7543_v13 = vld [vmem:[%s11066_s2 + $0x54] ss:$8 sps:$4 sm:$0xff]   ;;  %v7545_v14 = vld [vmem:[%s11066_s2 + $0x50] ss:$8 sps:$4 sm:$0xff]   ;;  %v7546_v15 = vld [vmem:[%s11066_s2 + $0x64] ss:$8 sps:$4 sm:$0xff]  }
   0x6   :  { %v7548_v16 = vld [vmem:[%s11066_s2 + $0x60] ss:$8 sps:$4 sm:$0xff]   ;;  %v7549_v17 = vld [vmem:[%s11066_s2 + $0x74] ss:$8 sps:$4 sm:$0xff]   ;;  %v7551_v18 = vld [vmem:[%s11066_s2 + $0x70] ss:$8 sps:$4 sm:$0xff]  }
   0x7   :  { %v7554_v19 = vld [vmem:[%s11067_s5 + $0x4] ss:$16 sps:$4 sm:$0xff]   ;;  %v7552_v27 = vld [vmem:[%s11067_s5] ss:$16 sps:$4 sm:$0xff]   ;;  %v7602_v59 = vld [vmem:[%s11067_s5 + $0xc] ss:$16 sps:$4 sm:$0xff]  }
   0x8   :  { %157 = vmatpush1.bf16.msra.mxu0 %v7533_v6  ;;  %v45_v23 = vld [vmem:[%s11068_s0] sm:$0xff] }
   0x9   :  { %158 = vmatprep.subr.bf16.mxu0 %v7534_v7  ;;  %v7557_v29 = vld [vmem:[%s11067_s5 + $0x24] ss:$16 sps:$4 sm:$0xff]   ;;  %v7555_v30 = vld [vmem:[%s11067_s5 + $0x20] ss:$16 sps:$4 sm:$0xff]  }
   0xa   :  { %v7560_v31 = vld [vmem:[%s11067_s5 + $0x44] ss:$16 sps:$4 sm:$0xff]   ;;  %v7558_v32 = vld [vmem:[%s11067_s5 + $0x40] ss:$16 sps:$4 sm:$0xff]  }
   0xb   :  { %v7563_v33 = vld [vmem:[%s11067_s5 + $0x64] ss:$16 sps:$4 sm:$0xff]   ;;  %v7561_v34 = vld [vmem:[%s11067_s5 + $0x60] ss:$16 sps:$4 sm:$0xff]  }
   0xc   :  { %159 = vmatpush1.bf16.msra.mxu0 %v7536_v8  ;;  %v7566_v35 = vld [vmem:[%s11067_s5 + $0x84] ss:$16 sps:$4 sm:$0xff]   ;;  %v7564_v36 = vld [vmem:[%s11067_s5 + $0x80] ss:$16 sps:$4 sm:$0xff]  }
   0xd   :  { %160 = vmatprep.subr.bf16.mxu0 %v7537_v9  ;;  %v7569_v37 = vld [vmem:[%s11067_s5 + $0xa4] ss:$16 sps:$4 sm:$0xff]   ;;  %v7567_v38 = vld [vmem:[%s11067_s5 + $0xa0] ss:$16 sps:$4 sm:$0xff]  }
   0xe   :  { %v7572_v39 = vld [vmem:[%s11067_s5 + $0xc4] ss:$16 sps:$4 sm:$0xff]   ;;  %v7570_v40 = vld [vmem:[%s11067_s5 + $0xc0] ss:$16 sps:$4 sm:$0xff]  }
   0xf   :  { %v7575_v41 = vld [vmem:[%s11067_s5 + $0xe4] ss:$16 sps:$4 sm:$0xff]   ;;  %v7573_v42 = vld [vmem:[%s11067_s5 + $0xe0] ss:$16 sps:$4 sm:$0xff]  }
  0x10   :  { %161 = vmatpush1.bf16.msra.mxu0 %v7539_v10  ;;  %v7578_v43 = vld [vmem:[%s11067_s5 + $0x104] ss:$16 sps:$4 sm:$0xff]   ;;  %v7576_v44 = vld [vmem:[%s11067_s5 + $0x100] ss:$16 sps:$4 sm:$0xff]  }
  0x11   :  { %162 = vmatprep.subr.bf16.mxu0 %v7540_v11  ;;  %v7581_v45 = vld [vmem:[%s11067_s5 + $0x124] ss:$16 sps:$4 sm:$0xff]   ;;  %v7579_v46 = vld [vmem:[%s11067_s5 + $0x120] ss:$16 sps:$4 sm:$0xff]  }
  0x12   :  { %v7584_v47 = vld [vmem:[%s11067_s5 + $0x144] ss:$16 sps:$4 sm:$0xff]   ;;  %v7582_v48 = vld [vmem:[%s11067_s5 + $0x140] ss:$16 sps:$4 sm:$0xff]  }
  0x13   :  { %v7587_v49 = vld [vmem:[%s11067_s5 + $0x164] ss:$16 sps:$4 sm:$0xff]   ;;  %v7585_v50 = vld [vmem:[%s11067_s5 + $0x160] ss:$16 sps:$4 sm:$0xff]  }
  0x14   :  { %163 = vmatpush1.bf16.msra.mxu0 %v7542_v12  ;;  %v7590_v51 = vld [vmem:[%s11067_s5 + $0x184] ss:$16 sps:$4 sm:$0xff]   ;;  %v7588_v52 = vld [vmem:[%s11067_s5 + $0x180] ss:$16 sps:$4 sm:$0xff]  }
  0x15   :  { %164 = vmatprep.subr.bf16.mxu0 %v7543_v13  ;;  %v7593_v53 = vld [vmem:[%s11067_s5 + $0x1a4] ss:$16 sps:$4 sm:$0xff]   ;;  %v7591_v54 = vld [vmem:[%s11067_s5 + $0x1a0] ss:$16 sps:$4 sm:$0xff]  }
  0x16   :  { %v7596_v55 = vld [vmem:[%s11067_s5 + $0x1c4] ss:$16 sps:$4 sm:$0xff]   ;;  %v7594_v56 = vld [vmem:[%s11067_s5 + $0x1c0] ss:$16 sps:$4 sm:$0xff]  }
  0x17   :  { %v7597_v57 = vld [vmem:[%s11067_s5 + $0x1e0] ss:$16 sps:$4 sm:$0xff]   ;;  %v7599_v58 = vld [vmem:[%s11067_s5 + $0x1e4] ss:$16 sps:$4 sm:$0xff]  }
  0x18   :  { %165 = vmatpush1.bf16.msra.mxu0 %v7545_v14  ;;  %v898_v60 = vld [vmem:[%s11069_s8] sm:$0xff] }
  0x19   :  { %166 = vmatprep.subr.bf16.mxu0 %v7546_v15  ;;  %v902_v61 = vld [vmem:[%s11069_s8 + $0x20] sm:$0xff] }
  0x1a   :  { %v6676_v63 = vcombine.high %v898_v60, %v902_v61  ;;  %v6675_v0 = vcombine.low %v898_v60, %v902_v61 }
  0x1c   :  { %167 = vmatpush1.bf16.msra.mxu0 %v7548_v16  ;;  %2434 = vmatprep.subr.bf16.mxu1 %v6676_v63 }
  0x1d   :  { %168 = vmatprep.subr.bf16.mxu0 %v7549_v17  ;;  %2435 = vmatpush1.bf16.msra.mxu1 %v6675_v0  ;;  %v7605_v0 = vld [vmem:[%s11067_s5 + $0x2c] ss:$16 sps:$4 sm:$0xff]  }
  0x20   :  { %169 = vmatpush1.bf16.msra.mxu0 %v7551_v18 }
  0x21   :  { %660 = vmatprep.subr.bf16.mxu0 %v7554_v19 }
  0x83   :  { %v52_v22 = vpop.permute.xlu0 %51 }
  0x84   :  { %vm53_vm0 = vcmp.eq.s32.totalorder %v47_v21, %v52_v22 }
  0x85   :  { %v6594_v25 = vsel %vm53_vm0, 1.0, %v8333_v24 }
  0x86   :  { %v56_v26 = vadd.f32 %v6594_v25, %v45_v23 }
  0x88   :  { %v57_v28 = vpack.c.bf16 %v56_v26, %v56_v26 }
  0x8a   :  { %187 = vmatmul.mubr.bf16.vlgmr.msra.gmra.mrb[0].mxu0 %v57_v28 }
  0x8b   :  { %661 = vmatpush1.bf16.msra.mxu0 %v7552_v27 }
  0x8c   :  { %662 = vmatprep.subr.bf16.mxu0 %v7557_v29 }
  0x8f   :  { %663 = vmatpush1.bf16.msra.mxu0 %v7555_v30 }
  0x90   :  { %664 = vmatprep.subr.bf16.mxu0 %v7560_v31 }
  0x93   :  { %665 = vmatpush1.bf16.msra.mxu0 %v7558_v32 }
  0x94   :  { %666 = vmatprep.subr.bf16.mxu0 %v7563_v33 }
  0x97   :  { %667 = vmatpush1.bf16.msra.mxu0 %v7561_v34 }
  0x98   :  { %668 = vmatprep.subr.bf16.mxu0 %v7566_v35 }
  0x9b   :  { %669 = vmatpush1.bf16.msra.mxu0 %v7564_v36 }
  0x9c   :  { %670 = vmatprep.subr.bf16.mxu0 %v7569_v37 }
  0x9f   :  { %671 = vmatpush1.bf16.msra.mxu0 %v7567_v38  ;;  %v8565_v38 = vshrl.u32 %v46_v20, 7  ;;  %v256_v20 = vld [vmem:[%s11071_s4] sm:$0x3] }
  0xa0   :  { %672 = vmatprep.subr.bf16.mxu0 %v7572_v39 }
  0xa3   :  { %673 = vmatpush1.bf16.msra.mxu0 %v7570_v40  ;;  %v8568_v40 = vsub.s32 0, %v8565_v38 }
  0xa4   :  { %674 = vmatprep.subr.bf16.mxu0 %v7575_v41  ;;  %v232_v41 = vld [vmem:[%s11070_s3] sm:$0x3] }
  0xa7   :  { %675 = vmatpush1.bf16.msra.mxu0 %v7573_v42  ;;  %v8574_v42 = vsub.s32 1, %v8565_v38 }
  0xa8   :  { %676 = vmatprep.subr.bf16.mxu0 %v7578_v43  ;;  %v237_v43 = vrot.slane %v232_v41, %v8568_v40 }
  0xab   :  { %677 = vmatpush1.bf16.msra.mxu0 %v7576_v44  ;;  %v241_v44 = vrot.slane %v232_v41, %v8574_v42  ;;  %v911_v41 = vld [vmem:[%s11069_s8 + $0x68] sm:$0xff] }
  0xac   :  { %678 = vmatprep.subr.bf16.mxu0 %v7581_v45 }
  0xaf   :  { %679 = vmatpush1.bf16.msra.mxu0 %v7579_v46 }
  0xb0   :  { %680 = vmatprep.subr.bf16.mxu0 %v7584_v47 }
  0xb3   :  { %681 = vmatpush1.bf16.msra.mxu0 %v7582_v48 }
  0xb4   :  { %682 = vmatprep.subr.bf16.mxu0 %v7587_v49 }
  0xb7   :  { %683 = vmatpush1.bf16.msra.mxu0 %v7585_v50  ;;  %v261_v50 = vrot.slane %v256_v20, %v8568_v40 }
  0xb8   :  { %684 = vmatprep.subr.bf16.mxu0 %v7590_v51 }
  0xbb   :  { %685 = vmatpush1.bf16.msra.mxu0 %v7588_v52  ;;  %v265_v52 = vrot.slane %v256_v20, %v8574_v42  ;;  %v914_v20 = vld [vmem:[%s11069_s8 + $0x80] sm:$0xff] }
  0xbc   :  { %686 = vmatprep.subr.bf16.mxu0 %v7593_v53 }
  0xbf   :  { %687 = vmatpush1.bf16.msra.mxu0 %v7591_v54 }
  0xc0   :  { %688 = vmatprep.subr.bf16.mxu0 %v7596_v55 }
  0xc3   :  { %689 = vmatpush1.bf16.msra.mxu0 %v7594_v56 }
  0xc4   :  { %690 = vmatprep.subr.bf16.mxu0 %v7599_v58 }
  0xc7   :  { %691 = vmatpush1.bf16.msra.mxu0 %v7597_v57 }
  0xc8   :  { %701 = vmatprep.subr.bf16.mxu0 %v7602_v59 }
 0x15d   :  { %v188_v62 = vpop.f32.mrb[0].mxu0 }
 0x15e   :  { %v195_v1 = vrot.slane %v188_v62, 4  ;;  %v190_v2 = vpop.f32.mrb[1].mxu0 }
 0x15f   :  { %v201_v3 = vrot.slane %v190_v2, 4  ;;  %v192_v4 = vpop.f32.mrb[2].mxu0 }
 0x160   :  { %v196_v5 = vadd.f32 %v195_v1, %v188_v62  ;;  %v193_v6 = vpop.f32.mrb[3].mxu0  ;;  %v7603_v1 = vld [vmem:[%s11067_s5 + $0x28] ss:$16 sps:$4 sm:$0xff]   ;;  %v7611_v4 = vld [vmem:[%s11067_s5 + $0x6c] ss:$16 sps:$4 sm:$0xff]  }
 0x161   :  { %v202_v7 = vadd.f32 %v201_v3, %v190_v2  ;;  %v7606_v3 = vld [vmem:[%s11067_s5 + $0x48] ss:$16 sps:$4 sm:$0xff]   ;;  %v7614_v6 = vld [vmem:[%s11067_s5 + $0x8c] ss:$16 sps:$4 sm:$0xff]  }
 0x162   :  { %v197_v8 = vrot.slane %v196_v5, 2 }
 0x163   :  { %v203_v9 = vrot.slane %v202_v7, 2 }
 0x164   :  { %v198_v10 = vadd.f32 %v197_v8, %v196_v5  ;;  %v7609_v5 = vld [vmem:[%s11067_s5 + $0x68] ss:$16 sps:$4 sm:$0xff]   ;;  %v7617_v8 = vld [vmem:[%s11067_s5 + $0xac] ss:$16 sps:$4 sm:$0xff]  }
 0x165   :  { %v204_v11 = vadd.f32 %v203_v9, %v202_v7  ;;  %v7612_v7 = vld [vmem:[%s11067_s5 + $0x88] ss:$16 sps:$4 sm:$0xff]  }
 0x166   :  { %v199_v12 = vrot.slane %v198_v10, 1  ;;  %v7615_v9 = vld [vmem:[%s11067_s5 + $0xa8] ss:$16 sps:$4 sm:$0xff]  }
 0x167   :  { %v205_v13 = vrot.slane %v204_v11, 1 }
 0x168   :  { %v200_v14 = vadd.f32 %v199_v12, %v198_v10  ;;  %v7620_v10 = vld [vmem:[%s11067_s5 + $0xcc] ss:$16 sps:$4 sm:$0xff]  }
 0x169   :  { %v206_v15 = vadd.f32 %v205_v13, %v204_v11  ;;  %v7618_v11 = vld [vmem:[%s11067_s5 + $0xc8] ss:$16 sps:$4 sm:$0xff]   ;;  %v7623_v12 = vld [vmem:[%s11067_s5 + $0xec] ss:$16 sps:$4 sm:$0xff]  }
 0x16a   :  { %v208_v16 = vmul.f32 0.125, %v200_v14  ;;  %v7621_v13 = vld [vmem:[%s11067_s5 + $0xe8] ss:$16 sps:$4 sm:$0xff]   ;;  %v7626_v14 = vld [vmem:[%s11067_s5 + $0x10c] ss:$16 sps:$4 sm:$0xff]  }
 0x16b   :  { %v209_v17 = vmul.f32 0.125, %v206_v15  ;;  %v7624_v15 = vld [vmem:[%s11067_s5 + $0x108] ss:$16 sps:$4 sm:$0xff]  }
 0x16c   :  { %v210_v18 = vsub.f32 %v188_v62, %v208_v16  ;;  %v7600_v62 = vld [vmem:[%s11067_s5 + $0x8] ss:$16 sps:$4 sm:$0xff]   ;;  %v7629_v16 = vld [vmem:[%s11067_s5 + $0x12c] ss:$16 sps:$4 sm:$0xff]  }
 0x16d   :  { %v211_v19 = vsub.f32 %v190_v2, %v209_v17  ;;  %v7608_v2 = vld [vmem:[%s11067_s5 + $0x4c] ss:$16 sps:$4 sm:$0xff]   ;;  %v7627_v17 = vld [vmem:[%s11067_s5 + $0x128] ss:$16 sps:$4 sm:$0xff]  }
 0x16e   :  { %v212_v21 = vmul.f32 %v210_v18, %v210_v18 }
 0x16f   :  { %v213_v22 = vmul.f32 %v211_v19, %v211_v19 }
 0x170   :  { %v214_v23 = vrot.slane %v212_v21, 4 }
 0x171   :  { %v220_v24 = vrot.slane %v213_v22, 4 }
 0x172   :  { %v215_v25 = vadd.f32 %v214_v23, %v212_v21  ;;  %v7635_v21 = vld [vmem:[%s11067_s5 + $0x16c] ss:$16 sps:$4 sm:$0xff]  }
 0x173   :  { %v221_v26 = vadd.f32 %v220_v24, %v213_v22  ;;  %v7633_v22 = vld [vmem:[%s11067_s5 + $0x168] ss:$16 sps:$4 sm:$0xff]   ;;  %v7638_v23 = vld [vmem:[%s11067_s5 + $0x18c] ss:$16 sps:$4 sm:$0xff]  }
 0x174   :  { %v216_v27 = vrot.slane %v215_v25, 2  ;;  %v7636_v24 = vld [vmem:[%s11067_s5 + $0x188] ss:$16 sps:$4 sm:$0xff]  }
 0x175   :  { %v222_v28 = vrot.slane %v221_v26, 2 }
 0x176   :  { %v217_v29 = vadd.f32 %v216_v27, %v215_v25  ;;  %v7641_v25 = vld [vmem:[%s11067_s5 + $0x1ac] ss:$16 sps:$4 sm:$0xff]  }
 0x177   :  { %v223_v30 = vadd.f32 %v222_v28, %v221_v26  ;;  %v7639_v26 = vld [vmem:[%s11067_s5 + $0x1a8] ss:$16 sps:$4 sm:$0xff]   ;;  %v7644_v27 = vld [vmem:[%s11067_s5 + $0x1cc] ss:$16 sps:$4 sm:$0xff]  }
 0x178   :  { %v218_v31 = vrot.slane %v217_v29, 1  ;;  %v7642_v28 = vld [vmem:[%s11067_s5 + $0x1c8] ss:$16 sps:$4 sm:$0xff]  }
 0x179   :  { %v224_v32 = vrot.slane %v223_v30, 1 }
 0x17a   :  { %v219_v33 = vadd.f32 %v218_v31, %v217_v29  ;;  %v7647_v29 = vld [vmem:[%s11067_s5 + $0x1ec] ss:$16 sps:$4 sm:$0xff]  }
 0x17b   :  { %v225_v34 = vadd.f32 %v224_v32, %v223_v30  ;;  %v899_v30 = vld [vmem:[%s11069_s8 + $0x8] sm:$0xff] }
 0x17c   :  { %v226_v35 = vmul.f32 0.125, %v219_v33  ;;  %v903_v31 = vld [vmem:[%s11069_s8 + $0x28] sm:$0xff] }
 0x17d   :  { %v227_v36 = vmul.f32 0.125, %v225_v34  ;;  %v7645_v32 = vld [vmem:[%s11067_s5 + $0x1e8] ss:$16 sps:$4 sm:$0xff]   ;;  %v6678_v33 = vcombine.high %v899_v30, %v903_v31  ;;  %v6677_v34 = vcombine.low %v899_v30, %v903_v31  ;;  %v962_v30 = vld [vmem:[%s11069_s8 + $0x200] sm:$0xff] }
 0x17e   :  { %v228_v37 = vadd.f32 1e-05, %v226_v35  ;;  %v906_v35 = vld [vmem:[%s11069_s8 + $0x40] sm:$0xff] }
 0x17f   :  { %v229_v39 = vadd.f32 1e-05, %v227_v36  ;;  %v910_v36 = vld [vmem:[%s11069_s8 + $0x60] sm:$0xff] }
 0x180   :  { %8288 = vrsqrt.f32 %v228_v37  ;;  %v907_v37 = vld [vmem:[%s11069_s8 + $0x48] sm:$0xff]  ;;  %v966_v31 = vld [vmem:[%s11069_s8 + $0x220] sm:$0xff] }
 0x181   :  { %8290 = vrsqrt.f32 %v229_v39  ;;  %v6684_v39 = vcombine.high %v906_v35, %v910_v36 }
 0x183   :  { %2436 = vmatprep.subr.bf16.mxu1 %v6684_v39  ;;  %v970_v39 = vld [vmem:[%s11069_s8 + $0x240] sm:$0xff] }
 0x18a   :  { %v8289_v45 = vpop.eup %8288 }
 0x18b   :  { %v8291_v46 = vpop.eup %8290  ;;  %v244_v47 = vmul.f32 %v8289_v45, %v237_v43  ;;  %v6685_v43 = vcombine.low %v907_v37, %v911_v41  ;;  %v6683_v45 = vcombine.low %v906_v35, %v910_v36 }
 0x18c   :  { %v245_v48 = vmul.f32 %v8291_v46, %v241_v44  ;;  %v6686_v44 = vcombine.high %v907_v37, %v911_v41  ;;  %v918_v46 = vld [vmem:[%s11069_s8 + $0xa0] sm:$0xff]  ;;  %v6739_v37 = vcombine.low %v962_v30, %v966_v31 }
 0x18d   :  { %v249_v49 = vrot.slane %v244_v47, %v8568_v40  ;;  %2437 = vmatpush1.bf16.msra.mxu1 %v6683_v45  ;;  %v915_v47 = vld [vmem:[%s11069_s8 + $0x88] sm:$0xff]  ;;  %v974_v41 = vld [vmem:[%s11069_s8 + $0x260] sm:$0xff] }
 0x18e   :  { %v253_v51 = vrot.slane %v245_v48, %v8568_v40  ;;  %v6692_v48 = vcombine.high %v914_v20, %v918_v46  ;;  %v975_v45 = vld [vmem:[%s11069_s8 + $0x268] sm:$0xff] }
 0x18f   :  { %v254_v53 = vmul.f32 %v249_v49, %v210_v18  ;;  %v7632_v18 = vld [vmem:[%s11067_s5 + $0x14c] ss:$16 sps:$4 sm:$0xff]  }
 0x190   :  { %v255_v54 = vmul.f32 %v253_v51, %v211_v19  ;;  %v7630_v19 = vld [vmem:[%s11067_s5 + $0x148] ss:$16 sps:$4 sm:$0xff]   ;;  %2438 = vmatprep.subr.bf16.mxu1 %v6692_v48  ;;  %v978_v48 = vld [vmem:[%s11069_s8 + $0x280] sm:$0xff] }
 0x191   :  { %v268_v55 = vadd.f32 %v261_v50, %v254_v53  ;;  %v919_v49 = vld [vmem:[%s11069_s8 + $0xa8] sm:$0xff]  ;;  %v922_v53 = vld [vmem:[%s11069_s8 + $0xc0] sm:$0xff] }
 0x192   :  { %v269_v56 = vadd.f32 %v265_v52, %v255_v54  ;;  %v6693_v50 = vcombine.low %v915_v47, %v919_v49  ;;  %v6694_v51 = vcombine.high %v915_v47, %v919_v49  ;;  %v6691_v52 = vcombine.low %v914_v20, %v918_v46  ;;  %v926_v54 = vld [vmem:[%s11069_s8 + $0xe0] sm:$0xff] }
 0x193   :  { %v270_v57 = vmul.f32 0.2, %v268_v55  ;;  %v6747_v47 = vcombine.low %v970_v39, %v974_v41  ;;  %v982_v49 = vld [vmem:[%s11069_s8 + $0x2a0] sm:$0xff] }
 0x194   :  { %v271_v58 = vmul.f32 0.2, %v269_v56  ;;  %2439 = vmatpush1.bf16.msra.mxu1 %v6691_v52  ;;  %v983_v52 = vld [vmem:[%s11069_s8 + $0x2a8] sm:$0xff] }
 0x195   :  { %v272_v59 = vmax.f32 %v268_v55, %v270_v57  ;;  %v923_v55 = vld [vmem:[%s11069_s8 + $0xc8] sm:$0xff] }
 0x196   :  { %v273_v60 = vmax.f32 %v269_v56, %v271_v58  ;;  %v6700_v56 = vcombine.high %v922_v53, %v926_v54  ;;  %v927_v57 = vld [vmem:[%s11069_s8 + $0xe8] sm:$0xff] }
 0x197   :  { %v8588_v63 = vpack.c.bf16 %v272_v59, %v272_v59  ;;  %v6701_v58 = vcombine.low %v923_v55, %v927_v57  ;;  %v6702_v59 = vcombine.high %v923_v55, %v927_v57  ;;  %v6755_v55 = vcombine.low %v978_v48, %v982_v49  ;;  %v990_v57 = vld [vmem:[%s11069_s8 + $0x2e0] sm:$0xff] }
 0x198   :  { %v275_v61 = vpack.c.bf16 %v273_v60, %v273_v60  ;;  %v6699_v60 = vcombine.low %v922_v53, %v926_v54  ;;  %2440 = vmatprep.subr.bf16.mxu1 %v6700_v56  ;;  %v986_v56 = vld [vmem:[%s11069_s8 + $0x2c0] sm:$0xff] }
 0x19a   :  { %692 = vmatprep.mubr.bf16.mxu0 %v275_v61  ;;  %2441 = vmatpush1.bf16.msra.mxu1 %v6699_v60  ;;  %v991_v60 = vld [vmem:[%s11069_s8 + $0x2e8] sm:$0xff] }
 0x19b   :  { %693 = vmatmul.mubr.bf16.vlgmr.msra.gmra.mrb[4].mxu0 %v8588_v63 }
 0x19c   :  { %702 = vmatpush1.bf16.msra.mxu0 %v7600_v62  ;;  %733 = vmatprep.mubr.bf16.mxu0 %v275_v61  ;;  %v930_v61 = vld [vmem:[%s11069_s8 + $0x100] sm:$0xff] }
 0x19d   :  { %703 = vmatprep.subr.bf16.mxu0 %v7605_v0  ;;  %v934_v62 = vld [vmem:[%s11069_s8 + $0x120] sm:$0xff] }
 0x19e   :  { %v6708_v0 = vcombine.high %v930_v61, %v934_v62 }
 0x1a0   :  { %704 = vmatpush1.bf16.msra.mxu0 %v7603_v1  ;;  %v935_v1 = vld [vmem:[%s11069_s8 + $0x128] sm:$0xff]  ;;  %2442 = vmatprep.subr.bf16.mxu1 %v6708_v0  ;;  %v994_v0 = vld [vmem:[%s11069_s8 + $0x300] sm:$0xff] }
 0x1a1   :  { %705 = vmatprep.subr.bf16.mxu0 %v7608_v2 }
 0x1a4   :  { %706 = vmatpush1.bf16.msra.mxu0 %v7606_v3 }
 0x1a5   :  { %707 = vmatprep.subr.bf16.mxu0 %v7611_v4  ;;  %v6707_v4 = vcombine.low %v930_v61, %v934_v62 }
 0x1a7   :  { %2443 = vmatpush1.bf16.msra.mxu1 %v6707_v4  ;;  %v999_v4 = vld [vmem:[%s11069_s8 + $0x328] sm:$0xff] }
 0x1a8   :  { %708 = vmatpush1.bf16.msra.mxu0 %v7609_v5  ;;  %v938_v5 = vld [vmem:[%s11069_s8 + $0x140] sm:$0xff] }
 0x1a9   :  { %709 = vmatprep.subr.bf16.mxu0 %v7614_v6  ;;  %v942_v6 = vld [vmem:[%s11069_s8 + $0x160] sm:$0xff] }
 0x1ac   :  { %710 = vmatpush1.bf16.msra.mxu0 %v7612_v7  ;;  %v939_v7 = vld [vmem:[%s11069_s8 + $0x148] sm:$0xff] }
 0x1ad   :  { %711 = vmatprep.subr.bf16.mxu0 %v7617_v8  ;;  %v6716_v8 = vcombine.high %v938_v5, %v942_v6 }
 0x1af   :  { %2444 = vmatprep.subr.bf16.mxu1 %v6716_v8  ;;  %v1002_v8 = vld [vmem:[%s11069_s8 + $0x340] sm:$0xff] }
 0x1b0   :  { %712 = vmatpush1.bf16.msra.mxu0 %v7615_v9  ;;  %v943_v9 = vld [vmem:[%s11069_s8 + $0x168] sm:$0xff] }
 0x1b1   :  { %713 = vmatprep.subr.bf16.mxu0 %v7620_v10  ;;  %v6717_v10 = vcombine.low %v939_v7, %v943_v9 }
 0x1b4   :  { %714 = vmatpush1.bf16.msra.mxu0 %v7618_v11  ;;  %v6718_v11 = vcombine.high %v939_v7, %v943_v9  ;;  %v1006_v9 = vld [vmem:[%s11069_s8 + $0x360] sm:$0xff] }
 0x1b5   :  { %715 = vmatprep.subr.bf16.mxu0 %v7623_v12  ;;  %v6715_v12 = vcombine.low %v938_v5, %v942_v6 }
 0x1b7   :  { %2445 = vmatpush1.bf16.msra.mxu1 %v6715_v12  ;;  %v1007_v12 = vld [vmem:[%s11069_s8 + $0x368] sm:$0xff] }
 0x1b8   :  { %716 = vmatpush1.bf16.msra.mxu0 %v7621_v13  ;;  %v946_v13 = vld [vmem:[%s11069_s8 + $0x180] sm:$0xff] }
 0x1b9   :  { %717 = vmatprep.subr.bf16.mxu0 %v7626_v14  ;;  %v950_v14 = vld [vmem:[%s11069_s8 + $0x1a0] sm:$0xff] }
 0x1bc   :  { %718 = vmatpush1.bf16.msra.mxu0 %v7624_v15  ;;  %v947_v15 = vld [vmem:[%s11069_s8 + $0x188] sm:$0xff] }
 0x1bd   :  { %719 = vmatprep.subr.bf16.mxu0 %v7629_v16  ;;  %v6724_v16 = vcombine.high %v946_v13, %v950_v14 }
 0x1bf   :  { %2446 = vmatprep.subr.bf16.mxu1 %v6724_v16  ;;  %v1010_v16 = vld [vmem:[%s11069_s8 + $0x380] sm:$0xff] }
 0x1c0   :  { %720 = vmatpush1.bf16.msra.mxu0 %v7627_v17  ;;  %v951_v17 = vld [vmem:[%s11069_s8 + $0x1a8] sm:$0xff] }
 0x1c1   :  { %721 = vmatprep.subr.bf16.mxu0 %v7632_v18  ;;  %v6725_v18 = vcombine.low %v947_v15, %v951_v17 }
 0x1c4   :  { %722 = vmatpush1.bf16.msra.mxu0 %v7630_v19  ;;  %v6726_v19 = vcombine.high %v947_v15, %v951_v17  ;;  %v6779_v15 = vcombine.low %v1002_v8, %v1006_v9  ;;  %v1014_v17 = vld [vmem:[%s11069_s8 + $0x3a0] sm:$0xff] }
 0x1c5   :  { %723 = vmatprep.subr.bf16.mxu0 %v7635_v21  ;;  %v6723_v21 = vcombine.low %v946_v13, %v950_v14 }
 0x1c7   :  { %2447 = vmatpush1.bf16.msra.mxu1 %v6723_v21  ;;  %v1015_v21 = vld [vmem:[%s11069_s8 + $0x3a8] sm:$0xff] }
 0x1c8   :  { %724 = vmatpush1.bf16.msra.mxu0 %v7633_v22  ;;  %v954_v22 = vld [vmem:[%s11069_s8 + $0x1c0] sm:$0xff] }
 0x1c9   :  { %725 = vmatprep.subr.bf16.mxu0 %v7638_v23  ;;  %v958_v23 = vld [vmem:[%s11069_s8 + $0x1e0] sm:$0xff] }
 0x1cc   :  { %726 = vmatpush1.bf16.msra.mxu0 %v7636_v24  ;;  %v955_v24 = vld [vmem:[%s11069_s8 + $0x1c8] sm:$0xff] }
 0x1cd   :  { %727 = vmatprep.subr.bf16.mxu0 %v7641_v25  ;;  %v6732_v25 = vcombine.high %v954_v22, %v958_v23 }
 0x1cf   :  { %2448 = vmatprep.subr.bf16.mxu1 %v6732_v25  ;;  %v1018_v25 = vld [vmem:[%s11069_s8 + $0x3c0] sm:$0xff] }
 0x1d0   :  { %728 = vmatpush1.bf16.msra.mxu0 %v7639_v26  ;;  %v959_v26 = vld [vmem:[%s11069_s8 + $0x1e8] sm:$0xff] }
 0x1d1   :  { %729 = vmatprep.subr.bf16.mxu0 %v7644_v27  ;;  %v6733_v27 = vcombine.low %v955_v24, %v959_v26 }
 0x1d4   :  { %730 = vmatpush1.bf16.msra.mxu0 %v7642_v28  ;;  %v6734_v28 = vcombine.high %v955_v24, %v959_v26  ;;  %v6787_v24 = vcombine.low %v1010_v16, %v1014_v17  ;;  %v1022_v26 = vld [vmem:[%s11069_s8 + $0x3e0] sm:$0xff] }
 0x1d5   :  { %731 = vmatprep.subr.bf16.mxu0 %v7647_v29  ;;  %v6731_v29 = vcombine.low %v954_v22, %v958_v23 }
 0x1d7   :  { %2449 = vmatpush1.bf16.msra.mxu1 %v6731_v29  ;;  %v1023_v29 = vld [vmem:[%s11069_s8 + $0x3e8] sm:$0xff] }
 0x1d8   :  { %732 = vmatpush1.bf16.msra.mxu0 %v7645_v32  ;;  %v963_v32 = vld [vmem:[%s11069_s8 + $0x208] sm:$0xff] }
 0x1d9   :  { %2516 = vmatprep.subr.bf16.mxu0 %v6678_v33  ;;  %v6740_v33 = vcombine.high %v962_v30, %v966_v31  ;;  %v6795_v30 = vcombine.low %v1018_v25, %v1022_v26 }
 0x1db   :  { %734 = vmatmul.mubr.bf16.vlgmr.msra.gmra.mrb[8].mxu0 %v8588_v63  ;;  %v931_v63 = vld [vmem:[%s11069_s8 + $0x108] sm:$0xff]  ;;  %2450 = vmatprep.subr.bf16.mxu1 %v6740_v33  ;;  %v8871_v33 = vld [vmem:[%s11069_s8 + $0x400] sm:$0xff] }
 0x1dc   :  { %2517 = vmatpush1.bf16.msra.mxu0 %v6677_v34  ;;  %v6709_v2 = vcombine.low %v931_v63, %v935_v1  ;;  %v6710_v3 = vcombine.high %v931_v63, %v935_v1  ;;  %v967_v34 = vld [vmem:[%s11069_s8 + $0x228] sm:$0xff]  ;;  %2451 = vmatpush1.bf16.msra.mxu1 %v6739_v37  ;;  %v6763_v63 = vcombine.low %v986_v56, %v990_v57  ;;  %v998_v1 = vld [vmem:[%s11069_s8 + $0x320] sm:$0xff] }
 0x1dd   :  { %2518 = vmatprep.subr.bf16.mxu0 %v6686_v44  ;;  %v6741_v35 = vcombine.low %v963_v32, %v967_v34  ;;  %v6742_v36 = vcombine.high %v963_v32, %v967_v34  ;;  %v6748_v44 = vcombine.high %v970_v39, %v974_v41  ;;  %v6771_v7 = vcombine.low %v994_v0, %v998_v1  ;;  %v8876_v34 = vld [vmem:[%s11069_s8 + $0x420] sm:$0xff]  ;;  %v8888_v37 = vld [vmem:[%s11069_s8 + $0x428] sm:$0xff] }
 0x1de   :  { %v6803_v39 = vcombine.low %v8871_v33, %v8876_v34 }
 0x1df   :  { %2452 = vmatprep.subr.bf16.mxu1 %v6748_v44 }
 0x1e0   :  { %2519 = vmatpush1.bf16.msra.mxu0 %v6685_v43  ;;  %v971_v43 = vld [vmem:[%s11069_s8 + $0x248] sm:$0xff]  ;;  %2453 = vmatpush1.bf16.msra.mxu1 %v6747_v47 }
 0x1e1   :  { %2520 = vmatprep.subr.bf16.mxu0 %v6694_v51  ;;  %v6749_v20 = vcombine.low %v971_v43, %v975_v45  ;;  %v6750_v46 = vcombine.high %v971_v43, %v975_v45  ;;  %v979_v51 = vld [vmem:[%s11069_s8 + $0x288] sm:$0xff] }
 0x1e2   :  { %v6757_v53 = vcombine.low %v979_v51, %v983_v52  ;;  %v6758_v54 = vcombine.high %v979_v51, %v983_v52 }
 0x1e4   :  { %2521 = vmatpush1.bf16.msra.mxu0 %v6693_v50  ;;  %v6756_v50 = vcombine.high %v978_v48, %v982_v49 }
 0x1e5   :  { %2522 = vmatprep.subr.bf16.mxu0 %v6702_v59  ;;  %v6764_v59 = vcombine.high %v986_v56, %v990_v57 }
 0x1e6   :  { %2454 = vmatprep.subr.bf16.mxu1 %v6756_v50 }
 0x1e7   :  { %2455 = vmatpush1.bf16.msra.mxu1 %v6755_v55 }
 0x1e8   :  { %2523 = vmatpush1.bf16.msra.mxu0 %v6701_v58  ;;  %v987_v58 = vld [vmem:[%s11069_s8 + $0x2c8] sm:$0xff]  ;;  %2456 = vmatprep.subr.bf16.mxu1 %v6764_v59 }
 0x1e9   :  { %2524 = vmatprep.subr.bf16.mxu0 %v6710_v3  ;;  %v6765_v61 = vcombine.low %v987_v58, %v991_v60  ;;  %v6766_v62 = vcombine.high %v987_v58, %v991_v60  ;;  %v6772_v3 = vcombine.high %v994_v0, %v998_v1 }
 0x1eb   :  { %2457 = vmatpush1.bf16.msra.mxu1 %v6763_v63 }
 0x1ec   :  { %2525 = vmatpush1.bf16.msra.mxu0 %v6709_v2  ;;  %v995_v2 = vld [vmem:[%s11069_s8 + $0x308] sm:$0xff]  ;;  %2458 = vmatprep.subr.bf16.mxu1 %v6772_v3 }
 0x1ed   :  { %2526 = vmatprep.subr.bf16.mxu0 %v6718_v11  ;;  %v6773_v5 = vcombine.low %v995_v2, %v999_v4  ;;  %v6774_v6 = vcombine.high %v995_v2, %v999_v4  ;;  %v6780_v11 = vcombine.high %v1002_v8, %v1006_v9 }
 0x1ef   :  { %2459 = vmatpush1.bf16.msra.mxu1 %v6771_v7 }
 0x1f0   :  { %2527 = vmatpush1.bf16.msra.mxu0 %v6717_v10  ;;  %v1003_v10 = vld [vmem:[%s11069_s8 + $0x348] sm:$0xff]  ;;  %2460 = vmatprep.subr.bf16.mxu1 %v6780_v11 }
 0x1f1   :  { %2528 = vmatprep.subr.bf16.mxu0 %v6726_v19  ;;  %v6781_v13 = vcombine.low %v1003_v10, %v1007_v12  ;;  %v6782_v14 = vcombine.high %v1003_v10, %v1007_v12  ;;  %v6788_v19 = vcombine.high %v1010_v16, %v1014_v17  ;;  %v8899_v17 = vld [vmem:[%s11072_s6] sm:$0xf] }
 0x1f3   :  { %2461 = vmatpush1.bf16.msra.mxu1 %v6779_v15 }
 0x1f4   :  { %2529 = vmatpush1.bf16.msra.mxu0 %v6725_v18  ;;  %v1011_v18 = vld [vmem:[%s11069_s8 + $0x388] sm:$0xff]  ;;  %2462 = vmatprep.subr.bf16.mxu1 %v6788_v19  ;;  %v823_v19 = vrot.slane %v8899_v17, %v8574_v42 }
 0x1f5   :  { %2530 = vmatprep.subr.bf16.mxu0 %v6734_v28  ;;  %v6789_v22 = vcombine.low %v1011_v18, %v1015_v21  ;;  %v6790_v23 = vcombine.high %v1011_v18, %v1015_v21  ;;  %v6796_v28 = vcombine.high %v1018_v25, %v1022_v26  ;;  %v819_v18 = vrot.slane %v8899_v17, %v8568_v40 }
 0x1f7   :  { %2463 = vmatpush1.bf16.msra.mxu1 %v6787_v24 }
 0x1f8   :  { %2531 = vmatpush1.bf16.msra.mxu0 %v6733_v27  ;;  %v1019_v27 = vld [vmem:[%s11069_s8 + $0x3c8] sm:$0xff]  ;;  %2464 = vmatprep.subr.bf16.mxu1 %v6796_v28 }
 0x1f9   :  { %2532 = vmatprep.subr.bf16.mxu0 %v6742_v36  ;;  %v6797_v31 = vcombine.low %v1019_v27, %v1023_v29  ;;  %v6798_v32 = vcombine.high %v1019_v27, %v1023_v29  ;;  %v6804_v36 = vcombine.high %v8871_v33, %v8876_v34  ;;  %v1054_v33 = vld [vmem:[%s11069_s8 + $0x4e0] sm:$0xff]  ;;  %v1051_v34 = vld [vmem:[%s11069_s8 + $0x4c8] sm:$0xff] }
 0x1fb   :  { %2465 = vmatpush1.bf16.msra.mxu1 %v6795_v30 }
 0x1fc   :  { %2533 = vmatpush1.bf16.msra.mxu0 %v6741_v35  ;;  %v8881_v35 = vld [vmem:[%s11069_s8 + $0x408] sm:$0xff]  ;;  %2475 = vmatprep.subr.bf16.mxu1 %v6804_v36 }
 0x1fd   :  { %2534 = vmatprep.subr.bf16.mxu0 %v6750_v46  ;;  %v6805_v41 = vcombine.low %v8881_v35, %v8888_v37  ;;  %v6806_v43 = vcombine.high %v8881_v35, %v8888_v37  ;;  %v1055_v35 = vld [vmem:[%s11069_s8 + $0x4e8] sm:$0xff] }
 0x200   :  { %2535 = vmatpush1.bf16.msra.mxu0 %v6749_v20 }
 0x201   :  { %2536 = vmatprep.subr.bf16.mxu0 %v6758_v54 }
 0x204   :  { %2537 = vmatpush1.bf16.msra.mxu0 %v6757_v53 }
 0x205   :  { %2538 = vmatprep.subr.bf16.mxu0 %v6766_v62 }
 0x208   :  { %2539 = vmatpush1.bf16.msra.mxu0 %v6765_v61 }
 0x209   :  { %2540 = vmatprep.subr.bf16.mxu0 %v6774_v6 }
 0x20c   :  { %2541 = vmatpush1.bf16.msra.mxu0 %v6773_v5 }
 0x20d   :  { %2542 = vmatprep.subr.bf16.mxu0 %v6782_v14 }
 0x210   :  { %2543 = vmatpush1.bf16.msra.mxu0 %v6781_v13 }
 0x211   :  { %2544 = vmatprep.subr.bf16.mxu0 %v6790_v23 }
 0x214   :  { %2545 = vmatpush1.bf16.msra.mxu0 %v6789_v22  ;;  %v8908_v22 = vld [vmem:[%s11073_s7] sm:$0xf] }
 0x215   :  { %2546 = vmatprep.subr.bf16.mxu0 %v6798_v32  ;;  %v865_v27 = vrot.slane %v8908_v22, %v8568_v40  ;;  %v869_v29 = vrot.slane %v8908_v22, %v8574_v42 }
 0x218   :  { %2547 = vmatpush1.bf16.msra.mxu0 %v6797_v31 }
 0x219   :  { %2557 = vmatprep.subr.bf16.mxu0 %v6806_v43 }
 0x26e   :  { %v694_v44 = vpop.f32.mrb[4].mxu0 }
 0x26f   :  { %v742_v45 = vrot.slane %v694_v44, 4  ;;  %v696_v20 = vpop.f32.mrb[5].mxu0 }
 0x270   :  { %v748_v46 = vrot.slane %v696_v20, 4  ;;  %v698_v47 = vpop.f32.mrb[6].mxu0 }
 0x271   :  { %v743_v48 = vadd.f32 %v742_v45, %v694_v44  ;;  %v699_v49 = vpop.f32.mrb[7].mxu0  ;;  %v1038_v47 = vld [vmem:[%s11069_s8 + $0x460] sm:$0xff] }
 0x272   :  { %v749_v50 = vadd.f32 %v748_v46, %v696_v20  ;;  %v1039_v49 = vld [vmem:[%s11069_s8 + $0x468] sm:$0xff] }
 0x273   :  { %v744_v51 = vrot.slane %v743_v48, 2 }
 0x274   :  { %v750_v52 = vrot.slane %v749_v50, 2 }
 0x275   :  { %v745_v53 = vadd.f32 %v744_v51, %v743_v48  ;;  %v1035_v48 = vld [vmem:[%s11069_s8 + $0x448] sm:$0xff] }
 0x276   :  { %v751_v54 = vadd.f32 %v750_v52, %v749_v50 }
 0x277   :  { %v746_v55 = vrot.slane %v745_v53, 1 }
 0x278   :  { %v752_v56 = vrot.slane %v751_v54, 1 }
 0x279   :  { %v747_v57 = vadd.f32 %v746_v55, %v745_v53  ;;  %v6814_v53 = vcombine.high %v1035_v48, %v1039_v49  ;;  %v1046_v55 = vld [vmem:[%s11069_s8 + $0x4a0] sm:$0xff] }
 0x27a   :  { %v753_v58 = vadd.f32 %v752_v56, %v751_v54  ;;  %v1042_v54 = vld [vmem:[%s11069_s8 + $0x480] sm:$0xff]  ;;  %v1043_v56 = vld [vmem:[%s11069_s8 + $0x488] sm:$0xff] }
 0x27b   :  { %v766_v59 = vmul.f32 0.125, %v747_v57  ;;  %v1047_v57 = vld [vmem:[%s11069_s8 + $0x4a8] sm:$0xff] }
 0x27c   :  { %v767_v60 = vmul.f32 0.125, %v753_v58 }
 0x27d   :  { %v770_v61 = vsub.f32 %v694_v44, %v766_v59  ;;  %v6813_v59 = vcombine.low %v1035_v48, %v1039_v49 }
 0x27e   :  { %v771_v62 = vsub.f32 %v696_v20, %v767_v60  ;;  %v1034_v20 = vld [vmem:[%s11069_s8 + $0x440] sm:$0xff] }
 0x27f   :  { %v774_v63 = vmul.f32 %v770_v61, %v770_v61  ;;  %v6812_v52 = vcombine.high %v1034_v20, %v1038_v47  ;;  %v6811_v58 = vcombine.low %v1034_v20, %v1038_v47  ;;  %v1078_v20 = vld [vmem:[%s11069_s8 + $0x5a0] sm:$0xff]  ;;  %v1079_v47 = vld [vmem:[%s11069_s8 + $0x5a8] sm:$0xff] }
 0x280   :  { %v775_v0 = vmul.f32 %v771_v62, %v771_v62 }
 0x281   :  { %v778_v1 = vrot.slane %v774_v63, 4 }
 0x282   :  { %v784_v2 = vrot.slane %v775_v0, 4 }
 0x283   :  { %v779_v3 = vadd.f32 %v778_v1, %v774_v63  ;;  %v1050_v63 = vld [vmem:[%s11069_s8 + $0x4c0] sm:$0xff] }
 0x284   :  { %v785_v4 = vadd.f32 %v784_v2, %v775_v0 }
 0x285   :  { %v780_v5 = vrot.slane %v779_v3, 2 }
 0x286   :  { %v786_v6 = vrot.slane %v785_v4, 2 }
 0x287   :  { %v781_v7 = vadd.f32 %v780_v5, %v779_v3  ;;  %v6819_v3 = vcombine.low %v1042_v54, %v1046_v55 }
 0x288   :  { %v787_v8 = vadd.f32 %v786_v6, %v785_v4  ;;  %v6821_v4 = vcombine.low %v1043_v56, %v1047_v57  ;;  %v6828_v6 = vcombine.high %v1050_v63, %v1054_v33 }
 0x289   :  { %v782_v9 = vrot.slane %v781_v7, 1 }
 0x28a   :  { %v788_v10 = vrot.slane %v787_v8, 1 }
 0x28b   :  { %v783_v11 = vadd.f32 %v782_v9, %v781_v7  ;;  %v6830_v7 = vcombine.high %v1051_v34, %v1055_v35 }
 0x28c   :  { %v789_v12 = vadd.f32 %v788_v10, %v787_v8  ;;  %v1058_v8 = vld [vmem:[%s11069_s8 + $0x500] sm:$0xff] }
 0x28d   :  { %v802_v13 = vmul.f32 0.125, %v783_v11  ;;  %v1062_v10 = vld [vmem:[%s11069_s8 + $0x520] sm:$0xff]  ;;  %v1059_v11 = vld [vmem:[%s11069_s8 + $0x508] sm:$0xff] }
 0x28e   :  { %v803_v14 = vmul.f32 0.125, %v789_v12  ;;  %v1063_v12 = vld [vmem:[%s11069_s8 + $0x528] sm:$0xff] }
 0x28f   :  { %v806_v15 = vadd.f32 1e-05, %v802_v13 }
 0x290   :  { %v807_v16 = vadd.f32 1e-05, %v803_v14 }
 0x291   :  { %8292 = vrsqrt.f32 %v806_v15  ;;  %v6827_v15 = vcombine.low %v1050_v63, %v1054_v33 }
 0x292   :  { %8294 = vrsqrt.f32 %v807_v16  ;;  %v6829_v16 = vcombine.low %v1051_v34, %v1055_v35 }
 0x29b   :  { %v8293_v21 = vpop.eup %8292 }
 0x29c   :  { %v8295_v23 = vpop.eup %8294  ;;  %v836_v24 = vmul.f32 %v8293_v21, %v819_v18  ;;  %v6838_v21 = vcombine.high %v1059_v11, %v1063_v12 }
 0x29d   :  { %v837_v25 = vmul.f32 %v8295_v23, %v823_v19  ;;  %v6836_v19 = vcombine.high %v1058_v8, %v1062_v10  ;;  %v1066_v23 = vld [vmem:[%s11069_s8 + $0x540] sm:$0xff] }
 0x29e   :  { %v843_v26 = vrot.slane %v836_v24, %v8568_v40 }
 0x29f   :  { %v847_v28 = vrot.slane %v837_v25, %v8568_v40  ;;  %v1070_v25 = vld [vmem:[%s11069_s8 + $0x560] sm:$0xff] }
 0x2a0   :  { %v856_v30 = vmul.f32 %v843_v26, %v770_v61  ;;  %v6820_v61 = vcombine.high %v1042_v54, %v1046_v55  ;;  %v1067_v26 = vld [vmem:[%s11069_s8 + $0x548] sm:$0xff] }
 0x2a1   :  { %v857_v31 = vmul.f32 %v847_v28, %v771_v62  ;;  %v6822_v62 = vcombine.high %v1043_v56, %v1047_v57  ;;  %v1082_v57 = vld [vmem:[%s11069_s8 + $0x5c0] sm:$0xff] }
 0x2a2   :  { %v882_v32 = vadd.f32 %v865_v27, %v856_v30  ;;  %v1071_v27 = vld [vmem:[%s11069_s8 + $0x568] sm:$0xff]  ;;  %v6835_v30 = vcombine.low %v1058_v8, %v1062_v10 }
 0x2a3   :  { %v883_v36 = vadd.f32 %v869_v29, %v857_v31  ;;  %v6837_v31 = vcombine.low %v1059_v11, %v1063_v12  ;;  %v1098_v11 = vld [vmem:[%s11069_s8 + $0x640] sm:$0xff] }
 0x2a4   :  { %v886_v43 = vmul.f32 0.2, %v882_v32 }
 0x2a5   :  { %v887_v44 = vmul.f32 0.2, %v883_v36 }
 0x2a6   :  { %v890_v45 = vmax.f32 %v882_v32, %v886_v43  ;;  %v6846_v43 = vcombine.high %v1067_v26, %v1071_v27 }
 0x2a7   :  { %v891_v46 = vmax.f32 %v883_v36, %v887_v44  ;;  %v6844_v36 = vcombine.high %v1066_v23, %v1070_v25  ;;  %v1074_v44 = vld [vmem:[%s11069_s8 + $0x580] sm:$0xff] }
 0x2a8   :  { %v8930_v51 = vpack.c.bf16 %v890_v45, %v890_v45  ;;  %v6852_v55 = vcombine.high %v1074_v44, %v1078_v20 }
 0x2a9   :  { %v8928_v50 = vpack.c.bf16 %v891_v46, %v891_v46  ;;  %v1075_v46 = vld [vmem:[%s11069_s8 + $0x588] sm:$0xff] }
 0x2aa   :  { %v6854_v56 = vcombine.high %v1075_v46, %v1079_v47 }
 0x2ab   :  { %2466 = vmatprep.mubr.bf16.mxu1 %v8928_v50  ;;  %2548 = vmatprep.mubr.bf16.mxu0 %v8928_v50 }
 0x2ac   :  { %2467 = vmatmul.mubr.bf16.vlgmr.msra.gmra.mrb[0].mxu1 %v8930_v51  ;;  %2549 = vmatmul.mubr.bf16.vlgmr.msra.gmra.mrb[12].mxu0 %v8930_v51 }
 0x2ad   :  { %2476 = vmatpush1.bf16.msra.mxu1 %v6803_v39  ;;  %2558 = vmatpush1.bf16.msra.mxu0 %v6805_v41 }
 0x2ae   :  { %v735_v60 = vpop.f32.mrb[8].mxu0  ;;  %2477 = vmatprep.subr.bf16.mxu1 %v6812_v52  ;;  %2559 = vmatprep.subr.bf16.mxu0 %v6814_v53  ;;  %v6843_v52 = vcombine.low %v1066_v23, %v1070_v25  ;;  %v6845_v53 = vcombine.low %v1067_v26, %v1071_v27  ;;  %v1106_v26 = vld [vmem:[%s11069_s8 + $0x680] sm:$0xff] }
 0x2af   :  { %v754_v0 = vrot.slane %v735_v60, 4  ;;  %v737_v1 = vpop.f32.mrb[9].mxu0 }
 0x2b0   :  { %v760_v37 = vrot.slane %v737_v1, 4  ;;  %v739_v39 = vpop.f32.mrb[10].mxu0 }
 0x2b1   :  { %v755_v41 = vadd.f32 %v754_v0, %v735_v60  ;;  %v740_v2 = vpop.f32.mrb[11].mxu0  ;;  %2478 = vmatpush1.bf16.msra.mxu1 %v6811_v58  ;;  %2560 = vmatpush1.bf16.msra.mxu0 %v6813_v59  ;;  %v1086_v59 = vld [vmem:[%s11069_s8 + $0x5e0] sm:$0xff]  ;;  %v6851_v0 = vcombine.low %v1074_v44, %v1078_v20 }
 0x2b2   :  { %v761_v5 = vadd.f32 %v760_v37, %v737_v1  ;;  %2479 = vmatprep.subr.bf16.mxu1 %v6820_v61  ;;  %2561 = vmatprep.subr.bf16.mxu0 %v6822_v62  ;;  %v1087_v61 = vld [vmem:[%s11069_s8 + $0x5e8] sm:$0xff]  ;;  %v6860_v34 = vcombine.high %v1082_v57, %v1086_v59  ;;  %v1090_v37 = vld [vmem:[%s11069_s8 + $0x600] sm:$0xff] }
 0x2b3   :  { %v756_v9 = vrot.slane %v755_v41, 2  ;;  %v1091_v2 = vld [vmem:[%s11069_s8 + $0x608] sm:$0xff] }
 0x2b4   :  { %v762_v13 = vrot.slane %v761_v5, 2 }
 0x2b5   :  { %v757_v14 = vadd.f32 %v756_v9, %v755_v41  ;;  %2480 = vmatpush1.bf16.msra.mxu1 %v6819_v3  ;;  %2562 = vmatpush1.bf16.msra.mxu0 %v6821_v4  ;;  %v1094_v41 = vld [vmem:[%s11069_s8 + $0x620] sm:$0xff]  ;;  %v1095_v3 = vld [vmem:[%s11069_s8 + $0x628] sm:$0xff] }
 0x2b6   :  { %v763_v18 = vadd.f32 %v762_v13, %v761_v5  ;;  %2481 = vmatprep.subr.bf16.mxu1 %v6828_v6  ;;  %2563 = vmatprep.subr.bf16.mxu0 %v6830_v7  ;;  %v6859_v6 = vcombine.low %v1082_v57, %v1086_v59  ;;  %v6868_v9 = vcombine.high %v1090_v37, %v1094_v41  ;;  %v1102_v13 = vld [vmem:[%s11069_s8 + $0x660] sm:$0xff] }
 0x2b7   :  { %v758_v24 = vrot.slane %v757_v14, 1  ;;  %v6870_v10 = vcombine.high %v1091_v2, %v1095_v3 }
 0x2b8   :  { %v764_v28 = vrot.slane %v763_v18, 1 }
 0x2b9   :  { %v759_v29 = vadd.f32 %v758_v24, %v757_v14  ;;  %2482 = vmatpush1.bf16.msra.mxu1 %v6827_v15  ;;  %2564 = vmatpush1.bf16.msra.mxu0 %v6829_v16  ;;  %v1099_v14 = vld [vmem:[%s11069_s8 + $0x648] sm:$0xff]  ;;  %v6876_v24 = vcombine.high %v1098_v11, %v1102_v13 }
 0x2ba   :  { %v765_v32 = vadd.f32 %v764_v28, %v763_v18  ;;  %2483 = vmatprep.subr.bf16.mxu1 %v6836_v19  ;;  %2565 = vmatprep.subr.bf16.mxu0 %v6838_v21  ;;  %v1103_v15 = vld [vmem:[%s11069_s8 + $0x668] sm:$0xff]  ;;  %v6867_v19 = vcombine.low %v1090_v37, %v1094_v41  ;;  %v6869_v21 = vcombine.low %v1091_v2, %v1095_v3  ;;  %v1110_v28 = vld [vmem:[%s11069_s8 + $0x6a0] sm:$0xff] }
 0x2bb   :  { %v768_v45 = vmul.f32 0.125, %v759_v29  ;;  %v6878_v25 = vcombine.high %v1099_v14, %v1103_v15  ;;  %v1107_v29 = vld [vmem:[%s11069_s8 + $0x688] sm:$0xff]  ;;  %v1134_v41 = vld [vmem:[%s11069_s8 + $0x760] sm:$0xff] }
 0x2bc   :  { %v769_v48 = vmul.f32 0.125, %v765_v32  ;;  %v1131_v2 = vld [vmem:[%s11069_s8 + $0x748] sm:$0xff] }
 0x2bd   :  { %v9002_v49 = vsub.f32 %v735_v60, %v768_v45  ;;  %2484 = vmatpush1.bf16.msra.mxu1 %v6835_v30  ;;  %2566 = vmatpush1.bf16.msra.mxu0 %v6837_v31  ;;  %v1083_v60 = vld [vmem:[%s11069_s8 + $0x5c8] sm:$0xff]  ;;  %v6884_v45 = vcombine.high %v1106_v26, %v1110_v28 }
 0x2be   :  { %v9004_v54 = vsub.f32 %v737_v1, %v769_v48  ;;  %2485 = vmatprep.subr.bf16.mxu1 %v6844_v36  ;;  %2567 = vmatprep.subr.bf16.mxu0 %v6846_v43  ;;  %v6853_v1 = vcombine.low %v1075_v46, %v1079_v47  ;;  %v6862_v35 = vcombine.high %v1083_v60, %v1087_v61  ;;  %v1111_v30 = vld [vmem:[%s11069_s8 + $0x6a8] sm:$0xff]  ;;  %v1114_v46 = vld [vmem:[%s11069_s8 + $0x6c0] sm:$0xff] }
 0x2bf   :  { %v776_v58 = vmul.f32 %v9002_v49, %v9002_v49  ;;  %v6861_v7 = vcombine.low %v1083_v60, %v1087_v61  ;;  %v6875_v36 = vcombine.low %v1098_v11, %v1102_v13  ;;  %v6877_v43 = vcombine.low %v1099_v14, %v1103_v15  ;;  %v1118_v48 = vld [vmem:[%s11069_s8 + $0x6e0] sm:$0xff]  ;;  %v1135_v3 = vld [vmem:[%s11069_s8 + $0x768] sm:$0xff] }
 0x2c0   :  { %v777_v62 = vmul.f32 %v9004_v54, %v9004_v54  ;;  %v6886_v20 = vcombine.high %v1107_v29, %v1111_v30  ;;  %v6885_v57 = vcombine.low %v1107_v29, %v1111_v30  ;;  %v1122_v60 = vld [vmem:[%s11069_s8 + $0x700] sm:$0xff]  ;;  %v1143_v13 = vld [vmem:[%s11069_s8 + $0x7a8] sm:$0xff] }
 0x2c1   :  { %v790_v63 = vrot.slane %v776_v58, 4  ;;  %2486 = vmatpush1.bf16.msra.mxu1 %v6843_v52  ;;  %2568 = vmatpush1.bf16.msra.mxu0 %v6845_v53  ;;  %v1115_v52 = vld [vmem:[%s11069_s8 + $0x6c8] sm:$0xff]  ;;  %v1126_v61 = vld [vmem:[%s11069_s8 + $0x720] sm:$0xff] }
 0x2c2   :  { %v796_v33 = vrot.slane %v777_v62, 4  ;;  %2487 = vmatprep.subr.bf16.mxu1 %v6852_v55  ;;  %2569 = vmatprep.subr.bf16.mxu0 %v6854_v56  ;;  %v1119_v53 = vld [vmem:[%s11069_s8 + $0x6e8] sm:$0xff]  ;;  %v6883_v56 = vcombine.low %v1106_v26, %v1110_v28  ;;  %v1146_v26 = vld [vmem:[%s11069_s8 + $0x7c0] sm:$0xff] }
 0x2c3   :  { %v791_v39 = vadd.f32 %v790_v63, %v776_v58  ;;  %v6892_v58 = vcombine.high %v1114_v46, %v1118_v48  ;;  %v6894_v59 = vcombine.high %v1115_v52, %v1119_v53  ;;  %v1127_v63 = vld [vmem:[%s11069_s8 + $0x728] sm:$0xff]  ;;  %v1150_v29 = vld [vmem:[%s11069_s8 + $0x7e0] sm:$0xff] }
 0x2c4   :  { %v797_v4 = vadd.f32 %v796_v33, %v777_v62  ;;  %v1123_v62 = vld [vmem:[%s11069_s8 + $0x708] sm:$0xff]  ;;  %v6891_v33 = vcombine.low %v1114_v46, %v1118_v48  ;;  %v900_v46 = vld [vmem:[%s11069_s8 + $0x10] sm:$0xff]  ;;  %v905_v48 = vld [vmem:[%s11069_s8 + $0x38] sm:$0xff] }
 0x2c5   :  { %v792_v5 = vrot.slane %v791_v39, 2  ;;  %2488 = vmatpush1.bf16.msra.mxu1 %v6851_v0  ;;  %2570 = vmatpush1.bf16.msra.mxu0 %v6853_v1  ;;  %v9083_v0 = vsub.s32 2, %v8565_v38  ;;  %v9086_v1 = vsub.s32 3, %v8565_v38  ;;  %v6902_v37 = vcombine.high %v1123_v62, %v1127_v63  ;;  %v1147_v30 = vld [vmem:[%s11069_s8 + $0x7c8] sm:$0xff] }
 0x2c6   :  { %v798_v8 = vrot.slane %v797_v4, 2  ;;  %2489 = vmatprep.subr.bf16.mxu1 %v6860_v34  ;;  %2571 = vmatprep.subr.bf16.mxu0 %v6862_v35  ;;  %v6893_v34 = vcombine.low %v1115_v52, %v1119_v53  ;;  %v6900_v35 = vcombine.high %v1122_v60, %v1126_v61 }
 0x2c7   :  { %v793_v12 = vadd.f32 %v792_v5, %v791_v39  ;;  %v1130_v39 = vld [vmem:[%s11069_s8 + $0x740] sm:$0xff]  ;;  %v831_v5 = vrot.slane %v8899_v17, %v9086_v1  ;;  %v877_v28 = vrot.slane %v8908_v22, %v9086_v1 }
 0x2c8   :  { %v799_v16 = vadd.f32 %v798_v8, %v797_v4  ;;  %v827_v4 = vrot.slane %v8899_v17, %v9083_v0  ;;  %v6908_v8 = vcombine.high %v1130_v39, %v1134_v41  ;;  %v1139_v17 = vld [vmem:[%s11069_s8 + $0x788] sm:$0xff] }
 0x2c9   :  { %v794_v18 = vrot.slane %v793_v12, 1  ;;  %2490 = vmatpush1.bf16.msra.mxu1 %v6859_v6  ;;  %2572 = vmatpush1.bf16.msra.mxu0 %v6861_v7  ;;  %v6899_v6 = vcombine.low %v1122_v60, %v1126_v61  ;;  %v6901_v7 = vcombine.low %v1123_v62, %v1127_v63  ;;  %v908_v61 = vld [vmem:[%s11069_s8 + $0x50] sm:$0xff]  ;;  %v909_v63 = vld [vmem:[%s11069_s8 + $0x58] sm:$0xff] }
 0x2ca   :  { %v800_v23 = vrot.slane %v799_v16, 1  ;;  %2491 = vmatprep.subr.bf16.mxu1 %v6868_v9  ;;  %2573 = vmatprep.subr.bf16.mxu0 %v6870_v10  ;;  %v6910_v9 = vcombine.high %v1131_v2, %v1135_v3  ;;  %v1138_v10 = vld [vmem:[%s11069_s8 + $0x780] sm:$0xff]  ;;  %v912_v62 = vld [vmem:[%s11069_s8 + $0x70] sm:$0xff] }
 0x2cb   :  { %v795_v27 = vadd.f32 %v794_v18, %v793_v12  ;;  %v1142_v12 = vld [vmem:[%s11069_s8 + $0x7a0] sm:$0xff]  ;;  %v873_v18 = vrot.slane %v8908_v22, %v9083_v0  ;;  %v6917_v22 = vcombine.low %v1139_v17, %v1143_v13 }
 0x2cc   :  { %v801_v31 = vadd.f32 %v800_v23, %v799_v16  ;;  %v6907_v16 = vcombine.low %v1130_v39, %v1134_v41  ;;  %v6688_v41 = vcombine.high %v908_v61, %v912_v62 }
 0x2cd   :  { %v804_v32 = vmul.f32 0.125, %v795_v27  ;;  %2492 = vmatpush1.bf16.msra.mxu1 %v6867_v19  ;;  %2574 = vmatpush1.bf16.msra.mxu0 %v6869_v21  ;;  %v6909_v21 = vcombine.low %v1131_v2, %v1135_v3  ;;  %v916_v3 = vld [vmem:[%s11069_s8 + $0x90] sm:$0xff] }
 0x2ce   :  { %v805_v44 = vmul.f32 0.125, %v801_v31  ;;  %2493 = vmatprep.subr.bf16.mxu1 %v6876_v24  ;;  %2575 = vmatprep.subr.bf16.mxu0 %v6878_v25  ;;  %v6916_v24 = vcombine.high %v1138_v10, %v1142_v12  ;;  %v6918_v25 = vcombine.high %v1139_v17, %v1143_v13  ;;  %v1151_v31 = vld [vmem:[%s11069_s8 + $0x7e8] sm:$0xff]  ;;  %v925_v17 = vld [vmem:[%s11069_s8 + $0xd8] sm:$0xff] }
 0x2cf   :  { %v808_v47 = vadd.f32 1e-05, %v804_v32 }
 0x2d0   :  { %v809_v55 = vadd.f32 1e-05, %v805_v44 }
 0x2d1   :  { %8296 = vrsqrt.f32 %v808_v47  ;;  %2494 = vmatpush1.bf16.msra.mxu1 %v6875_v36  ;;  %2576 = vmatpush1.bf16.msra.mxu0 %v6877_v43  ;;  %v6915_v43 = vcombine.low %v1138_v10, %v1142_v12  ;;  %v924_v10 = vld [vmem:[%s11069_s8 + $0xd0] sm:$0xff] }
 0x2d2   :  { %8298 = vrsqrt.f32 %v809_v55  ;;  %2495 = vmatprep.subr.bf16.mxu1 %v6884_v45  ;;  %2577 = vmatprep.subr.bf16.mxu0 %v6886_v20  ;;  %v6924_v45 = vcombine.high %v1146_v26, %v1150_v29  ;;  %v6926_v20 = vcombine.high %v1147_v30, %v1151_v31  ;;  %v6923_v55 = vcombine.low %v1146_v26, %v1150_v29  ;;  %v928_v12 = vld [vmem:[%s11069_s8 + $0xf0] sm:$0xff]  ;;  %v941_v29 = vld [vmem:[%s11069_s8 + $0x158] sm:$0xff] }
 0x2d3   :  { %v944_v26 = vld [vmem:[%s11069_s8 + $0x170] sm:$0xff] }
 0x2d5   :  { %2496 = vmatpush1.bf16.msra.mxu1 %v6883_v56  ;;  %2578 = vmatpush1.bf16.msra.mxu0 %v6885_v57  ;;  %v6925_v56 = vcombine.low %v1147_v30, %v1151_v31  ;;  %v945_v30 = vld [vmem:[%s11069_s8 + $0x178] sm:$0xff] }
 0x2d6   :  { %2497 = vmatprep.subr.bf16.mxu1 %v6892_v58  ;;  %2579 = vmatprep.subr.bf16.mxu0 %v6894_v59 }
 0x2d9   :  { %2498 = vmatpush1.bf16.msra.mxu1 %v6891_v33  ;;  %2580 = vmatpush1.bf16.msra.mxu0 %v6893_v34  ;;  %v913_v33 = vld [vmem:[%s11069_s8 + $0x78] sm:$0xff] }
 0x2da   :  { %2499 = vmatprep.subr.bf16.mxu1 %v6900_v35  ;;  %2581 = vmatprep.subr.bf16.mxu0 %v6902_v37  ;;  %v6690_v2 = vcombine.high %v909_v63, %v913_v33 }
 0x2db   :  { %v8297_v11 = vpop.eup %8296 }
 0x2dc   :  { %v8299_v14 = vpop.eup %8298  ;;  %v838_v15 = vmul.f32 %v8297_v11, %v827_v4  ;;  %v920_v4 = vld [vmem:[%s11069_s8 + $0xb0] sm:$0xff] }
 0x2dd   :  { %v839_v19 = vmul.f32 %v8299_v14, %v831_v5  ;;  %2500 = vmatpush1.bf16.msra.mxu1 %v6899_v6  ;;  %2582 = vmatpush1.bf16.msra.mxu0 %v6901_v7  ;;  %v917_v5 = vld [vmem:[%s11069_s8 + $0x98] sm:$0xff]  ;;  %v6687_v7 = vcombine.low %v908_v61, %v912_v62  ;;  %v6695_v13 = vcombine.low %v916_v3, %v920_v4  ;;  %v932_v14 = vld [vmem:[%s11069_s8 + $0x110] sm:$0xff] }
 0x2de   :  { %v851_v23 = vrot.slane %v838_v15, %v8568_v40  ;;  %2501 = vmatprep.subr.bf16.mxu1 %v6908_v8  ;;  %2583 = vmatprep.subr.bf16.mxu0 %v6910_v9  ;;  %v921_v6 = vld [vmem:[%s11069_s8 + $0xb8] sm:$0xff]  ;;  %v6689_v8 = vcombine.low %v909_v63, %v913_v33  ;;  %v6696_v9 = vcombine.high %v916_v3, %v920_v4  ;;  %v936_v15 = vld [vmem:[%s11069_s8 + $0x130] sm:$0xff] }
 0x2df   :  { %v855_v27 = vrot.slane %v839_v19, %v8568_v40  ;;  %v6698_v11 = vcombine.high %v917_v5, %v921_v6  ;;  %v933_v19 = vld [vmem:[%s11069_s8 + $0x118] sm:$0xff] }
 0x2e0   :  { %v858_v32 = vmul.f32 %v851_v23, %v9002_v49  ;;  %v904_v49 = vld [vmem:[%s11069_s8 + $0x30] sm:$0xff]  ;;  %v965_v62 = vld [vmem:[%s11069_s8 + $0x218] sm:$0xff] }
 0x2e1   :  { %v859_v36 = vmul.f32 %v855_v27, %v9004_v54  ;;  %2502 = vmatpush1.bf16.msra.mxu1 %v6907_v16  ;;  %2584 = vmatpush1.bf16.msra.mxu0 %v6909_v21  ;;  %v901_v54 = vld [vmem:[%s11069_s8 + $0x18] sm:$0xff]  ;;  %v6680_v58 = vcombine.high %v900_v46, %v904_v49  ;;  %v6679_v35 = vcombine.low %v900_v46, %v904_v49  ;;  %v956_v49 = vld [vmem:[%s11069_s8 + $0x1d0] sm:$0xff] }
 0x2e2   :  { %v884_v44 = vadd.f32 %v873_v18, %v858_v32  ;;  %2503 = vmatprep.subr.bf16.mxu1 %v6916_v24  ;;  %2585 = vmatprep.subr.bf16.mxu0 %v6918_v25  ;;  %v6682_v59 = vcombine.high %v901_v54, %v905_v48  ;;  %v6681_v39 = vcombine.low %v901_v54, %v905_v48  ;;  %v937_v21 = vld [vmem:[%s11069_s8 + $0x138] sm:$0xff]  ;;  %v940_v25 = vld [vmem:[%s11069_s8 + $0x150] sm:$0xff] }
 0x2e3   :  { %v885_v47 = vadd.f32 %v877_v28, %v859_v36  ;;  %v6697_v16 = vcombine.low %v917_v5, %v921_v6  ;;  %v6704_v18 = vcombine.high %v924_v10, %v928_v12  ;;  %v6703_v24 = vcombine.low %v924_v10, %v928_v12  ;;  %v948_v36 = vld [vmem:[%s11069_s8 + $0x190] sm:$0xff]  ;;  %v969_v63 = vld [vmem:[%s11069_s8 + $0x238] sm:$0xff] }
 0x2e4   :  { %v888_v52 = vmul.f32 0.2, %v884_v44  ;;  %v6712_v28 = vcombine.high %v932_v14, %v936_v15  ;;  %v6714_v31 = vcombine.high %v933_v19, %v937_v21  ;;  %v6711_v32 = vcombine.low %v932_v14, %v936_v15  ;;  %v960_v54 = vld [vmem:[%s11069_s8 + $0x1f0] sm:$0xff]  ;;  %v973_v4 = vld [vmem:[%s11069_s8 + $0x258] sm:$0xff] }
 0x2e5   :  { %v889_v53 = vmul.f32 0.2, %v885_v47  ;;  %2504 = vmatpush1.bf16.msra.mxu1 %v6915_v43  ;;  %2586 = vmatpush1.bf16.msra.mxu0 %v6917_v22  ;;  %v952_v43 = vld [vmem:[%s11069_s8 + $0x1b0] sm:$0xff]  ;;  %v6713_v22 = vcombine.low %v933_v19, %v937_v21  ;;  %v6722_v46 = vcombine.high %v941_v29, %v945_v30  ;;  %v6721_v48 = vcombine.low %v941_v29, %v945_v30  ;;  %v977_v5 = vld [vmem:[%s11069_s8 + $0x278] sm:$0xff] }
 0x2e6   :  { %2505 = vmatprep.subr.bf16.mxu1 %v6924_v45  ;;  %2587 = vmatprep.subr.bf16.mxu0 %v6926_v20  ;;  %v892_v57 = vmax.f32 %v884_v44, %v888_v52  ;;  %v6720_v44 = vcombine.high %v940_v25, %v944_v26  ;;  %v949_v45 = vld [vmem:[%s11069_s8 + $0x198] sm:$0xff]  ;;  %v6728_v52 = vcombine.high %v948_v36, %v952_v43  ;;  %v988_v14 = vld [vmem:[%s11069_s8 + $0x2d0] sm:$0xff] }
 0x2e7   :  { %v893_v60 = vmax.f32 %v885_v47, %v889_v53  ;;  %v953_v20 = vld [vmem:[%s11069_s8 + $0x1b8] sm:$0xff]  ;;  %v6719_v47 = vcombine.low %v940_v25, %v944_v26  ;;  %v6736_v61 = vcombine.high %v956_v49, %v960_v54  ;;  %v6746_v6 = vcombine.high %v965_v62, %v969_v63  ;;  %v992_v15 = vld [vmem:[%s11069_s8 + $0x2f0] sm:$0xff] }
 0x2e8   :  { %v9162_v37 = vpack.c.bf16 %v892_v57, %v892_v57  ;;  %v957_v53 = vld [vmem:[%s11069_s8 + $0x1d8] sm:$0xff]  ;;  %v6727_v57 = vcombine.low %v948_v36, %v952_v43  ;;  %v6745_v10 = vcombine.low %v965_v62, %v969_v63  ;;  %v996_v25 = vld [vmem:[%s11069_s8 + $0x310] sm:$0xff] }
 0x2e9   :  { %2506 = vmatpush1.bf16.msra.mxu1 %v6923_v55  ;;  %2588 = vmatpush1.bf16.msra.mxu0 %v6925_v56  ;;  %v9160_v34 = vpack.c.bf16 %v893_v60, %v893_v60  ;;  %v961_v55 = vld [vmem:[%s11069_s8 + $0x1f8] sm:$0xff]  ;;  %v6730_v56 = vcombine.high %v949_v45, %v953_v20  ;;  %v6729_v60 = vcombine.low %v949_v45, %v953_v20  ;;  %v1000_v26 = vld [vmem:[%s11069_s8 + $0x330] sm:$0xff] }
 0x2ea   :  { %2598 = vmatprep.subr.bf16.mxu1 %v6680_v58  ;;  %2680 = vmatprep.subr.bf16.mxu0 %v6682_v59  ;;  %v964_v58 = vld [vmem:[%s11069_s8 + $0x210] sm:$0xff]  ;;  %v6738_v33 = vcombine.high %v957_v53, %v961_v55  ;;  %v981_v12 = vld [vmem:[%s11069_s8 + $0x298] sm:$0xff] }
 0x2eb   :  { %2507 = vmatprep.mubr.bf16.mxu1 %v9160_v34  ;;  %2589 = vmatprep.mubr.bf16.mxu0 %v9160_v34  ;;  %v968_v59 = vld [vmem:[%s11069_s8 + $0x230] sm:$0xff]  ;;  %v989_v19 = vld [vmem:[%s11069_s8 + $0x2d8] sm:$0xff] }
 0x2ec   :  { %2508 = vmatmul.mubr.bf16.vlgmr.msra.gmra.mrb[0].mxu1 %v9162_v37  ;;  %2590 = vmatmul.mubr.bf16.vlgmr.msra.gmra.mrb[12].mxu0 %v9162_v37  ;;  %v6744_v3 = vcombine.high %v964_v58, %v968_v59  ;;  %v993_v21 = vld [vmem:[%s11069_s8 + $0x2f8] sm:$0xff]  ;;  %v1004_v36 = vld [vmem:[%s11069_s8 + $0x350] sm:$0xff] }
 0x2ed   :  { %2599 = vmatpush1.bf16.msra.mxu1 %v6679_v35  ;;  %2630 = vmatprep.mubr.bf16.mxu1 %v8928_v50  ;;  %v6735_v35 = vcombine.low %v956_v49, %v960_v54  ;;  %v997_v29 = vld [vmem:[%s11069_s8 + $0x318] sm:$0xff]  ;;  %v1008_v43 = vld [vmem:[%s11069_s8 + $0x370] sm:$0xff] }
 0x2ee   :  { %2681 = vmatpush1.bf16.msra.mxu0 %v6681_v39  ;;  %2712 = vmatprep.mubr.bf16.mxu0 %v8928_v50  ;;  %v929_v50 = vld [vmem:[%s11069_s8 + $0xf8] sm:$0xff]  ;;  %v972_v39 = vld [vmem:[%s11069_s8 + $0x250] sm:$0xff] }
 0x2ef   :  { %2600 = vmatprep.subr.bf16.mxu1 %v6688_v41  ;;  %2682 = vmatprep.subr.bf16.mxu0 %v6690_v2  ;;  %v6706_v23 = vcombine.high %v925_v17, %v929_v50  ;;  %v6705_v27 = vcombine.low %v925_v17, %v929_v50  ;;  %v976_v41 = vld [vmem:[%s11069_s8 + $0x270] sm:$0xff]  ;;  %v6737_v2 = vcombine.low %v957_v53, %v961_v55  ;;  %v985_v17 = vld [vmem:[%s11069_s8 + $0x2b8] sm:$0xff] }
 0x2f0   :  { %v6754_v50 = vcombine.high %v973_v4, %v977_v5  ;;  %v1001_v30 = vld [vmem:[%s11069_s8 + $0x338] sm:$0xff]  ;;  %v1012_v49 = vld [vmem:[%s11069_s8 + $0x390] sm:$0xff] }
 0x2f1   :  { %2601 = vmatpush1.bf16.msra.mxu1 %v6687_v7  ;;  %v6743_v7 = vcombine.low %v964_v58, %v968_v59  ;;  %v1005_v45 = vld [vmem:[%s11069_s8 + $0x358] sm:$0xff]  ;;  %v1016_v54 = vld [vmem:[%s11069_s8 + $0x3b0] sm:$0xff] }
 0x2f2   :  { %2683 = vmatpush1.bf16.msra.mxu0 %v6689_v8  ;;  %2602 = vmatprep.subr.bf16.mxu1 %v6696_v9  ;;  %v980_v8 = vld [vmem:[%s11069_s8 + $0x290] sm:$0xff]  ;;  %v1009_v20 = vld [vmem:[%s11069_s8 + $0x378] sm:$0xff] }
 0x2f3   :  { %2684 = vmatprep.subr.bf16.mxu0 %v6698_v11  ;;  %v984_v9 = vld [vmem:[%s11069_s8 + $0x2b0] sm:$0xff]  ;;  %v6752_v11 = vcombine.high %v972_v39, %v976_v41  ;;  %v1013_v53 = vld [vmem:[%s11069_s8 + $0x398] sm:$0xff] }
 0x2f4   :  { %v1017_v55 = vld [vmem:[%s11069_s8 + $0x3b8] sm:$0xff]  ;;  %v1020_v58 = vld [vmem:[%s11069_s8 + $0x3d0] sm:$0xff] }
 0x2f5   :  { %2603 = vmatpush1.bf16.msra.mxu1 %v6695_v13  ;;  %v6751_v13 = vcombine.low %v972_v39, %v976_v41  ;;  %v1024_v59 = vld [vmem:[%s11069_s8 + $0x3f0] sm:$0xff]  ;;  %v1021_v62 = vld [vmem:[%s11069_s8 + $0x3d8] sm:$0xff] }
 0x2f6   :  { %2685 = vmatpush1.bf16.msra.mxu0 %v6697_v16  ;;  %2604 = vmatprep.subr.bf16.mxu1 %v6704_v18  ;;  %v6753_v16 = vcombine.low %v973_v4, %v977_v5  ;;  %v6760_v18 = vcombine.high %v980_v8, %v984_v9  ;;  %v1025_v63 = vld [vmem:[%s11069_s8 + $0x3f8] sm:$0xff]  ;;  %v1028_v39 = vld [vmem:[%s11069_s8 + $0x410] sm:$0xff] }
 0x2f7   :  { %2686 = vmatprep.subr.bf16.mxu0 %v6706_v23  ;;  %v6762_v23 = vcombine.high %v981_v12, %v985_v17  ;;  %v1032_v41 = vld [vmem:[%s11069_s8 + $0x430] sm:$0xff]  ;;  %v1029_v4 = vld [vmem:[%s11069_s8 + $0x418] sm:$0xff] }
 0x2f8   :  { %v1033_v5 = vld [vmem:[%s11069_s8 + $0x438] sm:$0xff] }
 0x2f9   :  { %2605 = vmatpush1.bf16.msra.mxu1 %v6703_v24  ;;  %v6759_v24 = vcombine.low %v980_v8, %v984_v9  ;;  %v6801_v8 = vcombine.low %v1021_v62, %v1025_v63  ;;  %v6808_v9 = vcombine.high %v1028_v39, %v1032_v41 }
 0x2fa   :  { %2687 = vmatpush1.bf16.msra.mxu0 %v6705_v27  ;;  %2606 = vmatprep.subr.bf16.mxu1 %v6712_v28  ;;  %v6761_v27 = vcombine.low %v981_v12, %v985_v17  ;;  %v6768_v28 = vcombine.high %v988_v14, %v992_v15  ;;  %v6810_v12 = vcombine.high %v1029_v4, %v1033_v5  ;;  %v1037_v17 = vld [vmem:[%s11069_s8 + $0x458] sm:$0xff] }
 0x2fb   :  { %2688 = vmatprep.subr.bf16.mxu0 %v6714_v31  ;;  %v6770_v31 = vcombine.high %v989_v19, %v993_v21 }
 0x2fd   :  { %2607 = vmatpush1.bf16.msra.mxu1 %v6711_v32  ;;  %v6767_v32 = vcombine.low %v988_v14, %v992_v15  ;;  %v1044_v14 = vld [vmem:[%s11069_s8 + $0x490] sm:$0xff] }
 0x2fe   :  { %2689 = vmatpush1.bf16.msra.mxu0 %v6713_v22  ;;  %2608 = vmatprep.subr.bf16.mxu1 %v6720_v44  ;;  %v6769_v22 = vcombine.low %v989_v19, %v993_v21  ;;  %v6776_v44 = vcombine.high %v996_v25, %v1000_v26  ;;  %v1048_v15 = vld [vmem:[%s11069_s8 + $0x4b0] sm:$0xff]  ;;  %v1049_v19 = vld [vmem:[%s11069_s8 + $0x4b8] sm:$0xff] }
 0x2ff   :  { %2690 = vmatprep.subr.bf16.mxu0 %v6722_v46  ;;  %v6778_v46 = vcombine.high %v997_v29, %v1001_v30 }
 0x301   :  { %2609 = vmatpush1.bf16.msra.mxu1 %v6719_v47  ;;  %v6775_v47 = vcombine.low %v996_v25, %v1000_v26  ;;  %v1052_v25 = vld [vmem:[%s11069_s8 + $0x4d0] sm:$0xff] }
 0x302   :  { %2691 = vmatpush1.bf16.msra.mxu0 %v6721_v48  ;;  %2610 = vmatprep.subr.bf16.mxu1 %v6728_v52  ;;  %v6777_v48 = vcombine.low %v997_v29, %v1001_v30  ;;  %v6784_v52 = vcombine.high %v1004_v36, %v1008_v43  ;;  %v1056_v26 = vld [vmem:[%s11069_s8 + $0x4f0] sm:$0xff]  ;;  %v1053_v29 = vld [vmem:[%s11069_s8 + $0x4d8] sm:$0xff] }
 0x303   :  { %2692 = vmatprep.subr.bf16.mxu0 %v6730_v56  ;;  %v6786_v56 = vcombine.high %v1005_v45, %v1009_v20 }
 0x305   :  { %2611 = vmatpush1.bf16.msra.mxu1 %v6727_v57  ;;  %v6783_v57 = vcombine.low %v1004_v36, %v1008_v43  ;;  %v1064_v36 = vld [vmem:[%s11069_s8 + $0x530] sm:$0xff] }
 0x306   :  { %2693 = vmatpush1.bf16.msra.mxu0 %v6729_v60  ;;  %2612 = vmatprep.subr.bf16.mxu1 %v6736_v61  ;;  %v6785_v60 = vcombine.low %v1005_v45, %v1009_v20  ;;  %v6792_v61 = vcombine.high %v1012_v49, %v1016_v54  ;;  %v6831_v20 = vcombine.low %v1052_v25, %v1056_v26 }
 0x307   :  { %2694 = vmatprep.subr.bf16.mxu0 %v6738_v33  ;;  %v6794_v33 = vcombine.high %v1013_v53, %v1017_v55 }
 0x309   :  { %2613 = vmatpush1.bf16.msra.mxu1 %v6735_v35  ;;  %v6791_v35 = vcombine.low %v1012_v49, %v1016_v54 }
 0x30a   :  { %2695 = vmatpush1.bf16.msra.mxu0 %v6737_v2  ;;  %2614 = vmatprep.subr.bf16.mxu1 %v6744_v3  ;;  %v6793_v2 = vcombine.low %v1013_v53, %v1017_v55  ;;  %v6800_v3 = vcombine.high %v1020_v58, %v1024_v59 }
 0x30b   :  { %2696 = vmatprep.subr.bf16.mxu0 %v6746_v6  ;;  %v6802_v6 = vcombine.high %v1021_v62, %v1025_v63 }
 0x30d   :  { %2615 = vmatpush1.bf16.msra.mxu1 %v6743_v7  ;;  %v6799_v7 = vcombine.low %v1020_v58, %v1024_v59 }
 0x30e   :  { %2697 = vmatpush1.bf16.msra.mxu0 %v6745_v10  ;;  %2616 = vmatprep.subr.bf16.mxu1 %v6752_v11  ;;  %v1036_v10 = vld [vmem:[%s11069_s8 + $0x450] sm:$0xff] }
 0x30f   :  { %2698 = vmatprep.subr.bf16.mxu0 %v6754_v50  ;;  %v1040_v11 = vld [vmem:[%s11069_s8 + $0x470] sm:$0xff]  ;;  %v1041_v50 = vld [vmem:[%s11069_s8 + $0x478] sm:$0xff] }
 0x310   :  { %v6816_v21 = vcombine.high %v1036_v10, %v1040_v11 }
 0x311   :  { %2617 = vmatpush1.bf16.msra.mxu1 %v6751_v13  ;;  %v6807_v13 = vcombine.low %v1028_v39, %v1032_v41 }
 0x312   :  { %2699 = vmatpush1.bf16.msra.mxu0 %v6753_v16  ;;  %2618 = vmatprep.subr.bf16.mxu1 %v6760_v18  ;;  %v6809_v16 = vcombine.low %v1029_v4, %v1033_v5  ;;  %v1045_v18 = vld [vmem:[%s11069_s8 + $0x498] sm:$0xff] }
 0x313   :  { %2700 = vmatprep.subr.bf16.mxu0 %v6762_v23  ;;  %v6818_v23 = vcombine.high %v1037_v17, %v1041_v50  ;;  %v6826_v30 = vcombine.high %v1045_v18, %v1049_v19  ;;  %v6825_v43 = vcombine.low %v1045_v18, %v1049_v19  ;;  %v1089_v4 = vld [vmem:[%s11069_s8 + $0x5f8] sm:$0xff] }
 0x314   :  { %v1101_v18 = vld [vmem:[%s11069_s8 + $0x658] sm:$0xff] }
 0x315   :  { %2619 = vmatpush1.bf16.msra.mxu1 %v6759_v24  ;;  %v6815_v24 = vcombine.low %v1036_v10, %v1040_v11  ;;  %v1093_v11 = vld [vmem:[%s11069_s8 + $0x618] sm:$0xff] }
 0x316   :  { %2701 = vmatpush1.bf16.msra.mxu0 %v6761_v27  ;;  %2620 = vmatprep.subr.bf16.mxu1 %v6768_v28  ;;  %v6817_v27 = vcombine.low %v1037_v17, %v1041_v50  ;;  %v6824_v28 = vcombine.high %v1044_v14, %v1048_v15  ;;  %v1100_v50 = vld [vmem:[%s11069_s8 + $0x650] sm:$0xff]  ;;  %v1105_v19 = vld [vmem:[%s11069_s8 + $0x678] sm:$0xff] }
 0x317   :  { %2702 = vmatprep.subr.bf16.mxu0 %v6770_v31  ;;  %v6823_v31 = vcombine.low %v1044_v14, %v1048_v15 }
 0x319   :  { %2621 = vmatpush1.bf16.msra.mxu1 %v6767_v32  ;;  %v1060_v32 = vld [vmem:[%s11069_s8 + $0x510] sm:$0xff] }
 0x31a   :  { %2703 = vmatpush1.bf16.msra.mxu0 %v6769_v22  ;;  %2622 = vmatprep.subr.bf16.mxu1 %v6776_v44  ;;  %v6832_v22 = vcombine.high %v1052_v25, %v1056_v26  ;;  %v1065_v44 = vld [vmem:[%s11069_s8 + $0x538] sm:$0xff]  ;;  %v6840_v54 = vcombine.high %v1060_v32, %v1064_v36  ;;  %v6839_v55 = vcombine.low %v1060_v32, %v1064_v36 }
 0x31b   :  { %2704 = vmatprep.subr.bf16.mxu0 %v6778_v46  ;;  %v1068_v46 = vld [vmem:[%s11069_s8 + $0x550] sm:$0xff]  ;;  %v6881_v32 = vcombine.low %v1101_v18, %v1105_v19 }
 0x31d   :  { %2623 = vmatpush1.bf16.msra.mxu1 %v6775_v47  ;;  %v1072_v47 = vld [vmem:[%s11069_s8 + $0x570] sm:$0xff] }
 0x31e   :  { %2705 = vmatpush1.bf16.msra.mxu0 %v6777_v48  ;;  %2624 = vmatprep.subr.bf16.mxu1 %v6784_v52  ;;  %v1069_v48 = vld [vmem:[%s11069_s8 + $0x558] sm:$0xff]  ;;  %v6848_v59 = vcombine.high %v1068_v46, %v1072_v47  ;;  %v6847_v63 = vcombine.low %v1068_v46, %v1072_v47 }
 0x31f   :  { %2706 = vmatprep.subr.bf16.mxu0 %v6786_v56  ;;  %v1073_v52 = vld [vmem:[%s11069_s8 + $0x578] sm:$0xff]  ;;  %v1076_v56 = vld [vmem:[%s11069_s8 + $0x590] sm:$0xff] }
 0x320   :  { %v6850_v62 = vcombine.high %v1069_v48, %v1073_v52  ;;  %v6849_v39 = vcombine.low %v1069_v48, %v1073_v52  ;;  %v1129_v48 = vld [vmem:[%s11069_s8 + $0x738] sm:$0xff] }
 0x321   :  { %2625 = vmatpush1.bf16.msra.mxu1 %v6783_v57  ;;  %v1080_v57 = vld [vmem:[%s11069_s8 + $0x5b0] sm:$0xff] }
 0x322   :  { %2707 = vmatpush1.bf16.msra.mxu0 %v6785_v60  ;;  %2626 = vmatprep.subr.bf16.mxu1 %v6792_v61  ;;  %v1077_v60 = vld [vmem:[%s11069_s8 + $0x598] sm:$0xff]  ;;  %v6856_v41 = vcombine.high %v1076_v56, %v1080_v57  ;;  %v6855_v5 = vcombine.low %v1076_v56, %v1080_v57 }
 0x323   :  { %2708 = vmatprep.subr.bf16.mxu0 %v6794_v33  ;;  %v1081_v61 = vld [vmem:[%s11069_s8 + $0x5b8] sm:$0xff]  ;;  %v1084_v33 = vld [vmem:[%s11069_s8 + $0x5d0] sm:$0xff] }
 0x325   :  { %2627 = vmatpush1.bf16.msra.mxu1 %v6791_v35  ;;  %v1088_v35 = vld [vmem:[%s11069_s8 + $0x5f0] sm:$0xff] }
 0x326   :  { %2709 = vmatpush1.bf16.msra.mxu0 %v6793_v2  ;;  %2628 = vmatprep.subr.bf16.mxu1 %v6800_v3  ;;  %v6858_v2 = vcombine.high %v1077_v60, %v1081_v61  ;;  %v1085_v3 = vld [vmem:[%s11069_s8 + $0x5d8] sm:$0xff]  ;;  %v6863_v17 = vcombine.low %v1084_v33, %v1088_v35 }
 0x327   :  { %2710 = vmatprep.subr.bf16.mxu0 %v6802_v6  ;;  %v1092_v6 = vld [vmem:[%s11069_s8 + $0x610] sm:$0xff]  ;;  %v6866_v10 = vcombine.high %v1085_v3, %v1089_v4  ;;  %v6865_v14 = vcombine.low %v1085_v3, %v1089_v4 }
 0x328   :  { %v1148_v4 = vld [vmem:[%s11069_s8 + $0x7d0] sm:$0xff] }
 0x329   :  { %2629 = vmatpush1.bf16.msra.mxu1 %v6799_v7  ;;  %v1096_v7 = vld [vmem:[%s11069_s8 + $0x630] sm:$0xff] }
 0x32a   :  { %2711 = vmatpush1.bf16.msra.mxu0 %v6801_v8  ;;  %2639 = vmatprep.subr.bf16.mxu1 %v6808_v9  ;;  %v6857_v8 = vcombine.low %v1077_v60, %v1081_v61  ;;  %v6864_v9 = vcombine.high %v1084_v33, %v1088_v35  ;;  %v6872_v15 = vcombine.high %v1092_v6, %v1096_v7  ;;  %v1137_v60 = vld [vmem:[%s11069_s8 + $0x778] sm:$0xff] }
 0x32b   :  { %2721 = vmatprep.subr.bf16.mxu0 %v6810_v12  ;;  %v1097_v12 = vld [vmem:[%s11069_s8 + $0x638] sm:$0xff] }
 0x32c   :  { %2631 = vmatmul.mubr.bf16.vlgmr.msra.gmra.mrb[4].mxu1 %v8930_v51  ;;  %v6873_v25 = vcombine.low %v1093_v11, %v1097_v12 }
 0x32d   :  { %2713 = vmatmul.mubr.bf16.vlgmr.msra.gmra.mrb[16].mxu0 %v8930_v51  ;;  %2640 = vmatpush1.bf16.msra.mxu1 %v6807_v13  ;;  %v1057_v51 = vld [vmem:[%s11069_s8 + $0x4f8] sm:$0xff]  ;;  %v1104_v13 = vld [vmem:[%s11069_s8 + $0x670] sm:$0xff] }
 0x32e   :  { %2671 = vmatprep.mubr.bf16.mxu1 %v9160_v34  ;;  %2722 = vmatpush1.bf16.msra.mxu0 %v6809_v16  ;;  %v6834_v45 = vcombine.high %v1053_v29, %v1057_v51  ;;  %v6833_v49 = vcombine.low %v1053_v29, %v1057_v51  ;;  %v6874_v16 = vcombine.high %v1093_v11, %v1097_v12  ;;  %v1113_v29 = vld [vmem:[%s11069_s8 + $0x6b8] sm:$0xff] }
 0x32f   :  { %2753 = vmatprep.mubr.bf16.mxu0 %v9160_v34  ;;  %2641 = vmatprep.subr.bf16.mxu1 %v6816_v21  ;;  %v1061_v34 = vld [vmem:[%s11069_s8 + $0x518] sm:$0xff]  ;;  %v6871_v21 = vcombine.low %v1092_v6, %v1096_v7  ;;  %v6880_v26 = vcombine.high %v1100_v50, %v1104_v13  ;;  %v6879_v51 = vcombine.low %v1100_v50, %v1104_v13 }
 0x330   :  { %2723 = vmatprep.subr.bf16.mxu0 %v6818_v23  ;;  %v6842_v53 = vcombine.high %v1061_v34, %v1065_v44  ;;  %v6841_v58 = vcombine.low %v1061_v34, %v1065_v44  ;;  %v1108_v23 = vld [vmem:[%s11069_s8 + $0x690] sm:$0xff]  ;;  %v1121_v34 = vld [vmem:[%s11069_s8 + $0x6f8] sm:$0xff] }
 0x331   :  { %2642 = vmatpush1.bf16.msra.mxu1 %v6815_v24  ;;  %v1112_v24 = vld [vmem:[%s11069_s8 + $0x6b0] sm:$0xff] }
 0x332   :  { %2724 = vmatpush1.bf16.msra.mxu0 %v6817_v27  ;;  %2643 = vmatprep.subr.bf16.mxu1 %v6824_v28  ;;  %v6882_v27 = vcombine.high %v1101_v18, %v1105_v19  ;;  %v1109_v28 = vld [vmem:[%s11069_s8 + $0x698] sm:$0xff]  ;;  %v6888_v36 = vcombine.high %v1108_v23, %v1112_v24  ;;  %v6887_v44 = vcombine.low %v1108_v23, %v1112_v24  ;;  %v7651_v19 = vld [vmem:[%s11074_s11 + $0x8] ss:$28 sps:$4 sm:$0xff]  }
 0x333   :  { %2725 = vmatprep.subr.bf16.mxu0 %v6826_v30  ;;  %v1116_v30 = vld [vmem:[%s11069_s8 + $0x6d0] sm:$0xff]  ;;  %v6889_v46 = vcombine.low %v1109_v28, %v1113_v29  ;;  %v7648_v18 = vld [vmem:[%s11074_s11] ss:$28 sps:$4 sm:$0xff]  }
 0x334   :  { %v7659_v23 = vld [vmem:[%s11074_s11 + $0x44] ss:$28 sps:$4 sm:$0xff]   ;;  %v7654_v24 = vld [vmem:[%s11074_s11 + $0x38] ss:$28 sps:$4 sm:$0xff]  }
 0x335   :  { %2644 = vmatpush1.bf16.msra.mxu1 %v6823_v31  ;;  %v1120_v31 = vld [vmem:[%s11069_s8 + $0x6f0] sm:$0xff] }
 0x336   :  { %2726 = vmatpush1.bf16.msra.mxu0 %v6825_v43  ;;  %2645 = vmatprep.subr.bf16.mxu1 %v6832_v22  ;;  %v6890_v43 = vcombine.high %v1109_v28, %v1113_v29  ;;  %v1117_v22 = vld [vmem:[%s11069_s8 + $0x6d8] sm:$0xff]  ;;  %v6896_v47 = vcombine.high %v1116_v30, %v1120_v31  ;;  %v6895_v52 = vcombine.low %v1116_v30, %v1120_v31  ;;  %v7660_v28 = vld [vmem:[%s11074_s11 + $0x70] ss:$28 sps:$4 sm:$0xff]   ;;  %v7666_v30 = vld [vmem:[%s11074_s11 + $0xa8] ss:$28 sps:$4 sm:$0xff]  }
 0x337   :  { %2727 = vmatprep.subr.bf16.mxu0 %v6834_v45  ;;  %v1124_v45 = vld [vmem:[%s11069_s8 + $0x710] sm:$0xff]  ;;  %v6897_v56 = vcombine.low %v1117_v22, %v1121_v34  ;;  %v7668_v29 = vld [vmem:[%s11074_s11 + $0xac] ss:$28 sps:$4 sm:$0xff]  }
 0x338   :  { %v7669_v31 = vld [vmem:[%s11074_s11 + $0xb0] ss:$28 sps:$4 sm:$0xff]  }
 0x339   :  { %2646 = vmatpush1.bf16.msra.mxu1 %v6831_v20  ;;  %v1128_v20 = vld [vmem:[%s11069_s8 + $0x730] sm:$0xff] }
 0x33a   :  { %2728 = vmatpush1.bf16.msra.mxu0 %v6833_v49  ;;  %2647 = vmatprep.subr.bf16.mxu1 %v6840_v54  ;;  %v6898_v49 = vcombine.high %v1117_v22, %v1121_v34  ;;  %v1125_v54 = vld [vmem:[%s11069_s8 + $0x718] sm:$0xff]  ;;  %v6904_v57 = vcombine.high %v1124_v45, %v1128_v20  ;;  %v6903_v61 = vcombine.low %v1124_v45, %v1128_v20  ;;  %v7675_v22 = vld [vmem:[%s11074_s11 + $0xe8] ss:$28 sps:$4 sm:$0xff]  }
 0x33b   :  { %2729 = vmatprep.subr.bf16.mxu0 %v6842_v53  ;;  %v1132_v53 = vld [vmem:[%s11069_s8 + $0x750] sm:$0xff]  ;;  %v6905_v33 = vcombine.low %v1125_v54, %v1129_v48  ;;  %v7680_v34 = vld [vmem:[%s11074_s11 + $0x11c] ss:$28 sps:$4 sm:$0xff]  }
 0x33c   :  { %v7678_v45 = vld [vmem:[%s11074_s11 + $0x118] ss:$28 sps:$4 sm:$0xff]   ;;  %v7681_v20 = vld [vmem:[%s11074_s11 + $0x120] ss:$28 sps:$4 sm:$0xff]  }
 0x33d   :  { %2648 = vmatpush1.bf16.msra.mxu1 %v6839_v55  ;;  %v1136_v55 = vld [vmem:[%s11069_s8 + $0x770] sm:$0xff] }
 0x33e   :  { %2730 = vmatpush1.bf16.msra.mxu0 %v6841_v58  ;;  %2649 = vmatprep.subr.bf16.mxu1 %v6848_v59  ;;  %v6906_v58 = vcombine.high %v1125_v54, %v1129_v48  ;;  %v1133_v59 = vld [vmem:[%s11069_s8 + $0x758] sm:$0xff]  ;;  %v6912_v35 = vcombine.high %v1132_v53, %v1136_v55  ;;  %v6911_v3 = vcombine.low %v1132_v53, %v1136_v55  ;;  %v7692_v48 = vld [vmem:[%s11074_s11 + $0x18c] ss:$28 sps:$4 sm:$0xff]   ;;  %v7695_v53 = vld [vmem:[%s11074_s11 + $0x194] ss:$28 sps:$4 sm:$0xff]  }
 0x33f   :  { %2731 = vmatprep.subr.bf16.mxu0 %v6850_v62  ;;  %v1140_v62 = vld [vmem:[%s11069_s8 + $0x790] sm:$0xff]  ;;  %v6913_v6 = vcombine.low %v1133_v59, %v1137_v60 }
 0x340   :  { %v7687_v54 = vld [vmem:[%s11074_s11 + $0x158] ss:$28 sps:$4 sm:$0xff]   ;;  %v7693_v55 = vld [vmem:[%s11074_s11 + $0x190] ss:$28 sps:$4 sm:$0xff]  }
 0x341   :  { %2650 = vmatpush1.bf16.msra.mxu1 %v6847_v63  ;;  %v1144_v63 = vld [vmem:[%s11069_s8 + $0x7b0] sm:$0xff] }
 0x342   :  { %2732 = vmatpush1.bf16.msra.mxu0 %v6849_v39  ;;  %2651 = vmatprep.subr.bf16.mxu1 %v6856_v41  ;;  %v6914_v39 = vcombine.high %v1133_v59, %v1137_v60  ;;  %v1141_v41 = vld [vmem:[%s11069_s8 + $0x798] sm:$0xff]  ;;  %v6920_v7 = vcombine.high %v1140_v62, %v1144_v63  ;;  %v6919_v11 = vcombine.low %v1140_v62, %v1144_v63  ;;  %v7699_v59 = vld [vmem:[%s11074_s11 + $0x1c8] ss:$28 sps:$4 sm:$0xff]  }
 0x343   :  { %2733 = vmatprep.subr.bf16.mxu0 %v6858_v2  ;;  %v1145_v2 = vld [vmem:[%s11069_s8 + $0x7b8] sm:$0xff]  ;;  %v7707_v62 = vld [vmem:[%s11074_s11 + $0x204] ss:$28 sps:$4 sm:$0xff]  }
 0x344   :  { %v6921_v12 = vcombine.low %v1141_v41, %v1145_v2  ;;  %v7704_v60 = vld [vmem:[%s11074_s11 + $0x1fc] ss:$28 sps:$4 sm:$0xff]  }
 0x345   :  { %2652 = vmatpush1.bf16.msra.mxu1 %v6855_v5  ;;  %v1152_v5 = vld [vmem:[%s11069_s8 + $0x7f0] sm:$0xff]  ;;  %v7705_v63 = vld [vmem:[%s11074_s11 + $0x200] ss:$28 sps:$4 sm:$0xff]  }
 0x346   :  { %2734 = vmatpush1.bf16.msra.mxu0 %v6857_v8  ;;  %2653 = vmatprep.subr.bf16.mxu1 %v6864_v9  ;;  %v6922_v8 = vcombine.high %v1141_v41, %v1145_v2  ;;  %v1149_v9 = vld [vmem:[%s11069_s8 + $0x7d8] sm:$0xff]  ;;  %v6927_v13 = vcombine.low %v1148_v4, %v1152_v5  ;;  %v7716_v2 = vld [vmem:[%s11074_s11 + $0x26c] ss:$28 sps:$4 sm:$0xff]  }
 0x347   :  { %2735 = vmatprep.subr.bf16.mxu0 %v6866_v10  ;;  %v1153_v10 = vld [vmem:[%s11069_s8 + $0x7f8] sm:$0xff] }
 0x348   :  { %v6930_v50 = vcombine.high %v1149_v9, %v1153_v10  ;;  %v7711_v41 = vld [vmem:[%s11074_s11 + $0x238] ss:$28 sps:$4 sm:$0xff]  }
 0x349   :  { %2654 = vmatpush1.bf16.msra.mxu1 %v6863_v17  ;;  %v6928_v17 = vcombine.high %v1148_v4, %v1152_v5  ;;  %v7719_v4 = vld [vmem:[%s11074_s11 + $0x274] ss:$28 sps:$4 sm:$0xff]  }
 0x34a   :  { %2736 = vmatpush1.bf16.msra.mxu0 %v6865_v14  ;;  %2655 = vmatprep.subr.bf16.mxu1 %v6872_v15  ;;  %v7650_v14 = vld [vmem:[%s11074_s11 + $0x4] ss:$28 sps:$4 sm:$0xff]   ;;  %v7653_v15 = vld [vmem:[%s11074_s11 + $0xc] ss:$28 sps:$4 sm:$0xff]  }
 0x34b   :  { %2737 = vmatprep.subr.bf16.mxu0 %v6874_v16  ;;  %v6929_v16 = vcombine.low %v1149_v9, %v1153_v10  ;;  %v7717_v5 = vld [vmem:[%s11074_s11 + $0x270] ss:$28 sps:$4 sm:$0xff]   ;;  %v7723_v9 = vld [vmem:[%s11074_s11 + $0x2a8] ss:$28 sps:$4 sm:$0xff]   ;;  %v7728_v10 = vld [vmem:[%s11074_s11 + $0x2dc] ss:$28 sps:$4 sm:$0xff]  }
 0x34d   :  { %2656 = vmatpush1.bf16.msra.mxu1 %v6871_v21  ;;  %v7656_v21 = vld [vmem:[%s11074_s11 + $0x3c] ss:$28 sps:$4 sm:$0xff]  }
 0x34e   :  { %2738 = vmatpush1.bf16.msra.mxu0 %v6873_v25  ;;  %2657 = vmatprep.subr.bf16.mxu1 %v6880_v26  ;;  %v7657_v25 = vld [vmem:[%s11074_s11 + $0x40] ss:$28 sps:$4 sm:$0xff]   ;;  %v7662_v26 = vld [vmem:[%s11074_s11 + $0x74] ss:$28 sps:$4 sm:$0xff]  }
 0x34f   :  { %2739 = vmatprep.subr.bf16.mxu0 %v6882_v27  ;;  %v7665_v27 = vld [vmem:[%s11074_s11 + $0x7c] ss:$28 sps:$4 sm:$0xff]  }
 0x351   :  { %2658 = vmatpush1.bf16.msra.mxu1 %v6879_v51  ;;  %v7671_v51 = vld [vmem:[%s11074_s11 + $0xb4] ss:$28 sps:$4 sm:$0xff]  }
 0x352   :  { %2740 = vmatpush1.bf16.msra.mxu0 %v6881_v32  ;;  %2659 = vmatprep.subr.bf16.mxu1 %v6888_v36  ;;  %v7674_v32 = vld [vmem:[%s11074_s11 + $0xe4] ss:$28 sps:$4 sm:$0xff]   ;;  %v7677_v36 = vld [vmem:[%s11074_s11 + $0xec] ss:$28 sps:$4 sm:$0xff]  }
 0x353   :  { %2741 = vmatprep.subr.bf16.mxu0 %v6890_v43  ;;  %v7672_v43 = vld [vmem:[%s11074_s11 + $0xe0] ss:$28 sps:$4 sm:$0xff]  }
 0x355   :  { %2660 = vmatpush1.bf16.msra.mxu1 %v6887_v44  ;;  %v7683_v44 = vld [vmem:[%s11074_s11 + $0x124] ss:$28 sps:$4 sm:$0xff]  }
 0x356   :  { %2742 = vmatpush1.bf16.msra.mxu0 %v6889_v46  ;;  %2661 = vmatprep.subr.bf16.mxu1 %v6896_v47  ;;  %v7686_v46 = vld [vmem:[%s11074_s11 + $0x154] ss:$28 sps:$4 sm:$0xff]   ;;  %v7689_v47 = vld [vmem:[%s11074_s11 + $0x15c] ss:$28 sps:$4 sm:$0xff]  }
 0x357   :  { %2743 = vmatprep.subr.bf16.mxu0 %v6898_v49  ;;  %v7684_v49 = vld [vmem:[%s11074_s11 + $0x150] ss:$28 sps:$4 sm:$0xff]  }
 0x359   :  { %2662 = vmatpush1.bf16.msra.mxu1 %v6895_v52  ;;  %v7690_v52 = vld [vmem:[%s11074_s11 + $0x188] ss:$28 sps:$4 sm:$0xff]  }
 0x35a   :  { %2744 = vmatpush1.bf16.msra.mxu0 %v6897_v56  ;;  %2663 = vmatprep.subr.bf16.mxu1 %v6904_v57  ;;  %v7698_v56 = vld [vmem:[%s11074_s11 + $0x1c4] ss:$28 sps:$4 sm:$0xff]  }
 0x35b   :  { %2745 = vmatprep.subr.bf16.mxu0 %v6906_v58  ;;  %v7696_v57 = vld [vmem:[%s11074_s11 + $0x1c0] ss:$28 sps:$4 sm:$0xff]   ;;  %v7701_v58 = vld [vmem:[%s11074_s11 + $0x1cc] ss:$28 sps:$4 sm:$0xff]  }
 0x35d   :  { %2664 = vmatpush1.bf16.msra.mxu1 %v6903_v61  ;;  %v7702_v61 = vld [vmem:[%s11074_s11 + $0x1f8] ss:$28 sps:$4 sm:$0xff]  }
 0x35e   :  { %2746 = vmatpush1.bf16.msra.mxu0 %v6905_v33  ;;  %2665 = vmatprep.subr.bf16.mxu1 %v6912_v35  ;;  %v7710_v33 = vld [vmem:[%s11074_s11 + $0x234] ss:$28 sps:$4 sm:$0xff]  }
 0x35f   :  { %2747 = vmatprep.subr.bf16.mxu0 %v6914_v39  ;;  %v7708_v35 = vld [vmem:[%s11074_s11 + $0x230] ss:$28 sps:$4 sm:$0xff]   ;;  %v7713_v39 = vld [vmem:[%s11074_s11 + $0x23c] ss:$28 sps:$4 sm:$0xff]  }
 0x361   :  { %2666 = vmatpush1.bf16.msra.mxu1 %v6911_v3  ;;  %v7714_v3 = vld [vmem:[%s11074_s11 + $0x268] ss:$28 sps:$4 sm:$0xff]  }
 0x362   :  { %2748 = vmatpush1.bf16.msra.mxu0 %v6913_v6  ;;  %2667 = vmatprep.subr.bf16.mxu1 %v6920_v7  ;;  %v7722_v6 = vld [vmem:[%s11074_s11 + $0x2a4] ss:$28 sps:$4 sm:$0xff]  }
 0x363   :  { %2749 = vmatprep.subr.bf16.mxu0 %v6922_v8  ;;  %v7720_v7 = vld [vmem:[%s11074_s11 + $0x2a0] ss:$28 sps:$4 sm:$0xff]   ;;  %v7725_v8 = vld [vmem:[%s11074_s11 + $0x2ac] ss:$28 sps:$4 sm:$0xff]  }
 0x365   :  { %2668 = vmatpush1.bf16.msra.mxu1 %v6919_v11  ;;  %v7726_v11 = vld [vmem:[%s11074_s11 + $0x2d8] ss:$28 sps:$4 sm:$0xff]  }
 0x366   :  { %2750 = vmatpush1.bf16.msra.mxu0 %v6921_v12  ;;  %2669 = vmatprep.subr.bf16.mxu1 %v6928_v17  ;;  %v7731_v12 = vld [vmem:[%s11074_s11 + $0x2e4] ss:$28 sps:$4 sm:$0xff]  }
 0x367   :  { %2751 = vmatprep.subr.bf16.mxu0 %v6930_v50  ;;  %v7729_v17 = vld [vmem:[%s11074_s11 + $0x2e0] ss:$28 sps:$4 sm:$0xff]   ;;  %v7734_v50 = vld [vmem:[%s11074_s11 + $0x314] ss:$28 sps:$4 sm:$0xff]  }
 0x369   :  { %2670 = vmatpush1.bf16.msra.mxu1 %v6927_v13  ;;  %v7732_v13 = vld [vmem:[%s11074_s11 + $0x310] ss:$28 sps:$4 sm:$0xff]  }
 0x36a   :  { %2752 = vmatpush1.bf16.msra.mxu0 %v6929_v16  ;;  %5923 = vmatprep.subr.bf16.mxu1 %v7650_v14  ;;  %v7737_v14 = vld [vmem:[%s11074_s11 + $0x31c] ss:$28 sps:$4 sm:$0xff]   ;;  %v7740_v16 = vld [vmem:[%s11074_s11 + $0x34c] ss:$28 sps:$4 sm:$0xff]  }
 0x36b   :  { %6087 = vmatprep.subr.bf16.mxu0 %v7653_v15  ;;  %v7735_v15 = vld [vmem:[%s11074_s11 + $0x318] ss:$28 sps:$4 sm:$0xff]  }
 0x36c   :  { %2672 = vmatmul.mubr.bf16.vlgmr.msra.gmra.mrb[4].mxu1 %v9162_v37 }
 0x36d   :  { %2754 = vmatmul.mubr.bf16.vlgmr.msra.gmra.mrb[16].mxu0 %v9162_v37  ;;  %5924 = vmatpush1.bf16.msra.mxu1 %v7648_v18  ;;  %v7663_v37 = vld [vmem:[%s11074_s11 + $0x78] ss:$28 sps:$4 sm:$0xff]   ;;  %v7738_v18 = vld [vmem:[%s11074_s11 + $0x348] ss:$28 sps:$4 sm:$0xff]  }
 0x36e   :  { %6088 = vmatpush1.bf16.msra.mxu0 %v7651_v19  ;;  %5925 = vmatprep.subr.bf16.mxu1 %v7656_v21  ;;  %v7743_v19 = vld [vmem:[%s11074_s11 + $0x354] ss:$28 sps:$4 sm:$0xff]  }
 0x36f   :  { %6089 = vmatprep.subr.bf16.mxu0 %v7659_v23  ;;  %v7741_v21 = vld [vmem:[%s11074_s11 + $0x350] ss:$28 sps:$4 sm:$0xff]   ;;  %v7746_v23 = vld [vmem:[%s11074_s11 + $0x384] ss:$28 sps:$4 sm:$0xff]  }
 0x371   :  { %5926 = vmatpush1.bf16.msra.mxu1 %v7654_v24  ;;  %v7749_v24 = vld [vmem:[%s11074_s11 + $0x38c] ss:$28 sps:$4 sm:$0xff]  }
 0x372   :  { %6090 = vmatpush1.bf16.msra.mxu0 %v7657_v25  ;;  %5927 = vmatprep.subr.bf16.mxu1 %v7662_v26 }
 0x373   :  { %6091 = vmatprep.subr.bf16.mxu0 %v7665_v27 }
 0x375   :  { %5928 = vmatpush1.bf16.msra.mxu1 %v7660_v28 }
 0x376   :  { %6092 = vmatpush1.bf16.msra.mxu0 %v7663_v37  ;;  %5929 = vmatprep.subr.bf16.mxu1 %v7668_v29 }
 0x377   :  { %6093 = vmatprep.subr.bf16.mxu0 %v7671_v51 }
 0x379   :  { %5930 = vmatpush1.bf16.msra.mxu1 %v7666_v30 }
 0x37a   :  { %6094 = vmatpush1.bf16.msra.mxu0 %v7669_v31  ;;  %5931 = vmatprep.subr.bf16.mxu1 %v7674_v32 }
 0x37b   :  { %6095 = vmatprep.subr.bf16.mxu0 %v7677_v36 }
 0x37d   :  { %5932 = vmatpush1.bf16.msra.mxu1 %v7672_v43 }
 0x37e   :  { %6096 = vmatpush1.bf16.msra.mxu0 %v7675_v22  ;;  %5933 = vmatprep.subr.bf16.mxu1 %v7680_v34 }
 0x37f   :  { %6097 = vmatprep.subr.bf16.mxu0 %v7683_v44 }
 0x381   :  { %5934 = vmatpush1.bf16.msra.mxu1 %v7678_v45 }
 0x382   :  { %6098 = vmatpush1.bf16.msra.mxu0 %v7681_v20  ;;  %5935 = vmatprep.subr.bf16.mxu1 %v7686_v46 }
 0x383   :  { %6099 = vmatprep.subr.bf16.mxu0 %v7689_v47 }
 0x385   :  { %5936 = vmatpush1.bf16.msra.mxu1 %v7684_v49 }
 0x386   :  { %6100 = vmatpush1.bf16.msra.mxu0 %v7687_v54  ;;  %5937 = vmatprep.subr.bf16.mxu1 %v7692_v48 }
 0x387   :  { %6101 = vmatprep.subr.bf16.mxu0 %v7695_v53 }
 0x389   :  { %5938 = vmatpush1.bf16.msra.mxu1 %v7690_v52 }
 0x38a   :  { %6102 = vmatpush1.bf16.msra.mxu0 %v7693_v55  ;;  %5939 = vmatprep.subr.bf16.mxu1 %v7698_v56 }
 0x38b   :  { %6103 = vmatprep.subr.bf16.mxu0 %v7701_v58 }
 0x38d   :  { %5940 = vmatpush1.bf16.msra.mxu1 %v7696_v57 }
 0x38e   :  { %6104 = vmatpush1.bf16.msra.mxu0 %v7699_v59  ;;  %5941 = vmatprep.subr.bf16.mxu1 %v7704_v60 }
 0x38f   :  { %6105 = vmatprep.subr.bf16.mxu0 %v7707_v62 }
 0x391   :  { %5942 = vmatpush1.bf16.msra.mxu1 %v7702_v61 }
 0x392   :  { %6106 = vmatpush1.bf16.msra.mxu0 %v7705_v63  ;;  %5943 = vmatprep.subr.bf16.mxu1 %v7710_v33 }
 0x393   :  { %6107 = vmatprep.subr.bf16.mxu0 %v7713_v39 }
 0x395   :  { %5944 = vmatpush1.bf16.msra.mxu1 %v7708_v35 }
 0x396   :  { %6108 = vmatpush1.bf16.msra.mxu0 %v7711_v41  ;;  %5945 = vmatprep.subr.bf16.mxu1 %v7716_v2 }
 0x397   :  { %6109 = vmatprep.subr.bf16.mxu0 %v7719_v4 }
 0x399   :  { %5946 = vmatpush1.bf16.msra.mxu1 %v7714_v3 }
 0x39a   :  { %6110 = vmatpush1.bf16.msra.mxu0 %v7717_v5  ;;  %5947 = vmatprep.subr.bf16.mxu1 %v7722_v6 }
 0x39b   :  { %6111 = vmatprep.subr.bf16.mxu0 %v7725_v8 }
 0x39d   :  { %5948 = vmatpush1.bf16.msra.mxu1 %v7720_v7 }
 0x39e   :  { %6112 = vmatpush1.bf16.msra.mxu0 %v7723_v9  ;;  %5949 = vmatprep.subr.bf16.mxu1 %v7728_v10 }
 0x39f   :  { %6113 = vmatprep.subr.bf16.mxu0 %v7731_v12 }
 0x3a1   :  { %5950 = vmatpush1.bf16.msra.mxu1 %v7726_v11 }
 0x3a2   :  { %6114 = vmatpush1.bf16.msra.mxu0 %v7729_v17  ;;  %5951 = vmatprep.subr.bf16.mxu1 %v7734_v50 }
 0x3a3   :  { %6115 = vmatprep.subr.bf16.mxu0 %v7737_v14 }
 0x3a5   :  { %5952 = vmatpush1.bf16.msra.mxu1 %v7732_v13 }
 0x3a6   :  { %6116 = vmatpush1.bf16.msra.mxu0 %v7735_v15  ;;  %5953 = vmatprep.subr.bf16.mxu1 %v7740_v16 }
 0x3a7   :  { %6117 = vmatprep.subr.bf16.mxu0 %v7743_v19 }
 0x3a9   :  { %5954 = vmatpush1.bf16.msra.mxu1 %v7738_v18 }
 0x3aa   :  { %6118 = vmatpush1.bf16.msra.mxu0 %v7741_v21  ;;  %5964 = vmatprep.subr.bf16.mxu1 %v7746_v23 }
 0x3ab   :  { %6128 = vmatprep.subr.bf16.mxu0 %v7749_v24 }
 0x3bf   :  { %v2509_v25 = vpop.f32.mrb[0].mxu1  ;;  %v9734_v26 = vpop.f32.mrb[12].mxu0 }
 0x3c0   :  { %v2762_v27 = vrot.slane %v2509_v25, 4  ;;  %v2511_v28 = vpop.f32.mrb[1].mxu1  ;;  %v2593_v37 = vpop.f32.mrb[13].mxu0  ;;  %v2774_v41 = vrot.slane %v9734_v26, 4 }
 0x3c1   :  { %v2768_v29 = vrot.slane %v2511_v28, 4  ;;  %v2780_v51 = vrot.slane %v2593_v37, 4  ;;  %v2513_v30 = vpop.f32.mrb[2].mxu1  ;;  %v2595_v31 = vpop.f32.mrb[14].mxu0 }
 0x3c2   :  { %v2763_v32 = vadd.f32 %v2762_v27, %v2509_v25  ;;  %v2514_v36 = vpop.f32.mrb[3].mxu1  ;;  %v2596_v43 = vpop.f32.mrb[15].mxu0  ;;  %v2775_v8 = vadd.f32 %v2774_v41, %v9734_v26 }
 0x3c3   :  { %v2769_v22 = vadd.f32 %v2768_v29, %v2511_v28  ;;  %v2781_v34 = vadd.f32 %v2780_v51, %v2593_v37  ;;  %v9741_v51 = vld [vmem:[%s11075_s9] sm:$0xff] }
 0x3c4   :  { %v2764_v44 = vrot.slane %v2763_v32, 2  ;;  %v2776_v13 = vrot.slane %v2775_v8, 2  ;;  %v2911_v31 = vrot.slane %v9741_v51, %v8568_v40  ;;  %v2915_v36 = vrot.slane %v9741_v51, %v8574_v42 }
 0x3c5   :  { %v2770_v45 = vrot.slane %v2769_v22, 2  ;;  %v2782_v20 = vrot.slane %v2781_v34, 2 }
 0x3c6   :  { %v2765_v46 = vadd.f32 %v2764_v44, %v2763_v32  ;;  %v2777_v23 = vadd.f32 %v2776_v13, %v2775_v8  ;;  %v7744_v8 = vld [vmem:[%s11074_s11 + $0x380] ss:$28 sps:$4 sm:$0xff]   ;;  %v7758_v13 = vld [vmem:[%s11074_s11 + $0x3f4] ss:$28 sps:$4 sm:$0xff]  }
 0x3c7   :  { %v2771_v47 = vadd.f32 %v2770_v45, %v2769_v22  ;;  %v2783_v49 = vadd.f32 %v2782_v20, %v2781_v34  ;;  %v9750_v22 = vld [vmem:[%s11076_s10] sm:$0xff]  ;;  %v2923_v34 = vrot.slane %v9741_v51, %v9086_v1 }
 0x3c8   :  { %v2766_v54 = vrot.slane %v2765_v46, 1  ;;  %v2778_v29 = vrot.slane %v2777_v23, 1 }
 0x3c9   :  { %v2772_v48 = vrot.slane %v2771_v47, 1  ;;  %v2784_v52 = vrot.slane %v2783_v49, 1 }
 0x3ca   :  { %v2767_v53 = vadd.f32 %v2766_v54, %v2765_v46  ;;  %v2779_v30 = vadd.f32 %v2778_v29, %v2777_v23  ;;  %v7768_v29 = vld [vmem:[%s11074_s11 + $0x460] ss:$28 sps:$4 sm:$0xff]  }
 0x3cb   :  { %v2773_v55 = vadd.f32 %v2772_v48, %v2771_v47  ;;  %v2785_v56 = vadd.f32 %v2784_v52, %v2783_v49  ;;  %v3001_v47 = vrot.slane %v9750_v22, %v8568_v40 }
 0x3cc   :  { %v2810_v57 = vmul.f32 0.125, %v2767_v53  ;;  %v2812_v32 = vmul.f32 0.125, %v2779_v30  ;;  %v7771_v30 = vld [vmem:[%s11074_s11 + $0x468] ss:$28 sps:$4 sm:$0xff]  }
 0x3cd   :  { %v2811_v58 = vmul.f32 0.125, %v2773_v55  ;;  %v2813_v59 = vmul.f32 0.125, %v2785_v56  ;;  %v3005_v55 = vrot.slane %v9750_v22, %v8574_v42 }
 0x3ce   :  { %v2818_v60 = vsub.f32 %v2509_v25, %v2810_v57  ;;  %v9758_v49 = vsub.f32 %v9734_v26, %v2812_v32  ;;  %v3013_v57 = vrot.slane %v9750_v22, %v9086_v1  ;;  %v7779_v32 = vld [vmem:[%s11074_s11 + $0x4a4] ss:$28 sps:$4 sm:$0xff]  }
 0x3cf   :  { %v2819_v61 = vsub.f32 %v2511_v28, %v2811_v58  ;;  %v2821_v62 = vsub.f32 %v2593_v37, %v2813_v59 }
 0x3d0   :  { %v2826_v63 = vmul.f32 %v2818_v60, %v2818_v60  ;;  %v2828_v59 = vmul.f32 %v9758_v49, %v9758_v49 }
 0x3d1   :  { %v2827_v33 = vmul.f32 %v2819_v61, %v2819_v61  ;;  %v2829_v35 = vmul.f32 %v2821_v62, %v2821_v62 }
 0x3d2   :  { %v2834_v39 = vrot.slane %v2826_v63, 4 }
 0x3d3   :  { %v2840_v2 = vrot.slane %v2827_v33, 4  ;;  %v2852_v3 = vrot.slane %v2829_v35, 4 }
 0x3d4   :  { %v2835_v4 = vadd.f32 %v2834_v39, %v2826_v63 }
 0x3d5   :  { %v2841_v5 = vadd.f32 %v2840_v2, %v2827_v33  ;;  %v2853_v6 = vadd.f32 %v2852_v3, %v2829_v35 }
 0x3d6   :  { %v2836_v7 = vrot.slane %v2835_v4, 2 }
 0x3d7   :  { %v2842_v9 = vrot.slane %v2841_v5, 2  ;;  %v2854_v10 = vrot.slane %v2853_v6, 2 }
 0x3d8   :  { %v2837_v11 = vadd.f32 %v2836_v7, %v2835_v4 }
 0x3d9   :  { %v2843_v12 = vadd.f32 %v2842_v9, %v2841_v5  ;;  %v2855_v17 = vadd.f32 %v2854_v10, %v2853_v6  ;;  %v7752_v9 = vld [vmem:[%s11074_s11 + $0x3bc] ss:$28 sps:$4 sm:$0xff]   ;;  %v7755_v10 = vld [vmem:[%s11074_s11 + $0x3c4] ss:$28 sps:$4 sm:$0xff]  }
 0x3da   :  { %v2838_v50 = vrot.slane %v2837_v11, 1 }
 0x3db   :  { %v2844_v14 = vrot.slane %v2843_v12, 1  ;;  %v2856_v15 = vrot.slane %v2855_v17, 1 }
 0x3dc   :  { %v2839_v16 = vadd.f32 %v2838_v50, %v2837_v11  ;;  %v7753_v50 = vld [vmem:[%s11074_s11 + $0x3c0] ss:$28 sps:$4 sm:$0xff]  }
 0x3dd   :  { %v2845_v18 = vadd.f32 %v2844_v14, %v2843_v12  ;;  %v2857_v19 = vadd.f32 %v2856_v15, %v2855_v17  ;;  %v7750_v17 = vld [vmem:[%s11074_s11 + $0x3b8] ss:$28 sps:$4 sm:$0xff]  }
 0x3de   :  { %v2882_v21 = vmul.f32 0.125, %v2839_v16  ;;  %v7761_v14 = vld [vmem:[%s11074_s11 + $0x3fc] ss:$28 sps:$4 sm:$0xff]   ;;  %v7756_v16 = vld [vmem:[%s11074_s11 + $0x3f0] ss:$28 sps:$4 sm:$0xff]  }
 0x3df   :  { %v2883_v24 = vmul.f32 0.125, %v2845_v18  ;;  %v2885_v25 = vmul.f32 0.125, %v2857_v19  ;;  %v7759_v18 = vld [vmem:[%s11074_s11 + $0x3f8] ss:$28 sps:$4 sm:$0xff]   ;;  %v7764_v19 = vld [vmem:[%s11074_s11 + $0x42c] ss:$28 sps:$4 sm:$0xff]  }
 0x3e0   :  { %v2890_v27 = vadd.f32 1e-05, %v2882_v21  ;;  %v7767_v21 = vld [vmem:[%s11074_s11 + $0x434] ss:$28 sps:$4 sm:$0xff]  }
 0x3e1   :  { %v2891_v28 = vadd.f32 1e-05, %v2883_v24  ;;  %v2893_v37 = vadd.f32 1e-05, %v2885_v25  ;;  %v7762_v24 = vld [vmem:[%s11074_s11 + $0x428] ss:$28 sps:$4 sm:$0xff]  }
 0x3e2   :  { %8300 = vrsqrt.f32 %v2890_v27  ;;  %v7765_v25 = vld [vmem:[%s11074_s11 + $0x430] ss:$28 sps:$4 sm:$0xff]   ;;  %v7770_v27 = vld [vmem:[%s11074_s11 + $0x464] ss:$28 sps:$4 sm:$0xff]  }
 0x3e3   :  { %8302 = vrsqrt.f32 %v2891_v28  ;;  %v7773_v28 = vld [vmem:[%s11074_s11 + $0x46c] ss:$28 sps:$4 sm:$0xff]  }
 0x3e4   :  { %8304 = vrsqrt.f32 %v2893_v37 }
 0x3ec   :  { %v8301_v43 = vpop.eup %8300 }
 0x3ed   :  { %v2948_v44 = vmul.f32 %v8301_v43, %v2911_v31  ;;  %v8303_v45 = vpop.eup %8302  ;;  %v7776_v31 = vld [vmem:[%s11074_s11 + $0x49c] ss:$28 sps:$4 sm:$0xff]  }
 0x3ee   :  { %v8305_v20 = vpop.eup %8304  ;;  %v2949_v54 = vmul.f32 %v8303_v45, %v2915_v36  ;;  %v7774_v43 = vld [vmem:[%s11074_s11 + $0x498] ss:$28 sps:$4 sm:$0xff]  }
 0x3ef   :  { %v2959_v46 = vrot.slane %v2948_v44, %v8568_v40  ;;  %v2951_v48 = vmul.f32 %v8305_v20, %v2923_v34  ;;  %v7777_v34 = vld [vmem:[%s11074_s11 + $0x4a0] ss:$28 sps:$4 sm:$0xff]   ;;  %v7782_v44 = vld [vmem:[%s11074_s11 + $0x4d4] ss:$28 sps:$4 sm:$0xff]  }
 0x3f0   :  { %v2963_v53 = vrot.slane %v2949_v54, %v8568_v40  ;;  %v7785_v45 = vld [vmem:[%s11074_s11 + $0x4dc] ss:$28 sps:$4 sm:$0xff]   ;;  %v7788_v54 = vld [vmem:[%s11074_s11 + $0x50c] ss:$28 sps:$4 sm:$0xff]  }
 0x3f1   :  { %v2988_v52 = vmul.f32 %v2959_v46, %v2818_v60  ;;  %v2971_v56 = vrot.slane %v2951_v48, %v8568_v40  ;;  %v2846_v60 = vrot.slane %v2828_v59, 4  ;;  %v7780_v46 = vld [vmem:[%s11074_s11 + $0x4d0] ss:$28 sps:$4 sm:$0xff]  }
 0x3f2   :  { %v2989_v63 = vmul.f32 %v2963_v53, %v2819_v61  ;;  %v7747_v61 = vld [vmem:[%s11074_s11 + $0x388] ss:$28 sps:$4 sm:$0xff]   ;;  %v7791_v48 = vld [vmem:[%s11074_s11 + $0x514] ss:$28 sps:$4 sm:$0xff]  }
 0x3f3   :  { %v3038_v58 = vadd.f32 %v3001_v47, %v2988_v52  ;;  %v2991_v26 = vmul.f32 %v2971_v56, %v2821_v62  ;;  %v2847_v6 = vadd.f32 %v2846_v60, %v2828_v59  ;;  %v7783_v47 = vld [vmem:[%s11074_s11 + $0x4d8] ss:$28 sps:$4 sm:$0xff]   ;;  %v7786_v52 = vld [vmem:[%s11074_s11 + $0x508] ss:$28 sps:$4 sm:$0xff]   ;;  %v7789_v53 = vld [vmem:[%s11074_s11 + $0x510] ss:$28 sps:$4 sm:$0xff]  }
 0x3f4   :  { %v3039_v35 = vadd.f32 %v3005_v55, %v2989_v63  ;;  %v7794_v55 = vld [vmem:[%s11074_s11 + $0x544] ss:$28 sps:$4 sm:$0xff]   ;;  %v7797_v56 = vld [vmem:[%s11074_s11 + $0x54c] ss:$28 sps:$4 sm:$0xff]   ;;  %v7800_v59 = vld [vmem:[%s11074_s11 + $0x57c] ss:$28 sps:$4 sm:$0xff]  }
 0x3f5   :  { %v3046_v33 = vmul.f32 0.2, %v3038_v58  ;;  %v3041_v39 = vadd.f32 %v3013_v57, %v2991_v26  ;;  %v2848_v12 = vrot.slane %v2847_v6, 2  ;;  %v7792_v57 = vld [vmem:[%s11074_s11 + $0x540] ss:$28 sps:$4 sm:$0xff]  }
 0x3f6   :  { %v3047_v41 = vmul.f32 0.2, %v3039_v35  ;;  %v7803_v63 = vld [vmem:[%s11074_s11 + $0x584] ss:$28 sps:$4 sm:$0xff]   ;;  %v7798_v26 = vld [vmem:[%s11074_s11 + $0x578] ss:$28 sps:$4 sm:$0xff]  }
 0x3f7   :  { %v3049_v2 = vmul.f32 0.2, %v3041_v39  ;;  %v3054_v3 = vmax.f32 %v3038_v58, %v3046_v33  ;;  %v2849_v15 = vadd.f32 %v2848_v12, %v2847_v6  ;;  %v7795_v58 = vld [vmem:[%s11074_s11 + $0x548] ss:$28 sps:$4 sm:$0xff]   ;;  %v7801_v33 = vld [vmem:[%s11074_s11 + $0x580] ss:$28 sps:$4 sm:$0xff]  }
 0x3f8   :  { %v3055_v4 = vmax.f32 %v3039_v35, %v3047_v41  ;;  %v2919_v35 = vrot.slane %v9741_v51, %v9083_v0  ;;  %v7809_v60 = vld [vmem:[%s11074_s11 + $0x5bc] ss:$28 sps:$4 sm:$0xff]   ;;  %v7815_v6 = vld [vmem:[%s11074_s11 + $0x5f4] ss:$28 sps:$4 sm:$0xff]   ;;  %v7821_v12 = vld [vmem:[%s11074_s11 + $0x62c] ss:$28 sps:$4 sm:$0xff]  }
 0x3f9   :  { %v3057_v5 = vmax.f32 %v3041_v39, %v3049_v2  ;;  %v9776_v62 = vpack.c.bf16 %v3054_v3, %v3054_v3  ;;  %v2850_v23 = vrot.slane %v2849_v15, 1  ;;  %v7806_v39 = vld [vmem:[%s11074_s11 + $0x5b4] ss:$28 sps:$4 sm:$0xff]  }
 0x3fa   :  { %v9768_v7 = vpack.c.bf16 %v3055_v4, %v3055_v4  ;;  %v7804_v2 = vld [vmem:[%s11074_s11 + $0x5b0] ss:$28 sps:$4 sm:$0xff]   ;;  %v7807_v3 = vld [vmem:[%s11074_s11 + $0x5b8] ss:$28 sps:$4 sm:$0xff]  }
 0x3fb   :  { %v9788_v11 = vpack.c.bf16 %v3057_v5, %v3057_v5  ;;  %v2851_v37 = vadd.f32 %v2850_v23, %v2849_v15  ;;  %v7812_v5 = vld [vmem:[%s11074_s11 + $0x5ec] ss:$28 sps:$4 sm:$0xff]   ;;  %v7824_v15 = vld [vmem:[%s11074_s11 + $0x65c] ss:$28 sps:$4 sm:$0xff]  }
 0x3fc   :  { %5955 = vmatprep.mubr.bf16.mxu1 %v9768_v7  ;;  %6119 = vmatprep.mubr.bf16.mxu0 %v9768_v7  ;;  %v7833_v23 = vld [vmem:[%s11074_s11 + $0x69c] ss:$28 sps:$4 sm:$0xff]  }
 0x3fd   :  { %5956 = vmatmul.mubr.bf16.vlgmr.msra.gmra.mrb[8].mxu1 %v9776_v62  ;;  %6120 = vmatmul.mubr.bf16.vlgmr.msra.gmra.mrb[20].mxu0 %v9776_v62  ;;  %v2884_v36 = vmul.f32 0.125, %v2851_v37  ;;  %v7839_v37 = vld [vmem:[%s11074_s11 + $0x6d4] ss:$28 sps:$4 sm:$0xff]  }
 0x3fe   :  { %5965 = vmatpush1.bf16.msra.mxu1 %v7744_v8  ;;  %6129 = vmatpush1.bf16.msra.mxu0 %v7747_v61  ;;  %v7810_v8 = vld [vmem:[%s11074_s11 + $0x5e8] ss:$28 sps:$4 sm:$0xff]   ;;  %v7813_v61 = vld [vmem:[%s11074_s11 + $0x5f0] ss:$28 sps:$4 sm:$0xff]  }
 0x3ff   :  { %5996 = vmatprep.mubr.bf16.mxu1 %v9788_v11  ;;  %6160 = vmatprep.mubr.bf16.mxu0 %v9788_v11  ;;  %v2892_v20 = vadd.f32 1e-05, %v2884_v36  ;;  %v7845_v36 = vld [vmem:[%s11074_s11 + $0x70c] ss:$28 sps:$4 sm:$0xff]  }
 0x400   :  { %5966 = vmatprep.subr.bf16.mxu1 %v7752_v9  ;;  %6130 = vmatprep.subr.bf16.mxu0 %v7755_v10  ;;  %v7818_v10 = vld [vmem:[%s11074_s11 + $0x624] ss:$28 sps:$4 sm:$0xff]  }
 0x401   :  { %8306 = vrsqrt.f32 %v2892_v20  ;;  %v7851_v20 = vld [vmem:[%s11074_s11 + $0x744] ss:$28 sps:$4 sm:$0xff]  }
 0x402   :  { %5967 = vmatpush1.bf16.msra.mxu1 %v7750_v17  ;;  %6131 = vmatpush1.bf16.msra.mxu0 %v7753_v50  ;;  %v7816_v17 = vld [vmem:[%s11074_s11 + $0x620] ss:$28 sps:$4 sm:$0xff]   ;;  %v7819_v50 = vld [vmem:[%s11074_s11 + $0x628] ss:$28 sps:$4 sm:$0xff]  }
 0x403   :  { %5968 = vmatprep.subr.bf16.mxu1 %v7758_v13  ;;  %6132 = vmatprep.subr.bf16.mxu0 %v7761_v14  ;;  %v3009_v14 = vrot.slane %v9750_v22, %v9083_v0 }
 0x406   :  { %5969 = vmatpush1.bf16.msra.mxu1 %v7756_v16  ;;  %6133 = vmatpush1.bf16.msra.mxu0 %v7759_v18  ;;  %v7827_v16 = vld [vmem:[%s11074_s11 + $0x664] ss:$28 sps:$4 sm:$0xff]   ;;  %v7822_v18 = vld [vmem:[%s11074_s11 + $0x658] ss:$28 sps:$4 sm:$0xff]  }
 0x407   :  { %5970 = vmatprep.subr.bf16.mxu1 %v7764_v19  ;;  %6134 = vmatprep.subr.bf16.mxu0 %v7767_v21  ;;  %v7830_v21 = vld [vmem:[%s11074_s11 + $0x694] ss:$28 sps:$4 sm:$0xff]  }
 0x40a   :  { %5971 = vmatpush1.bf16.msra.mxu1 %v7762_v24  ;;  %6135 = vmatpush1.bf16.msra.mxu0 %v7765_v25  ;;  %v7828_v24 = vld [vmem:[%s11074_s11 + $0x690] ss:$28 sps:$4 sm:$0xff]   ;;  %v7831_v25 = vld [vmem:[%s11074_s11 + $0x698] ss:$28 sps:$4 sm:$0xff]  }
 0x40b   :  { %5972 = vmatprep.subr.bf16.mxu1 %v7770_v27  ;;  %6136 = vmatprep.subr.bf16.mxu0 %v7773_v28  ;;  %v8307_v41 = vpop.eup %8306  ;;  %v7836_v28 = vld [vmem:[%s11074_s11 + $0x6cc] ss:$28 sps:$4 sm:$0xff]  }
 0x40c   :  { %v2950_v4 = vmul.f32 %v8307_v41, %v2919_v35  ;;  %v7852_v41 = vld [vmem:[%s11074_s11 + $0x770] ss:$28 sps:$4 sm:$0xff]  }
 0x40e   :  { %5973 = vmatpush1.bf16.msra.mxu1 %v7768_v29  ;;  %6137 = vmatpush1.bf16.msra.mxu0 %v7771_v30  ;;  %v2967_v9 = vrot.slane %v2950_v4, %v8568_v40  ;;  %v7834_v29 = vld [vmem:[%s11074_s11 + $0x6c8] ss:$28 sps:$4 sm:$0xff]   ;;  %v7837_v30 = vld [vmem:[%s11074_s11 + $0x6d0] ss:$28 sps:$4 sm:$0xff]  }
 0x40f   :  { %5974 = vmatprep.subr.bf16.mxu1 %v7776_v31  ;;  %6138 = vmatprep.subr.bf16.mxu0 %v7779_v32  ;;  %v7842_v32 = vld [vmem:[%s11074_s11 + $0x704] ss:$28 sps:$4 sm:$0xff]  }
 0x410   :  { %v2990_v13 = vmul.f32 %v2967_v9, %v9758_v49  ;;  %v7825_v49 = vld [vmem:[%s11074_s11 + $0x660] ss:$28 sps:$4 sm:$0xff]  }
 0x412   :  { %5975 = vmatpush1.bf16.msra.mxu1 %v7774_v43  ;;  %6139 = vmatpush1.bf16.msra.mxu0 %v7777_v34  ;;  %v3040_v19 = vadd.f32 %v3009_v14, %v2990_v13  ;;  %v7840_v43 = vld [vmem:[%s11074_s11 + $0x700] ss:$28 sps:$4 sm:$0xff]   ;;  %v7843_v34 = vld [vmem:[%s11074_s11 + $0x708] ss:$28 sps:$4 sm:$0xff]  }
 0x413   :  { %5976 = vmatprep.subr.bf16.mxu1 %v7782_v44  ;;  %6140 = vmatprep.subr.bf16.mxu0 %v7785_v45  ;;  %v7848_v45 = vld [vmem:[%s11074_s11 + $0x73c] ss:$28 sps:$4 sm:$0xff]   ;;  %v7866_v14 = vld [vmem:[%s11074_s11 + $0x7e4] ss:$28 sps:$4 sm:$0xff]  }
 0x414   :  { %v3048_v27 = vmul.f32 0.2, %v3040_v19 }
 0x416   :  { %5977 = vmatpush1.bf16.msra.mxu1 %v7780_v46  ;;  %6141 = vmatpush1.bf16.msra.mxu0 %v7783_v47  ;;  %v3056_v31 = vmax.f32 %v3040_v19, %v3048_v27  ;;  %v7846_v46 = vld [vmem:[%s11074_s11 + $0x738] ss:$28 sps:$4 sm:$0xff]  }
 0x417   :  { %5978 = vmatprep.subr.bf16.mxu1 %v7788_v54  ;;  %6142 = vmatprep.subr.bf16.mxu0 %v7791_v48  ;;  %v7849_v54 = vld [vmem:[%s11074_s11 + $0x740] ss:$28 sps:$4 sm:$0xff]   ;;  %v7854_v48 = vld [vmem:[%s11074_s11 + $0x774] ss:$28 sps:$4 sm:$0xff]  }
 0x418   :  { %v9984_v44 = vpack.c.bf16 %v3056_v31, %v3056_v31  ;;  %v7872_v27 = vld [vmem:[%s11074_s11 + $0x81c] ss:$28 sps:$4 sm:$0xff]  }
 0x41a   :  { %5979 = vmatpush1.bf16.msra.mxu1 %v7786_v52  ;;  %6143 = vmatpush1.bf16.msra.mxu0 %v7789_v53 }
 0x41b   :  { %5980 = vmatprep.subr.bf16.mxu1 %v7794_v55  ;;  %6144 = vmatprep.subr.bf16.mxu0 %v7797_v56  ;;  %v7857_v56 = vld [vmem:[%s11074_s11 + $0x77c] ss:$28 sps:$4 sm:$0xff]  }
 0x41e   :  { %5981 = vmatpush1.bf16.msra.mxu1 %v7792_v57  ;;  %6145 = vmatpush1.bf16.msra.mxu0 %v7795_v58 }
 0x41f   :  { %5982 = vmatprep.subr.bf16.mxu1 %v7800_v59  ;;  %6146 = vmatprep.subr.bf16.mxu0 %v7803_v63 }
 0x422   :  { %5983 = vmatpush1.bf16.msra.mxu1 %v7798_v26  ;;  %6147 = vmatpush1.bf16.msra.mxu0 %v7801_v33 }
 0x423   :  { %5984 = vmatprep.subr.bf16.mxu1 %v7806_v39  ;;  %6148 = vmatprep.subr.bf16.mxu0 %v7809_v60 }
 0x426   :  { %5985 = vmatpush1.bf16.msra.mxu1 %v7804_v2  ;;  %6149 = vmatpush1.bf16.msra.mxu0 %v7807_v3  ;;  %v7855_v2 = vld [vmem:[%s11074_s11 + $0x778] ss:$28 sps:$4 sm:$0xff]  }
 0x427   :  { %5986 = vmatprep.subr.bf16.mxu1 %v7812_v5  ;;  %6150 = vmatprep.subr.bf16.mxu0 %v7815_v6  ;;  %v7860_v5 = vld [vmem:[%s11074_s11 + $0x7ac] ss:$28 sps:$4 sm:$0xff]   ;;  %v7863_v6 = vld [vmem:[%s11074_s11 + $0x7b4] ss:$28 sps:$4 sm:$0xff]  }
 0x42a   :  { %5987 = vmatpush1.bf16.msra.mxu1 %v7810_v8  ;;  %6151 = vmatpush1.bf16.msra.mxu0 %v7813_v61 }
 0x42b   :  { %5988 = vmatprep.subr.bf16.mxu1 %v7818_v10  ;;  %6152 = vmatprep.subr.bf16.mxu0 %v7821_v12  ;;  %v7858_v12 = vld [vmem:[%s11074_s11 + $0x7a8] ss:$28 sps:$4 sm:$0xff]  }
 0x42e   :  { %5989 = vmatpush1.bf16.msra.mxu1 %v7816_v17  ;;  %6153 = vmatpush1.bf16.msra.mxu0 %v7819_v50  ;;  %v7861_v17 = vld [vmem:[%s11074_s11 + $0x7b0] ss:$28 sps:$4 sm:$0xff]  }
 0x42f   :  { %5990 = vmatprep.subr.bf16.mxu1 %v7824_v15  ;;  %6154 = vmatprep.subr.bf16.mxu0 %v7827_v16  ;;  %v7869_v15 = vld [vmem:[%s11074_s11 + $0x7ec] ss:$28 sps:$4 sm:$0xff]  }
 0x432   :  { %5991 = vmatpush1.bf16.msra.mxu1 %v7822_v18  ;;  %6155 = vmatpush1.bf16.msra.mxu0 %v7825_v49 }
 0x433   :  { %5992 = vmatprep.subr.bf16.mxu1 %v7830_v21  ;;  %6156 = vmatprep.subr.bf16.mxu0 %v7833_v23  ;;  %v7864_v21 = vld [vmem:[%s11074_s11 + $0x7e0] ss:$28 sps:$4 sm:$0xff]   ;;  %v7867_v23 = vld [vmem:[%s11074_s11 + $0x7e8] ss:$28 sps:$4 sm:$0xff]  }
 0x436   :  { %5993 = vmatpush1.bf16.msra.mxu1 %v7828_v24  ;;  %6157 = vmatpush1.bf16.msra.mxu0 %v7831_v25 }
 0x437   :  { %5994 = vmatprep.subr.bf16.mxu1 %v7836_v28  ;;  %6158 = vmatprep.subr.bf16.mxu0 %v7839_v37  ;;  %v7875_v28 = vld [vmem:[%s11074_s11 + $0x824] ss:$28 sps:$4 sm:$0xff]  }
 0x43a   :  { %5995 = vmatpush1.bf16.msra.mxu1 %v7834_v29  ;;  %6159 = vmatpush1.bf16.msra.mxu0 %v7837_v30 }
 0x43b   :  { %6005 = vmatprep.subr.bf16.mxu1 %v7842_v32  ;;  %6169 = vmatprep.subr.bf16.mxu0 %v7845_v36  ;;  %v7870_v32 = vld [vmem:[%s11074_s11 + $0x818] ss:$28 sps:$4 sm:$0xff]   ;;  %v7873_v36 = vld [vmem:[%s11074_s11 + $0x820] ss:$28 sps:$4 sm:$0xff]  }
 0x43d   :  { %5997 = vmatmul.mubr.bf16.vlgmr.msra.gmra.mrb[8].mxu1 %v9984_v44  ;;  %6161 = vmatmul.mubr.bf16.vlgmr.msra.gmra.mrb[20].mxu0 %v9984_v44 }
 0x43e   :  { %6006 = vmatpush1.bf16.msra.mxu1 %v7840_v43  ;;  %6170 = vmatpush1.bf16.msra.mxu0 %v7843_v34 }
 0x43f   :  { %v2673_v47 = vpop.f32.mrb[4].mxu1  ;;  %6007 = vmatprep.subr.bf16.mxu1 %v7848_v45  ;;  %6171 = vmatprep.subr.bf16.mxu0 %v7851_v20  ;;  %v7878_v45 = vld [vmem:[%s11074_s11 + $0x854] ss:$28 sps:$4 sm:$0xff]   ;;  %v7881_v20 = vld [vmem:[%s11074_s11 + $0x85c] ss:$28 sps:$4 sm:$0xff]  }
 0x440   :  { %v2786_v52 = vrot.slane %v2673_v47, 4  ;;  %v10003_v53 = vpop.f32.mrb[16].mxu0  ;;  %v2675_v55 = vpop.f32.mrb[5].mxu1 }
 0x441   :  { %v2792_v57 = vrot.slane %v2675_v55, 4  ;;  %v2757_v58 = vpop.f32.mrb[17].mxu0  ;;  %v2677_v59 = vpop.f32.mrb[6].mxu1 }
 0x442   :  { %v2787_v63 = vadd.f32 %v2786_v52, %v2673_v47  ;;  %v2804_v26 = vrot.slane %v2757_v58, 4  ;;  %v2759_v33 = vpop.f32.mrb[18].mxu0  ;;  %v2678_v35 = vpop.f32.mrb[7].mxu1  ;;  %6008 = vmatpush1.bf16.msra.mxu1 %v7846_v46  ;;  %6172 = vmatpush1.bf16.msra.mxu0 %v7849_v54  ;;  %v7884_v59 = vld [vmem:[%s11074_s11 + $0x88c] ss:$28 sps:$4 sm:$0xff]  }
 0x443   :  { %v2793_v39 = vadd.f32 %v2792_v57, %v2675_v55  ;;  %v2760_v60 = vpop.f32.mrb[19].mxu0  ;;  %6009 = vmatprep.subr.bf16.mxu1 %v7854_v48  ;;  %6173 = vmatprep.subr.bf16.mxu0 %v7857_v56  ;;  %v2798_v48 = vrot.slane %v10003_v53, 4  ;;  %v7879_v56 = vld [vmem:[%s11074_s11 + $0x858] ss:$28 sps:$4 sm:$0xff]  }
 0x444   :  { %v2788_v3 = vrot.slane %v2787_v63, 2  ;;  %v2805_v4 = vadd.f32 %v2804_v26, %v2757_v58 }
 0x445   :  { %v2794_v8 = vrot.slane %v2793_v39, 2 }
 0x446   :  { %v2789_v61 = vadd.f32 %v2788_v3, %v2787_v63  ;;  %v2806_v9 = vrot.slane %v2805_v4, 2  ;;  %6010 = vmatpush1.bf16.msra.mxu1 %v7852_v41  ;;  %6174 = vmatpush1.bf16.msra.mxu0 %v7855_v2  ;;  %v7887_v63 = vld [vmem:[%s11074_s11 + $0x894] ss:$28 sps:$4 sm:$0xff]   ;;  %v7882_v41 = vld [vmem:[%s11074_s11 + $0x888] ss:$28 sps:$4 sm:$0xff]  }
 0x447   :  { %v2795_v10 = vadd.f32 %v2794_v8, %v2793_v39  ;;  %6011 = vmatprep.subr.bf16.mxu1 %v7860_v5  ;;  %6175 = vmatprep.subr.bf16.mxu0 %v7863_v6  ;;  %v2799_v39 = vadd.f32 %v2798_v48, %v10003_v53  ;;  %v7885_v2 = vld [vmem:[%s11074_s11 + $0x890] ss:$28 sps:$4 sm:$0xff]   ;;  %v7890_v5 = vld [vmem:[%s11074_s11 + $0x8c4] ss:$28 sps:$4 sm:$0xff]  }
 0x448   :  { %v2790_v50 = vrot.slane %v2789_v61, 1  ;;  %v2807_v13 = vadd.f32 %v2806_v9, %v2805_v4  ;;  %v7893_v6 = vld [vmem:[%s11074_s11 + $0x8cc] ss:$28 sps:$4 sm:$0xff]  }
 0x449   :  { %v2796_v16 = vrot.slane %v2795_v10, 1 }
 0x44a   :  { %v2791_v18 = vadd.f32 %v2790_v50, %v2789_v61  ;;  %v2808_v49 = vrot.slane %v2807_v13, 1  ;;  %6012 = vmatpush1.bf16.msra.mxu1 %v7858_v12  ;;  %6176 = vmatpush1.bf16.msra.mxu0 %v7861_v17  ;;  %v7888_v17 = vld [vmem:[%s11074_s11 + $0x8c0] ss:$28 sps:$4 sm:$0xff]   ;;  %v7891_v50 = vld [vmem:[%s11074_s11 + $0x8c8] ss:$28 sps:$4 sm:$0xff]  }
 0x44b   :  { %v2797_v19 = vadd.f32 %v2796_v16, %v2795_v10  ;;  %6013 = vmatprep.subr.bf16.mxu1 %v7866_v14  ;;  %6177 = vmatprep.subr.bf16.mxu0 %v7869_v15  ;;  %v2800_v10 = vrot.slane %v2799_v39, 2  ;;  %v7896_v15 = vld [vmem:[%s11074_s11 + $0x8fc] ss:$28 sps:$4 sm:$0xff]   ;;  %v7899_v16 = vld [vmem:[%s11074_s11 + $0x904] ss:$28 sps:$4 sm:$0xff]  }
 0x44c   :  { %v2814_v24 = vmul.f32 0.125, %v2791_v18  ;;  %v2809_v25 = vadd.f32 %v2808_v49, %v2807_v13 }
 0x44d   :  { %v2815_v37 = vmul.f32 0.125, %v2797_v19 }
 0x44e   :  { %v10044_v29 = vsub.f32 %v2673_v47, %v2814_v24  ;;  %v2817_v30 = vmul.f32 0.125, %v2809_v25  ;;  %6014 = vmatpush1.bf16.msra.mxu1 %v7864_v21  ;;  %6178 = vmatpush1.bf16.msra.mxu0 %v7867_v23  ;;  %v7894_v21 = vld [vmem:[%s11074_s11 + $0x8f8] ss:$28 sps:$4 sm:$0xff]   ;;  %v2801_v23 = vadd.f32 %v2800_v10, %v2799_v39  ;;  %v7897_v25 = vld [vmem:[%s11074_s11 + $0x900] ss:$28 sps:$4 sm:$0xff]  }
 0x44f   :  { %v10046_v31 = vsub.f32 %v2675_v55, %v2815_v37  ;;  %6015 = vmatprep.subr.bf16.mxu1 %v7872_v27  ;;  %6179 = vmatprep.subr.bf16.mxu0 %v7875_v28  ;;  %v7876_v55 = vld [vmem:[%s11074_s11 + $0x850] ss:$28 sps:$4 sm:$0xff]   ;;  %v7915_v39 = vld [vmem:[%s11074_s11 + $0x9a8] ss:$28 sps:$4 sm:$0xff]   ;;  %v7918_v10 = vld [vmem:[%s11074_s11 + $0x9d8] ss:$28 sps:$4 sm:$0xff]  }
 0x450   :  { %v2830_v43 = vmul.f32 %v10044_v29, %v10044_v29  ;;  %v10056_v34 = vsub.f32 %v2757_v58, %v2817_v30  ;;  %v7902_v27 = vld [vmem:[%s11074_s11 + $0x934] ss:$28 sps:$4 sm:$0xff]   ;;  %v7905_v30 = vld [vmem:[%s11074_s11 + $0x93c] ss:$28 sps:$4 sm:$0xff]  }
 0x451   :  { %v2831_v46 = vmul.f32 %v10046_v31, %v10046_v31 }
 0x452   :  { %v2858_v47 = vrot.slane %v2830_v43, 4  ;;  %v2833_v54 = vmul.f32 %v10056_v34, %v10056_v34  ;;  %6016 = vmatpush1.bf16.msra.mxu1 %v7870_v32  ;;  %6180 = vmatpush1.bf16.msra.mxu0 %v7873_v36 }
 0x453   :  { %v2864_v52 = vrot.slane %v2831_v46, 4  ;;  %6017 = vmatprep.subr.bf16.mxu1 %v7878_v45  ;;  %6181 = vmatprep.subr.bf16.mxu0 %v7881_v20  ;;  %v7900_v45 = vld [vmem:[%s11074_s11 + $0x930] ss:$28 sps:$4 sm:$0xff]   ;;  %v7903_v20 = vld [vmem:[%s11074_s11 + $0x938] ss:$28 sps:$4 sm:$0xff]  }
 0x454   :  { %v2859_v57 = vadd.f32 %v2858_v47, %v2830_v43  ;;  %v2876_v58 = vrot.slane %v2833_v54, 4  ;;  %v2802_v43 = vrot.slane %v2801_v23, 1  ;;  %v7911_v47 = vld [vmem:[%s11074_s11 + $0x974] ss:$28 sps:$4 sm:$0xff]  }
 0x455   :  { %v2865_v26 = vadd.f32 %v2864_v52, %v2831_v46  ;;  %v7908_v46 = vld [vmem:[%s11074_s11 + $0x96c] ss:$28 sps:$4 sm:$0xff]   ;;  %v10134_v52 = vsub.s32 5, %v8565_v38 }
 0x456   :  { %v2860_v33 = vrot.slane %v2859_v57, 2  ;;  %v2877_v35 = vadd.f32 %v2876_v58, %v2833_v54  ;;  %6018 = vmatpush1.bf16.msra.mxu1 %v7876_v55  ;;  %6182 = vmatpush1.bf16.msra.mxu0 %v7879_v56  ;;  %v10131_v54 = vsub.s32 4, %v8565_v38  ;;  %v2803_v48 = vadd.f32 %v2802_v43, %v2801_v23  ;;  %v7906_v55 = vld [vmem:[%s11074_s11 + $0x968] ss:$28 sps:$4 sm:$0xff]   ;;  %v7909_v56 = vld [vmem:[%s11074_s11 + $0x970] ss:$28 sps:$4 sm:$0xff]  }
 0x457   :  { %v2866_v60 = vrot.slane %v2865_v26, 2  ;;  %6019 = vmatprep.subr.bf16.mxu1 %v7884_v59  ;;  %6183 = vmatprep.subr.bf16.mxu0 %v7887_v63  ;;  %v7914_v58 = vld [vmem:[%s11074_s11 + $0x9a4] ss:$28 sps:$4 sm:$0xff]   ;;  %v7917_v59 = vld [vmem:[%s11074_s11 + $0x9ac] ss:$28 sps:$4 sm:$0xff]  }
 0x458   :  { %v2861_v3 = vadd.f32 %v2860_v33, %v2859_v57  ;;  %v2878_v4 = vrot.slane %v2877_v35, 2  ;;  %v2938_v57 = vsub.s32 7, %v8565_v38  ;;  %v2927_v63 = vrot.slane %v9741_v51, %v10131_v54  ;;  %v7927_v23 = vld [vmem:[%s11074_s11 + $0xa18] ss:$28 sps:$4 sm:$0xff]   ;;  %v7938_v43 = vld [vmem:[%s11074_s11 + $0xa84] ss:$28 sps:$4 sm:$0xff]  }
 0x459   :  { %v2867_v8 = vadd.f32 %v2866_v60, %v2865_v26  ;;  %v2816_v26 = vmul.f32 0.125, %v2803_v48  ;;  %v2931_v33 = vrot.slane %v9741_v51, %v10134_v52 }
 0x45a   :  { %v2862_v61 = vrot.slane %v2861_v3, 1  ;;  %v2879_v9 = vadd.f32 %v2878_v4, %v2877_v35  ;;  %6020 = vmatpush1.bf16.msra.mxu1 %v7882_v41  ;;  %6184 = vmatpush1.bf16.msra.mxu0 %v7885_v2  ;;  %v7912_v35 = vld [vmem:[%s11074_s11 + $0x9a0] ss:$28 sps:$4 sm:$0xff]   ;;  %v2939_v41 = vrot.slane %v9741_v51, %v2938_v57 }
 0x45b   :  { %v2868_v12 = vrot.slane %v2867_v8, 1  ;;  %6021 = vmatprep.subr.bf16.mxu1 %v7890_v5  ;;  %6185 = vmatprep.subr.bf16.mxu0 %v7893_v6  ;;  %v7920_v2 = vld [vmem:[%s11074_s11 + $0x9dc] ss:$28 sps:$4 sm:$0xff]   ;;  %v3017_v6 = vrot.slane %v9750_v22, %v10131_v54  ;;  %v10170_v51 = vsub.f32 %v10003_v53, %v2816_v26 }
 0x45c   :  { %v2863_v13 = vadd.f32 %v2862_v61, %v2861_v3  ;;  %v2880_v14 = vrot.slane %v2879_v9, 1  ;;  %v7923_v3 = vld [vmem:[%s11074_s11 + $0x9e4] ss:$28 sps:$4 sm:$0xff]   ;;  %v7929_v53 = vld [vmem:[%s11074_s11 + $0xa1c] ss:$28 sps:$4 sm:$0xff]  }
 0x45d   :  { %v2869_v18 = vadd.f32 %v2868_v12, %v2867_v8  ;;  %v7921_v12 = vld [vmem:[%s11074_s11 + $0x9e0] ss:$28 sps:$4 sm:$0xff]  }
 0x45e   :  { %v2886_v49 = vmul.f32 0.125, %v2863_v13  ;;  %v2881_v19 = vadd.f32 %v2880_v14, %v2879_v9  ;;  %6022 = vmatpush1.bf16.msra.mxu1 %v7888_v17  ;;  %6186 = vmatpush1.bf16.msra.mxu0 %v7891_v50  ;;  %v7926_v50 = vld [vmem:[%s11074_s11 + $0xa14] ss:$28 sps:$4 sm:$0xff]  }
 0x45f   :  { %v2887_v24 = vmul.f32 0.125, %v2869_v18  ;;  %6023 = vmatprep.subr.bf16.mxu1 %v7896_v15  ;;  %6187 = vmatprep.subr.bf16.mxu0 %v7899_v16  ;;  %v3021_v15 = vrot.slane %v9750_v22, %v10134_v52  ;;  %v3029_v18 = vrot.slane %v9750_v22, %v2938_v57  ;;  %v7932_v22 = vld [vmem:[%s11074_s11 + $0xa4c] ss:$28 sps:$4 sm:$0xff]  }
 0x460   :  { %v2894_v28 = vadd.f32 1e-05, %v2886_v49  ;;  %v2889_v37 = vmul.f32 0.125, %v2881_v19  ;;  %v2832_v19 = vmul.f32 %v10170_v51, %v10170_v51  ;;  %v7939_v57 = vld [vmem:[%s11074_s11 + $0xa88] ss:$28 sps:$4 sm:$0xff]  }
 0x461   :  { %v2895_v32 = vadd.f32 1e-05, %v2887_v24 }
 0x462   :  { %8308 = vrsqrt.f32 %v2894_v28  ;;  %v2897_v36 = vadd.f32 1e-05, %v2889_v37  ;;  %6024 = vmatpush1.bf16.msra.mxu1 %v7894_v21  ;;  %6188 = vmatpush1.bf16.msra.mxu0 %v7897_v25  ;;  %v7930_v37 = vld [vmem:[%s11074_s11 + $0xa48] ss:$28 sps:$4 sm:$0xff]  }
 0x463   :  { %8310 = vrsqrt.f32 %v2895_v32  ;;  %6025 = vmatprep.subr.bf16.mxu1 %v7902_v27  ;;  %6189 = vmatprep.subr.bf16.mxu0 %v7905_v30  ;;  %v2870_v30 = vrot.slane %v2832_v19, 4 }
 0x464   :  { %8312 = vrsqrt.f32 %v2897_v36 }
 0x465   :  { %v2871_v48 = vadd.f32 %v2870_v30, %v2832_v19  ;;  %v7977_v19 = vld [vmem:[%s11074_s11 + $0xbdc] ss:$28 sps:$4 sm:$0xff]   ;;  %v7987_v30 = vld [vmem:[%s11074_s11 + $0xc48] ss:$28 sps:$4 sm:$0xff]  }
 0x466   :  { %6026 = vmatpush1.bf16.msra.mxu1 %v7900_v45  ;;  %6190 = vmatpush1.bf16.msra.mxu0 %v7903_v20  ;;  %v7941_v45 = vld [vmem:[%s11074_s11 + $0xa8c] ss:$28 sps:$4 sm:$0xff]  }
 0x467   :  { %6027 = vmatprep.subr.bf16.mxu1 %v7908_v46  ;;  %6191 = vmatprep.subr.bf16.mxu0 %v7911_v47 }
 0x46a   :  { %6028 = vmatpush1.bf16.msra.mxu1 %v7906_v55  ;;  %6192 = vmatpush1.bf16.msra.mxu0 %v7909_v56  ;;  %v7936_v56 = vld [vmem:[%s11074_s11 + $0xa80] ss:$28 sps:$4 sm:$0xff]  }
 0x46b   :  { %6029 = vmatprep.subr.bf16.mxu1 %v7914_v58  ;;  %6193 = vmatprep.subr.bf16.mxu0 %v7917_v59  ;;  %v7944_v59 = vld [vmem:[%s11074_s11 + $0xabc] ss:$28 sps:$4 sm:$0xff]  }
 0x46c   :  { %v8309_v60 = vpop.eup %8308 }
 0x46d   :  { %v2952_v4 = vmul.f32 %v8309_v60, %v2927_v63  ;;  %v8311_v5 = vpop.eup %8310  ;;  %v7947_v63 = vld [vmem:[%s11074_s11 + $0xac4] ss:$28 sps:$4 sm:$0xff]   ;;  %v7950_v60 = vld [vmem:[%s11074_s11 + $0xaf4] ss:$28 sps:$4 sm:$0xff]  }
 0x46e   :  { %v8313_v8 = vpop.eup %8312  ;;  %v2953_v9 = vmul.f32 %v8311_v5, %v2931_v33  ;;  %6030 = vmatpush1.bf16.msra.mxu1 %v7912_v35  ;;  %6194 = vmatpush1.bf16.msra.mxu0 %v7915_v39  ;;  %v2872_v33 = vrot.slane %v2871_v48, 2  ;;  %v7942_v35 = vld [vmem:[%s11074_s11 + $0xab8] ss:$28 sps:$4 sm:$0xff]   ;;  %v7945_v39 = vld [vmem:[%s11074_s11 + $0xac0] ss:$28 sps:$4 sm:$0xff]  }
 0x46f   :  { %v2975_v61 = vrot.slane %v2952_v4, %v8568_v40  ;;  %v2955_v17 = vmul.f32 %v8313_v8, %v2939_v41  ;;  %6031 = vmatprep.subr.bf16.mxu1 %v7920_v2  ;;  %6195 = vmatprep.subr.bf16.mxu0 %v7923_v3  ;;  %v7953_v41 = vld [vmem:[%s11074_s11 + $0xafc] ss:$28 sps:$4 sm:$0xff]   ;;  %v7948_v3 = vld [vmem:[%s11074_s11 + $0xaf0] ss:$28 sps:$4 sm:$0xff]  }
 0x470   :  { %v2979_v14 = vrot.slane %v2953_v9, %v8568_v40  ;;  %v2873_v2 = vadd.f32 %v2872_v33, %v2871_v48  ;;  %v7951_v4 = vld [vmem:[%s11074_s11 + $0xaf8] ss:$28 sps:$4 sm:$0xff]   ;;  %v7956_v5 = vld [vmem:[%s11074_s11 + $0xb2c] ss:$28 sps:$4 sm:$0xff]  }
 0x471   :  { %v2992_v13 = vmul.f32 %v2975_v61, %v10044_v29  ;;  %v2987_v16 = vrot.slane %v2955_v17, %v8568_v40  ;;  %v7924_v29 = vld [vmem:[%s11074_s11 + $0xa10] ss:$28 sps:$4 sm:$0xff]   ;;  %v7954_v61 = vld [vmem:[%s11074_s11 + $0xb28] ss:$28 sps:$4 sm:$0xff]  }
 0x472   :  { %v2993_v21 = vmul.f32 %v2979_v14, %v10046_v31  ;;  %6032 = vmatpush1.bf16.msra.mxu1 %v7918_v10  ;;  %6196 = vmatpush1.bf16.msra.mxu0 %v7921_v12  ;;  %v7935_v31 = vld [vmem:[%s11074_s11 + $0xa54] ss:$28 sps:$4 sm:$0xff]   ;;  %v2874_v8 = vrot.slane %v2873_v2, 1  ;;  %v7962_v10 = vld [vmem:[%s11074_s11 + $0xb64] ss:$28 sps:$4 sm:$0xff]  }
 0x473   :  { %v3042_v49 = vadd.f32 %v3017_v6, %v2992_v13  ;;  %v2995_v24 = vmul.f32 %v2987_v16, %v10056_v34  ;;  %6033 = vmatprep.subr.bf16.mxu1 %v7926_v50  ;;  %6197 = vmatprep.subr.bf16.mxu0 %v7929_v53  ;;  %v7933_v34 = vld [vmem:[%s11074_s11 + $0xa50] ss:$28 sps:$4 sm:$0xff]   ;;  %v7960_v50 = vld [vmem:[%s11074_s11 + $0xb60] ss:$28 sps:$4 sm:$0xff]   ;;  %v7963_v53 = vld [vmem:[%s11074_s11 + $0xb68] ss:$28 sps:$4 sm:$0xff]  }
 0x474   :  { %v3043_v27 = vadd.f32 %v3021_v15, %v2993_v21  ;;  %v7959_v6 = vld [vmem:[%s11074_s11 + $0xb34] ss:$28 sps:$4 sm:$0xff]   ;;  %v7965_v12 = vld [vmem:[%s11074_s11 + $0xb6c] ss:$28 sps:$4 sm:$0xff]   ;;  %v2875_v17 = vadd.f32 %v2874_v8, %v2873_v2  ;;  %v7968_v13 = vld [vmem:[%s11074_s11 + $0xb9c] ss:$28 sps:$4 sm:$0xff]  }
 0x475   :  { %v3050_v25 = vmul.f32 0.2, %v3042_v49  ;;  %v3045_v28 = vadd.f32 %v3029_v18, %v2995_v24  ;;  %v7957_v9 = vld [vmem:[%s11074_s11 + $0xb30] ss:$28 sps:$4 sm:$0xff]   ;;  %v7971_v14 = vld [vmem:[%s11074_s11 + $0xba4] ss:$28 sps:$4 sm:$0xff]  }
 0x476   :  { %v3051_v32 = vmul.f32 0.2, %v3043_v27  ;;  %6034 = vmatpush1.bf16.msra.mxu1 %v7924_v29  ;;  %6198 = vmatpush1.bf16.msra.mxu0 %v7927_v23  ;;  %v2888_v15 = vmul.f32 0.125, %v2875_v17  ;;  %v7966_v16 = vld [vmem:[%s11074_s11 + $0xb98] ss:$28 sps:$4 sm:$0xff]  }
 0x477   :  { %v3053_v36 = vmul.f32 0.2, %v3045_v28  ;;  %6035 = vmatprep.subr.bf16.mxu1 %v7932_v22  ;;  %6199 = vmatprep.subr.bf16.mxu0 %v7935_v31  ;;  %v3058_v20 = vmax.f32 %v3042_v49, %v3050_v25  ;;  %v7969_v18 = vld [vmem:[%s11074_s11 + $0xba0] ss:$28 sps:$4 sm:$0xff]   ;;  %v7974_v49 = vld [vmem:[%s11074_s11 + $0xbd4] ss:$28 sps:$4 sm:$0xff]  }
 0x478   :  { %v3059_v46 = vmax.f32 %v3043_v27, %v3051_v32  ;;  %v2896_v21 = vadd.f32 1e-05, %v2888_v15  ;;  %v7972_v29 = vld [vmem:[%s11074_s11 + $0xbd0] ss:$28 sps:$4 sm:$0xff]   ;;  %v7975_v23 = vld [vmem:[%s11074_s11 + $0xbd8] ss:$28 sps:$4 sm:$0xff]  }
 0x479   :  { %v3061_v47 = vmax.f32 %v3045_v28, %v3053_v36  ;;  %v10226_v58 = vpack.c.bf16 %v3058_v20, %v3058_v20  ;;  %v7980_v24 = vld [vmem:[%s11074_s11 + $0xc0c] ss:$28 sps:$4 sm:$0xff]   ;;  %v7983_v22 = vld [vmem:[%s11074_s11 + $0xc14] ss:$28 sps:$4 sm:$0xff]   ;;  %v7986_v27 = vld [vmem:[%s11074_s11 + $0xc44] ss:$28 sps:$4 sm:$0xff]  }
 0x47a   :  { %6036 = vmatpush1.bf16.msra.mxu1 %v7930_v37  ;;  %6200 = vmatpush1.bf16.msra.mxu0 %v7933_v34  ;;  %v10218_v55 = vpack.c.bf16 %v3059_v46, %v3059_v46  ;;  %8314 = vrsqrt.f32 %v2896_v21  ;;  %v7978_v31 = vld [vmem:[%s11074_s11 + $0xc08] ss:$28 sps:$4 sm:$0xff]   ;;  %v7981_v25 = vld [vmem:[%s11074_s11 + $0xc10] ss:$28 sps:$4 sm:$0xff]   ;;  %v7984_v37 = vld [vmem:[%s11074_s11 + $0xc40] ss:$28 sps:$4 sm:$0xff]  }
 0x47b   :  { %6046 = vmatprep.subr.bf16.mxu1 %v7938_v43  ;;  %6210 = vmatprep.subr.bf16.mxu0 %v7941_v45  ;;  %v10238_v26 = vpack.c.bf16 %v3061_v47, %v3061_v47  ;;  %v7989_v28 = vld [vmem:[%s11074_s11 + $0xc4c] ss:$28 sps:$4 sm:$0xff]   ;;  %v10333_v32 = vsub.s32 6, %v8565_v38  ;;  %v7992_v34 = vld [vmem:[%s11074_s11 + $0xc7c] ss:$28 sps:$4 sm:$0xff]   ;;  %v8330_v45 = vld [vmem:[%s11075_s9] sm:$0xff] }
 0x47c   :  { %6037 = vmatprep.mubr.bf16.mxu1 %v10218_v55  ;;  %6201 = vmatprep.mubr.bf16.mxu0 %v10218_v55  ;;  %v7995_v36 = vld [vmem:[%s11074_s11 + $0xc84] ss:$28 sps:$4 sm:$0xff]   ;;  %v7990_v43 = vld [vmem:[%s11074_s11 + $0xc78] ss:$28 sps:$4 sm:$0xff]   ;;  %v8013_v2 = vld [vmem:[%s11074_s11 + $0xd2c] ss:$28 sps:$4 sm:$0xff]  }
 0x47d   :  { %6038 = vmatmul.mubr.bf16.vlgmr.msra.gmra.mrb[8].mxu1 %v10226_v58  ;;  %6202 = vmatmul.mubr.bf16.vlgmr.msra.gmra.mrb[20].mxu0 %v10226_v58  ;;  %v7993_v38 = vld [vmem:[%s11074_s11 + $0xc80] ss:$28 sps:$4 sm:$0xff]   ;;  %v2935_v20 = vrot.slane %v8330_v45, %v10333_v32  ;;  %v7998_v46 = vld [vmem:[%s11074_s11 + $0xcb4] ss:$28 sps:$4 sm:$0xff]   ;;  %v8028_v15 = vld [vmem:[%s11074_s11 + $0xdcc] ss:$28 sps:$4 sm:$0xff]  }
 0x47e   :  { %6047 = vmatpush1.bf16.msra.mxu1 %v7936_v56  ;;  %6211 = vmatpush1.bf16.msra.mxu0 %v7939_v57  ;;  %v8001_v47 = vld [vmem:[%s11074_s11 + $0xcbc] ss:$28 sps:$4 sm:$0xff]   ;;  %v7996_v56 = vld [vmem:[%s11074_s11 + $0xcb0] ss:$28 sps:$4 sm:$0xff]  }
 0x47f   :  { %6078 = vmatprep.mubr.bf16.mxu1 %v10238_v26  ;;  %6242 = vmatprep.mubr.bf16.mxu0 %v10238_v26  ;;  %v7999_v57 = vld [vmem:[%s11074_s11 + $0xcb8] ss:$28 sps:$4 sm:$0xff]   ;;  %v8051_v45 = vld [vmem:[%s11074_s11 + $0xc0] ss:$28 sps:$4 sm:$0xff]  }
 0x480   :  { %6048 = vmatprep.subr.bf16.mxu1 %v7944_v59  ;;  %6212 = vmatprep.subr.bf16.mxu0 %v7947_v63  ;;  %v8004_v63 = vld [vmem:[%s11074_s11 + $0xcec] ss:$28 sps:$4 sm:$0xff]   ;;  %v8007_v33 = vld [vmem:[%s11074_s11 + $0xcf4] ss:$28 sps:$4 sm:$0xff]  }
 0x481   :  { %v8022_v17 = vld [vmem:[%s11074_s11 + $0xd94] ss:$28 sps:$4 sm:$0xff]  }
 0x482   :  { %6049 = vmatpush1.bf16.msra.mxu1 %v7942_v35  ;;  %6213 = vmatpush1.bf16.msra.mxu0 %v7945_v39  ;;  %v8002_v35 = vld [vmem:[%s11074_s11 + $0xce8] ss:$28 sps:$4 sm:$0xff]   ;;  %v8005_v39 = vld [vmem:[%s11074_s11 + $0xcf0] ss:$28 sps:$4 sm:$0xff]  }
 0x483   :  { %6050 = vmatprep.subr.bf16.mxu1 %v7950_v60  ;;  %6214 = vmatprep.subr.bf16.mxu0 %v7953_v41  ;;  %v8010_v41 = vld [vmem:[%s11074_s11 + $0xd24] ss:$28 sps:$4 sm:$0xff]   ;;  %v8034_v21 = vld [vmem:[%s11074_s11 + $0x14] ss:$28 sps:$4 sm:$0xff]  }
 0x484   :  { %v8315_v48 = vpop.eup %8314 }
 0x485   :  { %v2954_v59 = vmul.f32 %v8315_v48, %v2935_v20  ;;  %v8054_v20 = vld [vmem:[%s11074_s11 + $0xf4] ss:$28 sps:$4 sm:$0xff]  }
 0x486   :  { %6051 = vmatpush1.bf16.msra.mxu1 %v7948_v3  ;;  %6215 = vmatpush1.bf16.msra.mxu0 %v7951_v4  ;;  %v8008_v3 = vld [vmem:[%s11074_s11 + $0xd20] ss:$28 sps:$4 sm:$0xff]   ;;  %v8011_v4 = vld [vmem:[%s11074_s11 + $0xd28] ss:$28 sps:$4 sm:$0xff]   ;;  %v8056_v48 = vld [vmem:[%s11074_s11 + $0xf8] ss:$28 sps:$4 sm:$0xff]  }
 0x487   :  { %6052 = vmatprep.subr.bf16.mxu1 %v7956_v5  ;;  %6216 = vmatprep.subr.bf16.mxu0 %v7959_v6  ;;  %v2983_v60 = vrot.slane %v2954_v59, %v8568_v40  ;;  %v8331_v6 = vld [vmem:[%s11076_s10] sm:$0xff] }
 0x488   :  { %v3025_v8 = vrot.slane %v8331_v6, %v10333_v32  ;;  %v8057_v59 = vld [vmem:[%s11074_s11 + $0x128] ss:$28 sps:$4 sm:$0xff]   ;;  %v8075_v6 = vld [vmem:[%s11074_s11 + $0x558] ss:$28 sps:$4 sm:$0xff]  }
 0x489   :  { %v2994_v5 = vmul.f32 %v2983_v60, %v10170_v51  ;;  %v8014_v51 = vld [vmem:[%s11074_s11 + $0xd58] ss:$28 sps:$4 sm:$0xff]   ;;  %v8066_v60 = vld [vmem:[%s11074_s11 + $0x168] ss:$28 sps:$4 sm:$0xff]  }
 0x48a   :  { %6053 = vmatpush1.bf16.msra.mxu1 %v7954_v61  ;;  %6217 = vmatpush1.bf16.msra.mxu0 %v7957_v9  ;;  %v8016_v61 = vld [vmem:[%s11074_s11 + $0xd5c] ss:$28 sps:$4 sm:$0xff]   ;;  %v8019_v9 = vld [vmem:[%s11074_s11 + $0xd64] ss:$28 sps:$4 sm:$0xff]  }
 0x48b   :  { %6054 = vmatprep.subr.bf16.mxu1 %v7962_v10  ;;  %6218 = vmatprep.subr.bf16.mxu0 %v7965_v12  ;;  %v8017_v10 = vld [vmem:[%s11074_s11 + $0xd60] ss:$28 sps:$4 sm:$0xff]   ;;  %v3044_v12 = vadd.f32 %v3025_v8, %v2994_v5  ;;  %v8074_v5 = vld [vmem:[%s11074_s11 + $0x1d4] ss:$28 sps:$4 sm:$0xff]  }
 0x48c   :  { %v8072_v8 = vld [vmem:[%s11074_s11 + $0x1d0] ss:$28 sps:$4 sm:$0xff]  }
 0x48e   :  { %6055 = vmatpush1.bf16.msra.mxu1 %v7960_v50  ;;  %6219 = vmatpush1.bf16.msra.mxu0 %v7963_v53  ;;  %v8025_v50 = vld [vmem:[%s11074_s11 + $0xd9c] ss:$28 sps:$4 sm:$0xff]   ;;  %v8020_v53 = vld [vmem:[%s11074_s11 + $0xd90] ss:$28 sps:$4 sm:$0xff]  }
 0x48f   :  { %6056 = vmatprep.subr.bf16.mxu1 %v7968_v13  ;;  %6220 = vmatprep.subr.bf16.mxu0 %v7971_v14  ;;  %v8023_v13 = vld [vmem:[%s11074_s11 + $0xd98] ss:$28 sps:$4 sm:$0xff]   ;;  %v3052_v14 = vmul.f32 0.2, %v3044_v12 }
 0x492   :  { %6057 = vmatpush1.bf16.msra.mxu1 %v7966_v16  ;;  %6221 = vmatpush1.bf16.msra.mxu0 %v7969_v18  ;;  %v8031_v16 = vld [vmem:[%s11074_s11 + $0xdd4] ss:$28 sps:$4 sm:$0xff]   ;;  %v8026_v18 = vld [vmem:[%s11074_s11 + $0xdc8] ss:$28 sps:$4 sm:$0xff]  }
 0x493   :  { %6058 = vmatprep.subr.bf16.mxu1 %v7974_v49  ;;  %6222 = vmatprep.subr.bf16.mxu0 %v7977_v19  ;;  %v8029_v49 = vld [vmem:[%s11074_s11 + $0xdd0] ss:$28 sps:$4 sm:$0xff]   ;;  %v3060_v19 = vmax.f32 %v3044_v12, %v3052_v14  ;;  %v8089_v14 = vld [vmem:[%s11074_s11 + $0x27c] ss:$28 sps:$4 sm:$0xff]  }
 0x494   :  { %v8081_v12 = vld [vmem:[%s11074_s11 + $0x3d0] ss:$28 sps:$4 sm:$0xff]  }
 0x496   :  { %6059 = vmatpush1.bf16.msra.mxu1 %v7972_v29  ;;  %6223 = vmatpush1.bf16.msra.mxu0 %v7975_v23  ;;  %v8035_v29 = vld [vmem:[%s11074_s11 + $0x1d8] ss:$28 sps:$4 sm:$0xff]   ;;  %v8032_v23 = vld [vmem:[%s11074_s11 + $0x10] ss:$28 sps:$4 sm:$0xff]  }
 0x497   :  { %6060 = vmatprep.subr.bf16.mxu1 %v7980_v24  ;;  %6224 = vmatprep.subr.bf16.mxu0 %v7983_v22  ;;  %v10438_v24 = vpack.c.bf16 %v3060_v19, %v3060_v19  ;;  %v8036_v22 = vld [vmem:[%s11074_s11 + $0x18] ss:$28 sps:$4 sm:$0xff]  }
 0x498   :  { %v8095_v19 = vld [vmem:[%s11074_s11 + $0x638] ss:$28 sps:$4 sm:$0xff]  }
 0x49a   :  { %6061 = vmatpush1.bf16.msra.mxu1 %v7978_v31  ;;  %6225 = vmatpush1.bf16.msra.mxu0 %v7981_v25  ;;  %v8039_v31 = vld [vmem:[%s11074_s11 + $0x4c] ss:$28 sps:$4 sm:$0xff]  }
 0x49b   :  { %6062 = vmatprep.subr.bf16.mxu1 %v7986_v27  ;;  %6226 = vmatprep.subr.bf16.mxu0 %v7989_v28  ;;  %v8040_v25 = vld [vmem:[%s11074_s11 + $0x210] ss:$28 sps:$4 sm:$0xff]   ;;  %v8037_v27 = vld [vmem:[%s11074_s11 + $0x48] ss:$28 sps:$4 sm:$0xff]  }
 0x49c   :  { %v8041_v28 = vld [vmem:[%s11074_s11 + $0x50] ss:$28 sps:$4 sm:$0xff]  }
 0x49e   :  { %6063 = vmatpush1.bf16.msra.mxu1 %v7984_v37  ;;  %6227 = vmatpush1.bf16.msra.mxu0 %v7987_v30  ;;  %v8044_v37 = vld [vmem:[%s11074_s11 + $0x84] ss:$28 sps:$4 sm:$0xff]  }
 0x49f   :  { %6064 = vmatprep.subr.bf16.mxu1 %v7992_v34  ;;  %6228 = vmatprep.subr.bf16.mxu0 %v7995_v36  ;;  %v8045_v30 = vld [vmem:[%s11074_s11 + $0x248] ss:$28 sps:$4 sm:$0xff]   ;;  %v8042_v34 = vld [vmem:[%s11074_s11 + $0x80] ss:$28 sps:$4 sm:$0xff]  }
 0x4a0   :  { %v8049_v36 = vld [vmem:[%s11074_s11 + $0xbc] ss:$28 sps:$4 sm:$0xff]  }
 0x4a2   :  { %6065 = vmatpush1.bf16.msra.mxu1 %v7990_v43  ;;  %6229 = vmatpush1.bf16.msra.mxu0 %v7993_v38  ;;  %v8050_v43 = vld [vmem:[%s11074_s11 + $0x280] ss:$28 sps:$4 sm:$0xff]   ;;  %v8047_v38 = vld [vmem:[%s11074_s11 + $0xb8] ss:$28 sps:$4 sm:$0xff]  }
 0x4a3   :  { %6066 = vmatprep.subr.bf16.mxu1 %v7998_v46  ;;  %6230 = vmatprep.subr.bf16.mxu0 %v8001_v47  ;;  %v8055_v46 = vld [vmem:[%s11074_s11 + $0x2b8] ss:$28 sps:$4 sm:$0xff]   ;;  %v8052_v47 = vld [vmem:[%s11074_s11 + $0xf0] ss:$28 sps:$4 sm:$0xff]  }
 0x4a6   :  { %6067 = vmatpush1.bf16.msra.mxu1 %v7996_v56  ;;  %6231 = vmatpush1.bf16.msra.mxu0 %v7999_v57  ;;  %v8059_v56 = vld [vmem:[%s11074_s11 + $0x12c] ss:$28 sps:$4 sm:$0xff]  }
 0x4a7   :  { %6068 = vmatprep.subr.bf16.mxu1 %v8004_v63  ;;  %6232 = vmatprep.subr.bf16.mxu0 %v8007_v33  ;;  %v8060_v57 = vld [vmem:[%s11074_s11 + $0x2f0] ss:$28 sps:$4 sm:$0xff]   ;;  %v8064_v33 = vld [vmem:[%s11074_s11 + $0x164] ss:$28 sps:$4 sm:$0xff]  }
 0x4a8   :  { %v8061_v63 = vld [vmem:[%s11074_s11 + $0x130] ss:$28 sps:$4 sm:$0xff]  }
 0x4aa   :  { %6069 = vmatpush1.bf16.msra.mxu1 %v8002_v35  ;;  %6233 = vmatpush1.bf16.msra.mxu0 %v8005_v39  ;;  %v8065_v35 = vld [vmem:[%s11074_s11 + $0x328] ss:$28 sps:$4 sm:$0xff]   ;;  %v8062_v39 = vld [vmem:[%s11074_s11 + $0x160] ss:$28 sps:$4 sm:$0xff]  }
 0x4ab   :  { %6070 = vmatprep.subr.bf16.mxu1 %v8010_v41  ;;  %6234 = vmatprep.subr.bf16.mxu0 %v8013_v2  ;;  %v8069_v41 = vld [vmem:[%s11074_s11 + $0x19c] ss:$28 sps:$4 sm:$0xff]  }
 0x4ac   :  { %v8070_v2 = vld [vmem:[%s11074_s11 + $0x360] ss:$28 sps:$4 sm:$0xff]  }
 0x4ae   :  { %6071 = vmatpush1.bf16.msra.mxu1 %v8008_v3  ;;  %6235 = vmatpush1.bf16.msra.mxu0 %v8011_v4  ;;  %v8067_v3 = vld [vmem:[%s11074_s11 + $0x198] ss:$28 sps:$4 sm:$0xff]   ;;  %v8071_v4 = vld [vmem:[%s11074_s11 + $0x1a0] ss:$28 sps:$4 sm:$0xff]  }
 0x4af   :  { %6072 = vmatprep.subr.bf16.mxu1 %v8016_v61  ;;  %6236 = vmatprep.subr.bf16.mxu0 %v8019_v9  ;;  %v8076_v61 = vld [vmem:[%s11074_s11 + $0x398] ss:$28 sps:$4 sm:$0xff]   ;;  %v8079_v9 = vld [vmem:[%s11074_s11 + $0x20c] ss:$28 sps:$4 sm:$0xff]  }
 0x4b2   :  { %6073 = vmatpush1.bf16.msra.mxu1 %v8014_v51  ;;  %6237 = vmatpush1.bf16.msra.mxu0 %v8017_v10  ;;  %v8080_v51 = vld [vmem:[%s11074_s11 + $0x590] ss:$28 sps:$4 sm:$0xff]   ;;  %v8077_v10 = vld [vmem:[%s11074_s11 + $0x208] ss:$28 sps:$4 sm:$0xff]  }
 0x4b3   :  { %6074 = vmatprep.subr.bf16.mxu1 %v8022_v17  ;;  %6238 = vmatprep.subr.bf16.mxu0 %v8025_v50  ;;  %v8084_v17 = vld [vmem:[%s11074_s11 + $0x244] ss:$28 sps:$4 sm:$0xff]  }
 0x4b4   :  { %v8085_v50 = vld [vmem:[%s11074_s11 + $0x5c8] ss:$28 sps:$4 sm:$0xff]  }
 0x4b6   :  { %6075 = vmatpush1.bf16.msra.mxu1 %v8020_v53  ;;  %6239 = vmatpush1.bf16.msra.mxu0 %v8023_v13  ;;  %v8082_v53 = vld [vmem:[%s11074_s11 + $0x240] ss:$28 sps:$4 sm:$0xff]   ;;  %v8086_v13 = vld [vmem:[%s11074_s11 + $0x408] ss:$28 sps:$4 sm:$0xff]  }
 0x4b7   :  { %6076 = vmatprep.subr.bf16.mxu1 %v8028_v15  ;;  %6240 = vmatprep.subr.bf16.mxu0 %v8031_v16  ;;  %v8090_v15 = vld [vmem:[%s11074_s11 + $0x600] ss:$28 sps:$4 sm:$0xff]   ;;  %v8087_v16 = vld [vmem:[%s11074_s11 + $0x278] ss:$28 sps:$4 sm:$0xff]  }
 0x4ba   :  { %6077 = vmatpush1.bf16.msra.mxu1 %v8026_v18  ;;  %6241 = vmatpush1.bf16.msra.mxu0 %v8029_v49  ;;  %v8091_v18 = vld [vmem:[%s11074_s11 + $0x440] ss:$28 sps:$4 sm:$0xff]   ;;  %v8094_v49 = vld [vmem:[%s11074_s11 + $0x2b4] ss:$28 sps:$4 sm:$0xff]  }
 0x4bb   :  { %6251 = vmatprep.subr.bf16.mxu1 %v8034_v21  ;;  %7379 = vmatprep.subr.bf16.mxu0 %v8035_v29  ;;  %v8092_v21 = vld [vmem:[%s11074_s11 + $0x2b0] ss:$28 sps:$4 sm:$0xff]   ;;  %v8096_v29 = vld [vmem:[%s11074_s11 + $0x478] ss:$28 sps:$4 sm:$0xff]  }
 0x4bd   :  { %6079 = vmatmul.mubr.bf16.vlgmr.msra.gmra.mrb[8].mxu1 %v10438_v24  ;;  %6243 = vmatmul.mubr.bf16.vlgmr.msra.gmra.mrb[20].mxu0 %v10438_v24 }
 0x4be   :  { %6252 = vmatpush1.bf16.msra.mxu1 %v8032_v23  ;;  %6283 = vmatprep.mubr.bf16.mxu1 %v9768_v7  ;;  %v8099_v23 = vld [vmem:[%s11074_s11 + $0x2ec] ss:$28 sps:$4 sm:$0xff]  }
 0x4bf   :  { %7380 = vmatpush3.bf16.msra.mxu0 %v8036_v22  ;;  %6447 = vmatprep.mubr.bf16.mxu0 %v9768_v7  ;;  %v8046_v7 = vld [vmem:[%s11074_s11 + $0x88] ss:$28 sps:$4 sm:$0xff]   ;;  %v8100_v22 = vld [vmem:[%s11074_s11 + $0x670] ss:$28 sps:$4 sm:$0xff]  }
 0x4c0   :  { %6253 = vmatprep.subr.bf16.mxu1 %v8039_v31  ;;  %7381 = vmatprep.subr.bf16.mxu0 %v8040_v25  ;;  %v8097_v31 = vld [vmem:[%s11074_s11 + $0x2e8] ss:$28 sps:$4 sm:$0xff]   ;;  %v8101_v25 = vld [vmem:[%s11074_s11 + $0x4b0] ss:$28 sps:$4 sm:$0xff]  }
 0x4c2   :  { %6254 = vmatpush1.bf16.msra.mxu1 %v8037_v27  ;;  %v8104_v27 = vld [vmem:[%s11074_s11 + $0x324] ss:$28 sps:$4 sm:$0xff]  }
 0x4c3   :  { %7382 = vmatpush3.bf16.msra.mxu0 %v8041_v28  ;;  %6255 = vmatprep.subr.bf16.mxu1 %v8044_v37  ;;  %v8105_v28 = vld [vmem:[%s11074_s11 + $0x6a8] ss:$28 sps:$4 sm:$0xff]   ;;  %v8102_v37 = vld [vmem:[%s11074_s11 + $0x320] ss:$28 sps:$4 sm:$0xff]  }
 0x4c4   :  { %7383 = vmatprep.subr.bf16.mxu0 %v8045_v30  ;;  %v8106_v30 = vld [vmem:[%s11074_s11 + $0x4e8] ss:$28 sps:$4 sm:$0xff]  }
 0x4c6   :  { %6256 = vmatpush1.bf16.msra.mxu1 %v8042_v34  ;;  %v8109_v34 = vld [vmem:[%s11074_s11 + $0x35c] ss:$28 sps:$4 sm:$0xff]  }
 0x4c7   :  { %7384 = vmatpush3.bf16.msra.mxu0 %v8046_v7  ;;  %6257 = vmatprep.subr.bf16.mxu1 %v8049_v36  ;;  %v8110_v7 = vld [vmem:[%s11074_s11 + $0x6e0] ss:$28 sps:$4 sm:$0xff]   ;;  %v8107_v36 = vld [vmem:[%s11074_s11 + $0x358] ss:$28 sps:$4 sm:$0xff]  }
 0x4c8   :  { %7385 = vmatprep.subr.bf16.mxu0 %v8050_v43  ;;  %v8111_v43 = vld [vmem:[%s11074_s11 + $0x520] ss:$28 sps:$4 sm:$0xff]  }
 0x4ca   :  { %6258 = vmatpush1.bf16.msra.mxu1 %v8047_v38  ;;  %v8114_v38 = vld [vmem:[%s11074_s11 + $0x394] ss:$28 sps:$4 sm:$0xff]  }
 0x4cb   :  { %7386 = vmatpush3.bf16.msra.mxu0 %v8051_v45  ;;  %6259 = vmatprep.subr.bf16.mxu1 %v8054_v20  ;;  %v8115_v45 = vld [vmem:[%s11074_s11 + $0x8d8] ss:$28 sps:$4 sm:$0xff]   ;;  %v8112_v20 = vld [vmem:[%s11074_s11 + $0x390] ss:$28 sps:$4 sm:$0xff]  }
 0x4cc   :  { %7387 = vmatprep.subr.bf16.mxu0 %v8055_v46  ;;  %v8116_v46 = vld [vmem:[%s11074_s11 + $0x718] ss:$28 sps:$4 sm:$0xff]  }
 0x4ce   :  { %6260 = vmatpush1.bf16.msra.mxu1 %v8052_v47  ;;  %v8119_v47 = vld [vmem:[%s11074_s11 + $0x3cc] ss:$28 sps:$4 sm:$0xff]  }
 0x4cf   :  { %7388 = vmatpush3.bf16.msra.mxu0 %v8056_v48  ;;  %6261 = vmatprep.subr.bf16.mxu1 %v8059_v56  ;;  %v8120_v48 = vld [vmem:[%s11074_s11 + $0x910] ss:$28 sps:$4 sm:$0xff]   ;;  %v8117_v56 = vld [vmem:[%s11074_s11 + $0x3c8] ss:$28 sps:$4 sm:$0xff]  }
 0x4d0   :  { %7389 = vmatprep.subr.bf16.mxu0 %v8060_v57  ;;  %v8121_v57 = vld [vmem:[%s11074_s11 + $0x750] ss:$28 sps:$4 sm:$0xff]  }
 0x4d2   :  { %6262 = vmatpush1.bf16.msra.mxu1 %v8057_v59  ;;  %v8125_v59 = vld [vmem:[%s11074_s11 + $0x948] ss:$28 sps:$4 sm:$0xff]  }
 0x4d3   :  { %7390 = vmatpush3.bf16.msra.mxu0 %v8061_v63  ;;  %6263 = vmatprep.subr.bf16.mxu1 %v8064_v33  ;;  %v8126_v63 = vld [vmem:[%s11074_s11 + $0x788] ss:$28 sps:$4 sm:$0xff]   ;;  %v8129_v33 = vld [vmem:[%s11074_s11 + $0x43c] ss:$28 sps:$4 sm:$0xff]  }
 0x4d4   :  { %7391 = vmatprep.subr.bf16.mxu0 %v8065_v35  ;;  %v8130_v35 = vld [vmem:[%s11074_s11 + $0x980] ss:$28 sps:$4 sm:$0xff]  }
 0x4d6   :  { %6264 = vmatpush1.bf16.msra.mxu1 %v8062_v39  ;;  %v8127_v39 = vld [vmem:[%s11074_s11 + $0x438] ss:$28 sps:$4 sm:$0xff]  }
 0x4d7   :  { %7392 = vmatpush3.bf16.msra.mxu0 %v8066_v60  ;;  %6265 = vmatprep.subr.bf16.mxu1 %v8069_v41  ;;  %v8131_v60 = vld [vmem:[%s11074_s11 + $0x7c0] ss:$28 sps:$4 sm:$0xff]   ;;  %v8134_v41 = vld [vmem:[%s11074_s11 + $0x474] ss:$28 sps:$4 sm:$0xff]  }
 0x4d8   :  { %7393 = vmatprep.subr.bf16.mxu0 %v8070_v2  ;;  %v8135_v2 = vld [vmem:[%s11074_s11 + $0x9b8] ss:$28 sps:$4 sm:$0xff]  }
 0x4da   :  { %6266 = vmatpush1.bf16.msra.mxu1 %v8067_v3  ;;  %v8132_v3 = vld [vmem:[%s11074_s11 + $0x470] ss:$28 sps:$4 sm:$0xff]  }
 0x4db   :  { %7394 = vmatpush3.bf16.msra.mxu0 %v8071_v4  ;;  %6267 = vmatprep.subr.bf16.mxu1 %v8074_v5  ;;  %v8136_v4 = vld [vmem:[%s11074_s11 + $0x7f8] ss:$28 sps:$4 sm:$0xff]   ;;  %v8139_v5 = vld [vmem:[%s11074_s11 + $0x4ac] ss:$28 sps:$4 sm:$0xff]  }
 0x4dc   :  { %7401 = vmatprep.subr.bf16.mxu0 %v8075_v6  ;;  %v8140_v6 = vld [vmem:[%s11074_s11 + $0x9f0] ss:$28 sps:$4 sm:$0xff]  }
 0x4de   :  { %6448 = vmatmul.mubr.bf16.vlgmr.msra.gmra.mrb[24].mxu0 %v9776_v62  ;;  %6268 = vmatpush1.bf16.msra.mxu1 %v8072_v8  ;;  %v8137_v8 = vld [vmem:[%s11074_s11 + $0x4a8] ss:$28 sps:$4 sm:$0xff]  }
 0x4df   :  { %7402 = vmatpush3.bf16.msra.mxu0 %v8076_v61  ;;  %6487 = vmatprep.mubr.bf16.mxu0 %v9788_v11  ;;  %v8141_v61 = vld [vmem:[%s11074_s11 + $0x830] ss:$28 sps:$4 sm:$0xff]  }
 0x4e0   :  { %6269 = vmatprep.subr.bf16.mxu1 %v8079_v9  ;;  %7403 = vmatprep.subr.bf16.mxu0 %v8080_v51  ;;  %v8144_v9 = vld [vmem:[%s11074_s11 + $0x4e4] ss:$28 sps:$4 sm:$0xff]  }
 0x4e1   :  { %v8145_v51 = vld [vmem:[%s11074_s11 + $0xa28] ss:$28 sps:$4 sm:$0xff]  }
 0x4e2   :  { %6270 = vmatpush1.bf16.msra.mxu1 %v8077_v10  ;;  %v8142_v10 = vld [vmem:[%s11074_s11 + $0x4e0] ss:$28 sps:$4 sm:$0xff]  }
 0x4e3   :  { %7404 = vmatpush3.bf16.msra.mxu0 %v8081_v12  ;;  %6271 = vmatprep.subr.bf16.mxu1 %v8084_v17  ;;  %v8146_v12 = vld [vmem:[%s11074_s11 + $0x868] ss:$28 sps:$4 sm:$0xff]   ;;  %v8149_v17 = vld [vmem:[%s11074_s11 + $0x51c] ss:$28 sps:$4 sm:$0xff]  }
 0x4e4   :  { %7405 = vmatprep.subr.bf16.mxu0 %v8085_v50  ;;  %v8150_v50 = vld [vmem:[%s11074_s11 + $0xa60] ss:$28 sps:$4 sm:$0xff]  }
 0x4e6   :  { %6272 = vmatpush1.bf16.msra.mxu1 %v8082_v53  ;;  %v8147_v53 = vld [vmem:[%s11074_s11 + $0x518] ss:$28 sps:$4 sm:$0xff]  }
 0x4e7   :  { %7406 = vmatpush3.bf16.msra.mxu0 %v8086_v13  ;;  %6273 = vmatprep.subr.bf16.mxu1 %v8089_v14  ;;  %v8151_v13 = vld [vmem:[%s11074_s11 + $0x8a0] ss:$28 sps:$4 sm:$0xff]   ;;  %v8154_v14 = vld [vmem:[%s11074_s11 + $0x554] ss:$28 sps:$4 sm:$0xff]  }
 0x4e8   :  { %7407 = vmatprep.subr.bf16.mxu0 %v8090_v15  ;;  %v8155_v15 = vld [vmem:[%s11074_s11 + $0xc58] ss:$28 sps:$4 sm:$0xff]  }
 0x4ea   :  { %6274 = vmatpush1.bf16.msra.mxu1 %v8087_v16  ;;  %v8152_v16 = vld [vmem:[%s11074_s11 + $0x550] ss:$28 sps:$4 sm:$0xff]  }
 0x4eb   :  { %7408 = vmatpush3.bf16.msra.mxu0 %v8091_v18  ;;  %6275 = vmatprep.subr.bf16.mxu1 %v8094_v49  ;;  %v8156_v18 = vld [vmem:[%s11074_s11 + $0xa98] ss:$28 sps:$4 sm:$0xff]   ;;  %v8159_v49 = vld [vmem:[%s11074_s11 + $0x58c] ss:$28 sps:$4 sm:$0xff]  }
 0x4ec   :  { %7409 = vmatprep.subr.bf16.mxu0 %v8095_v19  ;;  %v8160_v19 = vld [vmem:[%s11074_s11 + $0xc90] ss:$28 sps:$4 sm:$0xff]  }
 0x4ee   :  { %6276 = vmatpush1.bf16.msra.mxu1 %v8092_v21  ;;  %v8157_v21 = vld [vmem:[%s11074_s11 + $0x588] ss:$28 sps:$4 sm:$0xff]  }
 0x4ef   :  { %7410 = vmatpush3.bf16.msra.mxu0 %v8096_v29  ;;  %6277 = vmatprep.subr.bf16.mxu1 %v8099_v23  ;;  %v8161_v29 = vld [vmem:[%s11074_s11 + $0xad0] ss:$28 sps:$4 sm:$0xff]   ;;  %v8164_v23 = vld [vmem:[%s11074_s11 + $0x5c4] ss:$28 sps:$4 sm:$0xff]  }
 0x4f0   :  { %7411 = vmatprep.subr.bf16.mxu0 %v8100_v22  ;;  %v8165_v22 = vld [vmem:[%s11074_s11 + $0xcc8] ss:$28 sps:$4 sm:$0xff]  }
 0x4f2   :  { %6278 = vmatpush1.bf16.msra.mxu1 %v8097_v31  ;;  %v8162_v31 = vld [vmem:[%s11074_s11 + $0x5c0] ss:$28 sps:$4 sm:$0xff]  }
 0x4f3   :  { %7412 = vmatpush3.bf16.msra.mxu0 %v8101_v25  ;;  %6279 = vmatprep.subr.bf16.mxu1 %v8104_v27  ;;  %v8166_v25 = vld [vmem:[%s11074_s11 + $0xb08] ss:$28 sps:$4 sm:$0xff]   ;;  %v8169_v27 = vld [vmem:[%s11074_s11 + $0x5fc] ss:$28 sps:$4 sm:$0xff]  }
 0x4f4   :  { %7413 = vmatprep.subr.bf16.mxu0 %v8105_v28  ;;  %v8170_v28 = vld [vmem:[%s11074_s11 + $0xd00] ss:$28 sps:$4 sm:$0xff]  }
 0x4f6   :  { %6280 = vmatpush1.bf16.msra.mxu1 %v8102_v37  ;;  %v8167_v37 = vld [vmem:[%s11074_s11 + $0x5f8] ss:$28 sps:$4 sm:$0xff]  }
 0x4f7   :  { %7414 = vmatpush3.bf16.msra.mxu0 %v8106_v30  ;;  %6281 = vmatprep.subr.bf16.mxu1 %v8109_v34  ;;  %v8171_v30 = vld [vmem:[%s11074_s11 + $0xb40] ss:$28 sps:$4 sm:$0xff]   ;;  %v8174_v34 = vld [vmem:[%s11074_s11 + $0x634] ss:$28 sps:$4 sm:$0xff]  }
 0x4f8   :  { %7415 = vmatprep.subr.bf16.mxu0 %v8110_v7  ;;  %v8175_v7 = vld [vmem:[%s11074_s11 + $0xd38] ss:$28 sps:$4 sm:$0xff]  }
 0x4fa   :  { %6282 = vmatpush1.bf16.msra.mxu1 %v8107_v36  ;;  %v8172_v36 = vld [vmem:[%s11074_s11 + $0x630] ss:$28 sps:$4 sm:$0xff]  }
 0x4fb   :  { %7416 = vmatpush3.bf16.msra.mxu0 %v8111_v43  ;;  %6292 = vmatprep.subr.bf16.mxu1 %v8114_v38  ;;  %v8176_v43 = vld [vmem:[%s11074_s11 + $0xb78] ss:$28 sps:$4 sm:$0xff]   ;;  %v8179_v38 = vld [vmem:[%s11074_s11 + $0x66c] ss:$28 sps:$4 sm:$0xff]  }
 0x4fc   :  { %7423 = vmatprep.subr.bf16.mxu0 %v8115_v45  ;;  %v8180_v45 = vld [vmem:[%s11074_s11 + $0xd70] ss:$28 sps:$4 sm:$0xff]  }
 0x4fd   :  { %6284 = vmatmul.mubr.bf16.vlgmr.msra.gmra.mrb[12].mxu1 %v9776_v62  ;;  %v8124_v62 = vld [vmem:[%s11074_s11 + $0x404] ss:$28 sps:$4 sm:$0xff]  }
 0x4fe   :  { %6488 = vmatmul.mubr.bf16.vlgmr.msra.gmra.mrb[28].mxu0 %v9984_v44  ;;  %6293 = vmatpush1.bf16.msra.mxu1 %v8112_v20  ;;  %v8177_v20 = vld [vmem:[%s11074_s11 + $0x668] ss:$28 sps:$4 sm:$0xff]  }
 0x4ff   :  { %6324 = vmatprep.mubr.bf16.mxu1 %v9788_v11  ;;  %7424 = vmatpush3.bf16.msra.mxu0 %v8116_v46  ;;  %v8122_v11 = vld [vmem:[%s11074_s11 + $0x400] ss:$28 sps:$4 sm:$0xff]   ;;  %v8181_v46 = vld [vmem:[%s11074_s11 + $0xbb0] ss:$28 sps:$4 sm:$0xff]  }
 0x500   :  { %6527 = vmatprep.mubr.bf16.mxu0 %v10218_v55  ;;  %6294 = vmatprep.subr.bf16.mxu1 %v8119_v47  ;;  %v8184_v47 = vld [vmem:[%s11074_s11 + $0x6a4] ss:$28 sps:$4 sm:$0xff]  }
 0x501   :  { %7425 = vmatprep.subr.bf16.mxu0 %v8120_v48  ;;  %v8185_v48 = vld [vmem:[%s11074_s11 + $0xda8] ss:$28 sps:$4 sm:$0xff]  }
 0x502   :  { %6295 = vmatpush1.bf16.msra.mxu1 %v8117_v56  ;;  %v8182_v56 = vld [vmem:[%s11074_s11 + $0x6a0] ss:$28 sps:$4 sm:$0xff]  }
 0x503   :  { %7426 = vmatpush3.bf16.msra.mxu0 %v8121_v57  ;;  %6296 = vmatprep.subr.bf16.mxu1 %v8124_v62  ;;  %v8186_v57 = vld [vmem:[%s11074_s11 + $0xbe8] ss:$28 sps:$4 sm:$0xff]   ;;  %v8189_v62 = vld [vmem:[%s11074_s11 + $0x6dc] ss:$28 sps:$4 sm:$0xff]  }
 0x504   :  { %7427 = vmatprep.subr.bf16.mxu0 %v8125_v59  ;;  %v8190_v59 = vld [vmem:[%s11074_s11 + $0xde0] ss:$28 sps:$4 sm:$0xff]  }
 0x506   :  { %6297 = vmatpush1.bf16.msra.mxu1 %v8122_v11  ;;  %v8187_v11 = vld [vmem:[%s11074_s11 + $0x6d8] ss:$28 sps:$4 sm:$0xff]  }
 0x507   :  { %7428 = vmatpush3.bf16.msra.mxu0 %v8126_v63  ;;  %6298 = vmatprep.subr.bf16.mxu1 %v8129_v33  ;;  %v8191_v63 = vld [vmem:[%s11074_s11 + $0xc20] ss:$28 sps:$4 sm:$0xff]   ;;  %v8194_v33 = vld [vmem:[%s11074_s11 + $0x714] ss:$28 sps:$4 sm:$0xff]  }
 0x508   :  { %7429 = vmatprep.subr.bf16.mxu0 %v8130_v35  ;;  %v8192_v35 = vld [vmem:[%s11074_s11 + $0x710] ss:$28 sps:$4 sm:$0xff]  }
 0x50a   :  { %6299 = vmatpush1.bf16.msra.mxu1 %v8127_v39  ;;  %v8197_v39 = vld [vmem:[%s11074_s11 + $0x74c] ss:$28 sps:$4 sm:$0xff]  }
 0x50b   :  { %7430 = vmatpush3.bf16.msra.mxu0 %v8131_v60  ;;  %6300 = vmatprep.subr.bf16.mxu1 %v8134_v41  ;;  %v8195_v60 = vld [vmem:[%s11074_s11 + $0x748] ss:$28 sps:$4 sm:$0xff]  }
 0x50c   :  { %7431 = vmatprep.subr.bf16.mxu0 %v8135_v2  ;;  %v8200_v41 = vld [vmem:[%s11074_s11 + $0x784] ss:$28 sps:$4 sm:$0xff]  }
 0x50d   :  { %v8198_v2 = vld [vmem:[%s11074_s11 + $0x780] ss:$28 sps:$4 sm:$0xff]  }
 0x50e   :  { %6301 = vmatpush1.bf16.msra.mxu1 %v8132_v3  ;;  %v8206_v3 = vld [vmem:[%s11074_s11 + $0x7f4] ss:$28 sps:$4 sm:$0xff]  }
 0x50f   :  { %7432 = vmatpush3.bf16.msra.mxu0 %v8136_v4  ;;  %6302 = vmatprep.subr.bf16.mxu1 %v8139_v5  ;;  %v8204_v4 = vld [vmem:[%s11074_s11 + $0x7f0] ss:$28 sps:$4 sm:$0xff]  }
 0x510   :  { %7433 = vmatprep.subr.bf16.mxu0 %v8140_v6  ;;  %v8209_v5 = vld [vmem:[%s11074_s11 + $0x82c] ss:$28 sps:$4 sm:$0xff]  }
 0x511   :  { %v8207_v6 = vld [vmem:[%s11074_s11 + $0x828] ss:$28 sps:$4 sm:$0xff]  }
 0x512   :  { %6303 = vmatpush1.bf16.msra.mxu1 %v8137_v8  ;;  %v8212_v8 = vld [vmem:[%s11074_s11 + $0x864] ss:$28 sps:$4 sm:$0xff]  }
 0x513   :  { %7434 = vmatpush3.bf16.msra.mxu0 %v8141_v61  ;;  %6304 = vmatprep.subr.bf16.mxu1 %v8144_v9  ;;  %v8210_v61 = vld [vmem:[%s11074_s11 + $0x860] ss:$28 sps:$4 sm:$0xff]  }
 0x514   :  { %7435 = vmatprep.subr.bf16.mxu0 %v8145_v51  ;;  %v8215_v9 = vld [vmem:[%s11074_s11 + $0x89c] ss:$28 sps:$4 sm:$0xff]  }
 0x515   :  { %v8213_v51 = vld [vmem:[%s11074_s11 + $0x898] ss:$28 sps:$4 sm:$0xff]  }
 0x516   :  { %6305 = vmatpush1.bf16.msra.mxu1 %v8142_v10  ;;  %v8218_v10 = vld [vmem:[%s11074_s11 + $0x8d4] ss:$28 sps:$4 sm:$0xff]  }
 0x517   :  { %7436 = vmatpush3.bf16.msra.mxu0 %v8146_v12  ;;  %6306 = vmatprep.subr.bf16.mxu1 %v8149_v17  ;;  %v8216_v12 = vld [vmem:[%s11074_s11 + $0x8d0] ss:$28 sps:$4 sm:$0xff]  }
 0x518   :  { %7437 = vmatprep.subr.bf16.mxu0 %v8150_v50  ;;  %v8221_v17 = vld [vmem:[%s11074_s11 + $0x90c] ss:$28 sps:$4 sm:$0xff]  }
 0x519   :  { %v8219_v50 = vld [vmem:[%s11074_s11 + $0x908] ss:$28 sps:$4 sm:$0xff]  }
 0x51a   :  { %6307 = vmatpush1.bf16.msra.mxu1 %v8147_v53  ;;  %v8224_v53 = vld [vmem:[%s11074_s11 + $0x944] ss:$28 sps:$4 sm:$0xff]  }
 0x51b   :  { %7438 = vmatpush3.bf16.msra.mxu0 %v8151_v13  ;;  %6308 = vmatprep.subr.bf16.mxu1 %v8154_v14  ;;  %v8222_v13 = vld [vmem:[%s11074_s11 + $0x940] ss:$28 sps:$4 sm:$0xff]  }
 0x51c   :  { %7445 = vmatprep.subr.bf16.mxu0 %v8155_v15  ;;  %v8227_v14 = vld [vmem:[%s11074_s11 + $0x97c] ss:$28 sps:$4 sm:$0xff]  }
 0x51d   :  { %v8225_v15 = vld [vmem:[%s11074_s11 + $0x978] ss:$28 sps:$4 sm:$0xff]  }
 0x51e   :  { %6528 = vmatmul.mubr.bf16.vlgmr.msra.gmra.mrb[32].mxu0 %v10226_v58  ;;  %6309 = vmatpush1.bf16.msra.mxu1 %v8152_v16  ;;  %v8230_v16 = vld [vmem:[%s11074_s11 + $0x9b4] ss:$28 sps:$4 sm:$0xff]  }
 0x51f   :  { %7446 = vmatpush3.bf16.msra.mxu0 %v8156_v18  ;;  %6567 = vmatprep.mubr.bf16.mxu0 %v10238_v26  ;;  %v8228_v18 = vld [vmem:[%s11074_s11 + $0x9b0] ss:$28 sps:$4 sm:$0xff]  }
 0x520   :  { %6310 = vmatprep.subr.bf16.mxu1 %v8159_v49  ;;  %7447 = vmatprep.subr.bf16.mxu0 %v8160_v19  ;;  %v8233_v49 = vld [vmem:[%s11074_s11 + $0x9ec] ss:$28 sps:$4 sm:$0xff]  }
 0x521   :  { %v8231_v19 = vld [vmem:[%s11074_s11 + $0x9e8] ss:$28 sps:$4 sm:$0xff]  }
 0x522   :  { %6311 = vmatpush1.bf16.msra.mxu1 %v8157_v21  ;;  %v8236_v21 = vld [vmem:[%s11074_s11 + $0xa24] ss:$28 sps:$4 sm:$0xff]  }
 0x523   :  { %7448 = vmatpush3.bf16.msra.mxu0 %v8161_v29  ;;  %6312 = vmatprep.subr.bf16.mxu1 %v8164_v23  ;;  %v8234_v29 = vld [vmem:[%s11074_s11 + $0xa20] ss:$28 sps:$4 sm:$0xff]  }
 0x524   :  { %7449 = vmatprep.subr.bf16.mxu0 %v8165_v22  ;;  %v8239_v23 = vld [vmem:[%s11074_s11 + $0xa5c] ss:$28 sps:$4 sm:$0xff]  }
 0x525   :  { %v8237_v22 = vld [vmem:[%s11074_s11 + $0xa58] ss:$28 sps:$4 sm:$0xff]  }
 0x526   :  { %6313 = vmatpush1.bf16.msra.mxu1 %v8162_v31  ;;  %v8242_v31 = vld [vmem:[%s11074_s11 + $0xa94] ss:$28 sps:$4 sm:$0xff]  }
 0x527   :  { %7450 = vmatpush3.bf16.msra.mxu0 %v8166_v25  ;;  %6314 = vmatprep.subr.bf16.mxu1 %v8169_v27  ;;  %v8240_v25 = vld [vmem:[%s11074_s11 + $0xa90] ss:$28 sps:$4 sm:$0xff]  }
 0x528   :  { %7451 = vmatprep.subr.bf16.mxu0 %v8170_v28  ;;  %v8245_v27 = vld [vmem:[%s11074_s11 + $0xacc] ss:$28 sps:$4 sm:$0xff]  }
 0x529   :  { %v8243_v28 = vld [vmem:[%s11074_s11 + $0xac8] ss:$28 sps:$4 sm:$0xff]  }
 0x52a   :  { %6315 = vmatpush1.bf16.msra.mxu1 %v8167_v37  ;;  %v8248_v37 = vld [vmem:[%s11074_s11 + $0xb04] ss:$28 sps:$4 sm:$0xff]  }
 0x52b   :  { %7452 = vmatpush3.bf16.msra.mxu0 %v8171_v30  ;;  %6316 = vmatprep.subr.bf16.mxu1 %v8174_v34  ;;  %v8246_v30 = vld [vmem:[%s11074_s11 + $0xb00] ss:$28 sps:$4 sm:$0xff]   ;;  %v8254_v34 = vld [vmem:[%s11074_s11 + $0xb74] ss:$28 sps:$4 sm:$0xff]  }
 0x52c   :  { %7453 = vmatprep.subr.bf16.mxu0 %v8175_v7  ;;  %v8252_v7 = vld [vmem:[%s11074_s11 + $0xb70] ss:$28 sps:$4 sm:$0xff]  }
 0x52e   :  { %6317 = vmatpush1.bf16.msra.mxu1 %v8172_v36  ;;  %v10961_v36 = vld [vmem:[%s11077_s12] sm:$0x7f] }
 0x52f   :  { %7454 = vmatpush3.bf16.msra.mxu0 %v8176_v43  ;;  %6318 = vmatprep.subr.bf16.mxu1 %v8179_v38  ;;  %v8257_v43 = vld [vmem:[%s11074_s11 + $0xbac] ss:$28 sps:$4 sm:$0xff]   ;;  %v3587_v38 = vrot.slane %v10961_v36, %v8568_v40 }
 0x530   :  { %7455 = vmatprep.subr.bf16.mxu0 %v8180_v45  ;;  %v3595_v45 = vrot.slane %v10961_v36, %v9083_v0 }
 0x532   :  { %6319 = vmatpush1.bf16.msra.mxu1 %v8177_v20  ;;  %v3591_v20 = vrot.slane %v10961_v36, %v8574_v42 }
 0x533   :  { %7456 = vmatpush3.bf16.msra.mxu0 %v8181_v46  ;;  %6320 = vmatprep.subr.bf16.mxu1 %v8184_v47  ;;  %v3599_v46 = vrot.slane %v10961_v36, %v9086_v1  ;;  %v8255_v47 = vld [vmem:[%s11074_s11 + $0xba8] ss:$28 sps:$4 sm:$0xff]   ;;  %v8258_v1 = vld [vmem:[%s11074_s11 + $0xbe0] ss:$28 sps:$4 sm:$0xff]  }
 0x534   :  { %7457 = vmatprep.subr.bf16.mxu0 %v8185_v48  ;;  %v8260_v48 = vld [vmem:[%s11074_s11 + $0xbe4] ss:$28 sps:$4 sm:$0xff]  }
 0x536   :  { %6321 = vmatpush1.bf16.msra.mxu1 %v8182_v56 }
 0x537   :  { %7458 = vmatpush3.bf16.msra.mxu0 %v8186_v57  ;;  %6322 = vmatprep.subr.bf16.mxu1 %v8189_v62 }
 0x538   :  { %7459 = vmatprep.subr.bf16.mxu0 %v8190_v59 }
 0x53a   :  { %6323 = vmatpush1.bf16.msra.mxu1 %v8187_v11 }
 0x53b   :  { %7460 = vmatpush3.bf16.msra.mxu0 %v8191_v63  ;;  %6333 = vmatprep.subr.bf16.mxu1 %v8194_v33 }
 0x53d   :  { %6325 = vmatmul.mubr.bf16.vlgmr.msra.gmra.mrb[12].mxu1 %v9984_v44  ;;  %v8203_v44 = vld [vmem:[%s11074_s11 + $0x7bc] ss:$28 sps:$4 sm:$0xff]  }
 0x53e   :  { %6568 = vmatmul.mubr.bf16.vlgmr.msra.gmra.mrb[36].mxu0 %v10438_v24  ;;  %6334 = vmatpush1.bf16.msra.mxu1 %v8192_v35 }
 0x53f   :  { %6365 = vmatprep.mubr.bf16.mxu1 %v10218_v55  ;;  %6335 = vmatprep.subr.bf16.mxu1 %v8197_v39  ;;  %v8201_v55 = vld [vmem:[%s11074_s11 + $0x7b8] ss:$28 sps:$4 sm:$0xff]  }
 0x542   :  { %6336 = vmatpush1.bf16.msra.mxu1 %v8195_v60  ;;  %v8263_v60 = vld [vmem:[%s11074_s11 + $0xc1c] ss:$28 sps:$4 sm:$0xff]  }
 0x543   :  { %6337 = vmatprep.subr.bf16.mxu1 %v8200_v41  ;;  %v8261_v41 = vld [vmem:[%s11074_s11 + $0xc18] ss:$28 sps:$4 sm:$0xff]  }
 0x546   :  { %6338 = vmatpush1.bf16.msra.mxu1 %v8198_v2  ;;  %v8266_v2 = vld [vmem:[%s11074_s11 + $0xc54] ss:$28 sps:$4 sm:$0xff]  }
 0x547   :  { %6339 = vmatprep.subr.bf16.mxu1 %v8203_v44  ;;  %v8264_v44 = vld [vmem:[%s11074_s11 + $0xc50] ss:$28 sps:$4 sm:$0xff]  }
 0x54a   :  { %6340 = vmatpush1.bf16.msra.mxu1 %v8201_v55  ;;  %v8269_v55 = vld [vmem:[%s11074_s11 + $0xc8c] ss:$28 sps:$4 sm:$0xff]  }
 0x54b   :  { %6341 = vmatprep.subr.bf16.mxu1 %v8206_v3 }
 0x54e   :  { %6342 = vmatpush1.bf16.msra.mxu1 %v8204_v4 }
 0x54f   :  { %6343 = vmatprep.subr.bf16.mxu1 %v8209_v5  ;;  %v8267_v5 = vld [vmem:[%s11074_s11 + $0xc88] ss:$28 sps:$4 sm:$0xff]  }
 0x552   :  { %6344 = vmatpush1.bf16.msra.mxu1 %v8207_v6 }
 0x553   :  { %6345 = vmatprep.subr.bf16.mxu1 %v8212_v8  ;;  %v8272_v8 = vld [vmem:[%s11074_s11 + $0xcc4] ss:$28 sps:$4 sm:$0xff]  }
 0x556   :  { %6346 = vmatpush1.bf16.msra.mxu1 %v8210_v61 }
 0x557   :  { %6347 = vmatprep.subr.bf16.mxu1 %v8215_v9  ;;  %v8270_v9 = vld [vmem:[%s11074_s11 + $0xcc0] ss:$28 sps:$4 sm:$0xff]  }
 0x55a   :  { %6348 = vmatpush1.bf16.msra.mxu1 %v8213_v51  ;;  %v8275_v51 = vld [vmem:[%s11074_s11 + $0xcfc] ss:$28 sps:$4 sm:$0xff]  }
 0x55b   :  { %6349 = vmatprep.subr.bf16.mxu1 %v8218_v10  ;;  %v8273_v10 = vld [vmem:[%s11074_s11 + $0xcf8] ss:$28 sps:$4 sm:$0xff]  }
 0x55e   :  { %6350 = vmatpush1.bf16.msra.mxu1 %v8216_v12  ;;  %v8278_v12 = vld [vmem:[%s11074_s11 + $0xd34] ss:$28 sps:$4 sm:$0xff]  }
 0x55f   :  { %6351 = vmatprep.subr.bf16.mxu1 %v8221_v17  ;;  %v8276_v17 = vld [vmem:[%s11074_s11 + $0xd30] ss:$28 sps:$4 sm:$0xff]  }
 0x562   :  { %6352 = vmatpush1.bf16.msra.mxu1 %v8219_v50  ;;  %v8281_v50 = vld [vmem:[%s11074_s11 + $0xd6c] ss:$28 sps:$4 sm:$0xff]  }
 0x563   :  { %6353 = vmatprep.subr.bf16.mxu1 %v8224_v53  ;;  %v8279_v53 = vld [vmem:[%s11074_s11 + $0xd68] ss:$28 sps:$4 sm:$0xff]  }
 0x566   :  { %6354 = vmatpush1.bf16.msra.mxu1 %v8222_v13  ;;  %v8284_v13 = vld [vmem:[%s11074_s11 + $0xda4] ss:$28 sps:$4 sm:$0xff]  }
 0x567   :  { %6355 = vmatprep.subr.bf16.mxu1 %v8227_v14 }
 0x56a   :  { %6356 = vmatpush1.bf16.msra.mxu1 %v8225_v15 }
 0x56b   :  { %6357 = vmatprep.subr.bf16.mxu1 %v8230_v16  ;;  %v8282_v16 = vld [vmem:[%s11074_s11 + $0xda0] ss:$28 sps:$4 sm:$0xff]  }
 0x56e   :  { %6358 = vmatpush1.bf16.msra.mxu1 %v8228_v18 }
 0x56f   :  { %6359 = vmatprep.subr.bf16.mxu1 %v8233_v49 }
 0x572   :  { %6360 = vmatpush1.bf16.msra.mxu1 %v8231_v19  ;;  %v8287_v19 = vld [vmem:[%s11074_s11 + $0xddc] ss:$28 sps:$4 sm:$0xff]  }
 0x573   :  { %6361 = vmatprep.subr.bf16.mxu1 %v8236_v21 }
 0x576   :  { %6362 = vmatpush1.bf16.msra.mxu1 %v8234_v29  ;;  %v8285_v29 = vld [vmem:[%s11074_s11 + $0xdd8] ss:$28 sps:$4 sm:$0xff]  }
 0x577   :  { %6363 = vmatprep.subr.bf16.mxu1 %v8239_v23  ;;  %v3611_v23 = vrot.slane %v10961_v36, %v10333_v32 }
 0x57a   :  { %6364 = vmatpush1.bf16.msra.mxu1 %v8237_v22 }
 0x57b   :  { %6374 = vmatprep.subr.bf16.mxu1 %v8242_v31 }
 0x57d   :  { %6366 = vmatmul.mubr.bf16.vlgmr.msra.gmra.mrb[12].mxu1 %v10226_v58  ;;  %v8251_v58 = vld [vmem:[%s11074_s11 + $0xb3c] ss:$28 sps:$4 sm:$0xff]  }
 0x57e   :  { %6375 = vmatpush1.bf16.msra.mxu1 %v8240_v25  ;;  %6406 = vmatprep.mubr.bf16.mxu1 %v10238_v26  ;;  %v8249_v26 = vld [vmem:[%s11074_s11 + $0xb38] ss:$28 sps:$4 sm:$0xff]  }
 0x57f   :  { %6376 = vmatprep.subr.bf16.mxu1 %v8245_v27 }
 0x582   :  { %6377 = vmatpush1.bf16.msra.mxu1 %v8243_v28 }
 0x583   :  { %6378 = vmatprep.subr.bf16.mxu1 %v8248_v37 }
 0x586   :  { %6379 = vmatpush1.bf16.msra.mxu1 %v8246_v30 }
 0x587   :  { %6380 = vmatprep.subr.bf16.mxu1 %v8251_v58 }
 0x58a   :  { %6381 = vmatpush1.bf16.msra.mxu1 %v8249_v26 }
 0x58b   :  { %6382 = vmatprep.subr.bf16.mxu1 %v8254_v34 }
 0x58e   :  { %6383 = vmatpush1.bf16.msra.mxu1 %v8252_v7 }
 0x58f   :  { %6384 = vmatprep.subr.bf16.mxu1 %v8257_v43 }
 0x590   :  { %v6080_v40 = vpop.f32.mrb[8].mxu1  ;;  %v6244_v56 = vpop.f32.mrb[20].mxu0 }
 0x591   :  { %v7467_v57 = vadd.f32 %v6080_v40, %v3587_v38  ;;  %v7469_v0 = vadd.f32 %v6244_v56, %v3595_v45  ;;  %v6082_v62 = vpop.f32.mrb[9].mxu1  ;;  %v6246_v59 = vpop.f32.mrb[21].mxu0  ;;  %v3603_v40 = vrot.slane %v10961_v36, %v10131_v54  ;;  %v3607_v56 = vrot.slane %v10961_v36, %v10134_v52 }
 0x592   :  { %v7468_v11 = vadd.f32 %v6082_v62, %v3591_v20  ;;  %v7470_v42 = vadd.f32 %v6246_v59, %v3599_v46  ;;  %v6084_v63 = vpop.f32.mrb[10].mxu1  ;;  %v6248_v33 = vpop.f32.mrb[22].mxu0  ;;  %6385 = vmatpush1.bf16.msra.mxu1 %v8255_v47 }
 0x593   :  { %8316 = vtanh.f32 %v7467_v57  ;;  %v6085_v35 = vpop.f32.mrb[11].mxu1  ;;  %v6249_v39 = vpop.f32.mrb[23].mxu0  ;;  %6386 = vmatprep.subr.bf16.mxu1 %v8260_v48 }
 0x594   :  { %8318 = vtanh.f32 %v7469_v0 }
 0x595   :  { %8320 = vtanh.f32 %v7468_v11 }
 0x596   :  { %8322 = vtanh.f32 %v7470_v42  ;;  %6387 = vmatpush1.bf16.msra.mxu1 %v8258_v1 }
 0x597   :  { %6388 = vmatprep.subr.bf16.mxu1 %v8263_v60 }
 0x59a   :  { %6389 = vmatpush1.bf16.msra.mxu1 %v8261_v41 }
 0x59b   :  { %6390 = vmatprep.subr.bf16.mxu1 %v8266_v2 }
 0x59d   :  { %v8317_v3 = vpop.eup %8316 }
 0x59e   :  { %v8319_v4 = vpop.eup %8318  ;;  %6582 = vst [vmem:[%s11078_s13] sm:$0xff] %v8317_v3  ;;  %6391 = vmatpush1.bf16.msra.mxu1 %v8264_v44 }
 0x59f   :  { %v8321_v6 = vpop.eup %8320  ;;  %6584 = vst [vmem:[%s11078_s13 + $0x10] sm:$0xff] %v8319_v4  ;;  %6392 = vmatprep.subr.bf16.mxu1 %v8269_v55 }
 0x5a0   :  { %v8323_v61 = vpop.eup %8322  ;;  %6583 = vst [vmem:[%s11078_s13 + $0x8] sm:$0xff] %v8321_v6 }
 0x5a1   :  { %6585 = vst [vmem:[%s11078_s13 + $0x18] sm:$0xff] %v8323_v61 }
 0x5a2   :  { %6393 = vmatpush1.bf16.msra.mxu1 %v8267_v5 }
 0x5a3   :  { %6394 = vmatprep.subr.bf16.mxu1 %v8272_v8 }
 0x5a6   :  { %6395 = vmatpush1.bf16.msra.mxu1 %v8270_v9 }
 0x5a7   :  { %6396 = vmatprep.subr.bf16.mxu1 %v8275_v51 }
 0x5aa   :  { %6397 = vmatpush1.bf16.msra.mxu1 %v8273_v10 }
 0x5ab   :  { %6398 = vmatprep.subr.bf16.mxu1 %v8278_v12 }
 0x5ae   :  { %6399 = vmatpush1.bf16.msra.mxu1 %v8276_v17 }
 0x5af   :  { %6400 = vmatprep.subr.bf16.mxu1 %v8281_v50 }
 0x5b1   :  { %v7395_v14 = vpop.f32.mrb[24].mxu0 }
 0x5b2   :  { %v7396_v15 = vpop.f32.mrb[25].mxu0  ;;  %6401 = vmatpush1.bf16.msra.mxu1 %v8279_v53 }
 0x5b3   :  { %v7397_v18 = vadd.f32 %v7396_v15, %v7395_v14  ;;  %v7398_v49 = vpop.f32.mrb[26].mxu0  ;;  %6402 = vmatprep.subr.bf16.mxu1 %v8284_v13 }
 0x5b4   :  { %v7399_v21 = vpop.f32.mrb[27].mxu0 }
 0x5b5   :  { %v6450_v25 = vadd.f32 %v7397_v18, %v3611_v23 }
 0x5b6   :  { %6403 = vmatpush1.bf16.msra.mxu1 %v8282_v16 }
 0x5b7   :  { %6404 = vmatprep.subr.bf16.mxu1 %v8287_v19 }
 0x5ba   :  { %6405 = vmatpush1.bf16.msra.mxu1 %v8285_v29 }
 0x5bd   :  { %6407 = vmatmul.mubr.bf16.vlgmr.msra.gmra.mrb[12].mxu1 %v10438_v24 }
 0x5d1   :  { %v7417_v22 = vpop.f32.mrb[28].mxu0 }
 0x5d2   :  { %v7418_v31 = vpop.f32.mrb[29].mxu0 }
 0x5d3   :  { %v7419_v27 = vadd.f32 %v7418_v31, %v7417_v22  ;;  %v7420_v28 = vpop.f32.mrb[30].mxu0 }
 0x5d4   :  { %v7421_v37 = vpop.f32.mrb[31].mxu0 }
 0x5d5   :  { %v6490_v30 = vadd.f32 %v7419_v27, %v6450_v25 }
 0x5f1   :  { %v7439_v58 = vpop.f32.mrb[32].mxu0 }
 0x5f2   :  { %v7440_v26 = vpop.f32.mrb[33].mxu0 }
 0x5f3   :  { %v7441_v34 = vadd.f32 %v7440_v26, %v7439_v58  ;;  %v7442_v7 = vpop.f32.mrb[34].mxu0 }
 0x5f4   :  { %v7443_v43 = vpop.f32.mrb[35].mxu0 }
 0x5f5   :  { %v6530_v38 = vadd.f32 %v7441_v34, %v6490_v30 }
 0x611   :  { %v7461_v45 = vpop.f32.mrb[36].mxu0 }
 0x612   :  { %v7462_v20 = vpop.f32.mrb[37].mxu0 }
 0x613   :  { %v7463_v46 = vadd.f32 %v7462_v20, %v7461_v45  ;;  %v7464_v24 = vpop.f32.mrb[38].mxu0 }
 0x614   :  { %v7465_v47 = vpop.f32.mrb[39].mxu0 }
 0x615   :  { %v6570_v48 = vadd.f32 %v7463_v46, %v6530_v38 }
 0x617   :  { %8324 = vtanh.f32 %v6570_v48 }
 0x621   :  { %v8325_v32 = vpop.eup %8324 }
 0x622   :  { %6589 = vst.msk [vmem:[%s11078_s13 + $0x30] sm:$0xff] %vm6588_vm1, %v8325_v32 }
 0x690   :  { %v6408_v57 = vpop.f32.mrb[12].mxu1 }
 0x691   :  { %v7471_v0 = vadd.f32 %v6408_v57, %v3603_v40  ;;  %v6410_v62 = vpop.f32.mrb[13].mxu1 }
 0x692   :  { %v7472_v59 = vadd.f32 %v6410_v62, %v3607_v56  ;;  %v6412_v11 = vpop.f32.mrb[14].mxu1 }
 0x693   :  { %8326 = vtanh.f32 %v7471_v0  ;;  %v6413_v42 = vpop.f32.mrb[15].mxu1 }
 0x694   :  { %8328 = vtanh.f32 %v7472_v59 }
 0x69d   :  { %v8327_v63 = vpop.eup %8326 }
 0x69e   :  { %v8329_v33 = vpop.eup %8328  ;;  %6586 = vst [vmem:[%s11078_s13 + $0x20] sm:$0xff] %v8327_v63 }
 0x69f   :  { %6587 = vst [vmem:[%s11078_s13 + $0x28] sm:$0xff] %v8329_v33 }

</bundles_post_ra>
